<compile_context>
chip_gen: v5e
topology: v5e:2x2
jax: 0.10.0
libtpu: 0.0.40
codegen_flags: <defaults>
</compile_context>

<pallas_src>
import jax
import jax.numpy as jnp
from jax import lax
from jax.experimental import pallas as pl
from jax.experimental.pallas import tpu as pltpu


def _round_up(x, m):
    return ((x + m - 1) // m) * m


_VMEM = pl.BlockSpec(memory_space=pltpu.MemorySpace.VMEM)


# --------------------------------------------------------------------------
# Fused Pallas kernel: GRU encoder + (implicit) concat + both twin critic heads
# --------------------------------------------------------------------------

def fused_critic_kernel(x_ref, wih_ref, whh_ref, bih_ref, bhh_ref,
                        bs_ref, db_ref, act_ref,
                        w1h_ref, w1bs_ref, w1db_ref, w1act_ref, b1_ref,
                        w2_ref, b2_ref, w3_ref, b3_ref, w4_ref, b4_ref,
                        w5_ref, b5_ref,
                        out_ref, gi_scr):
    """x_ref: (T*Bp, E) time-major embedded context (flattened leading dims).
    GRU weights are per-gate padded to Hp=round_up(H,128); MLP weights hold both
    heads (block-diagonal, 128-padded). out_ref: (Bp, 128) with q1 in col 0, q2 in col 1.
    """
    f32 = jnp.float32
    TB, _ = x_ref.shape
    Hp = wih_ref.shape[1] // 3
    Bp = out_ref.shape[0]
    T = TB // Bp

    # ---- GRU: input projection (and b_ih) hoisted out of the recurrence ----
    gi_scr[...] = (jnp.dot(x_ref[...], wih_ref[...], preferred_element_type=f32)
                   + bih_ref[...])                                   # (T*Bp, 3Hp)

    w_hh = whh_ref[...]
    b_hh = bhh_ref[...]

    def step(t, h):                                                  # h: (Bp, Hp) in vregs
        row = pl.multiple_of(t * Bp, Bp)
        gi = gi_scr[pl.ds(row, Bp), :]                               # (Bp, 3Hp)
        gh = jnp.dot(h, w_hh, preferred_element_type=f32) + b_hh     # (Bp, 3Hp)
        r = jax.nn.sigmoid(gi[:, 0:Hp] + gh[:, 0:Hp])
        z = jax.nn.sigmoid(gi[:, Hp:2 * Hp] + gh[:, Hp:2 * Hp])
        n = jnp.tanh(gi[:, 2 * Hp:3 * Hp] + r * gh[:, 2 * Hp:3 * Hp])
        return (1.0 - z) * n + z * h

    h = lax.fori_loop(0, T, step, jnp.zeros((Bp, Hp), f32))          # ctx_summary (padded)

    # ---- sa = cat([h, bs, db, act]) folded into the split first-layer matmul ----
    h1 = (jnp.dot(h, w1h_ref[...], preferred_element_type=f32)
          + jnp.dot(bs_ref[...], w1bs_ref[...], preferred_element_type=f32)
          + jnp.dot(db_ref[...], w1db_ref[...], preferred_element_type=f32)
          + jnp.dot(act_ref[...], w1act_ref[...], preferred_element_type=f32)
          + b1_ref[...])                                             # q11/q21: no relu
    h2 = jax.nn.relu(jnp.dot(h1, w2_ref[...], preferred_element_type=f32) + b2_ref[...])
    h3 = jax.nn.relu(jnp.dot(h2, w3_ref[...], preferred_element_type=f32) + b3_ref[...])
    h4 = jax.nn.relu(jnp.dot(h3, w4_ref[...], preferred_element_type=f32) + b4_ref[...])
    out_ref[...] = jnp.dot(h4, w5_ref[...], preferred_element_type=f32) + b5_ref[...]


# --------------------------------------------------------------------------
# Wrapper (jitted glue: batch pad, time-major embedding gather, pallas_call)
# --------------------------------------------------------------------------

@jax.jit
def _fused_forward(ctx_tokens, bs_label, db_label, act, emb_table,
                   gru_params, mlp_params):
    B, T = ctx_tokens.shape
    Bp = _round_up(max(B, 8), 8)                  # full sublane multiple
    E = emb_table.shape[1]

    ctx_p = jnp.pad(ctx_tokens, ((0, Bp - B), (0, 0)))
    # Gather directly in time-major (T, Bp) order: no transpose of embedded activations.
    x_flat = jnp.take(emb_table, ctx_p.T, axis=0).reshape(T * Bp, E)
    pad_b = lambda a: jnp.pad(a, ((0, Bp - B), (0, 0)))

    w_ih, w_hh, b_ih, b_hh = gru_params
    (w1h, w1bs, w1db, w1act, b1), (w2, b2), (w3, b3), (w4, b4), (w5, b5) = mlp_params
    out_w = b5.shape[1]

    out = pl.pallas_call(
        fused_critic_kernel,
        out_shape=jax.ShapeDtypeStruct((Bp, out_w), jnp.float32),
        in_specs=[_VMEM] * 21,
        out_specs=_VMEM,
        scratch_shapes=[pltpu.VMEM((T * Bp, w_ih.shape[1]), jnp.float32)],
        compiler_params=pltpu.CompilerParams(vmem_limit_bytes=32 * 1024 * 1024),
    )(x_flat, w_ih, w_hh, b_ih, b_hh,
      pad_b(bs_label), pad_b(db_label), pad_b(act),
      w1h, w1bs, w1db, w1act, b1, w2, b2, w3, b3, w4, b4, w5, b5)
    return out[:B]                                # (B, 128): col 0 = q1, col 1 = q2


# --------------------------------------------------------------------------
# RecurrentCritic (word_plas=False) in JAX + Pallas
# --------------------------------------------------------------------------

class RecurrentCriticPallas:
    def __init__(self, key, vocab_size, emb_dim, state_dim,
                 bs_size, db_size, action_dim):
        self.emb_dim = emb_dim
        self.state_dim = state_dim
        self.bs_size = bs_size
        self.db_size = db_size
        self.action_dim = action_dim
        self.input_dim = state_dim + bs_size + db_size + action_dim

        keys = iter(jax.random.split(key, 64))

        def lin(in_f, out_f, scale=0.1):
            w = scale * jax.random.normal(next(keys), (in_f, out_f), jnp.float32)
            b = scale * jax.random.normal(next(keys), (1, out_f), jnp.float32)
            return (w, b)

        # ----- unpadded "torch layout (transposed)" parameters (also used by reference) ----
        self.emb_table = 0.1 * jax.random.normal(next(keys), (vocab_size, emb_dim), jnp.float32)
        self.w_ih = 0.1 * jax.random.normal(next(keys), (emb_dim, 3 * state_dim), jnp.float32)
        self.w_hh = 0.1 * jax.random.normal(next(keys), (state_dim, 3 * state_dim), jnp.float32)
        self.b_ih = 0.1 * jax.random.normal(next(keys), (1, 3 * state_dim), jnp.float32)
        self.b_hh = 0.1 * jax.random.normal(next(keys), (1, 3 * state_dim), jnp.float32)

        widths = [self.input_dim, 500, 300, 100, 20, 1]
        self.head1 = [lin(widths[i], widths[i + 1]) for i in range(5)]
        self.head2 = [lin(widths[i], widths[i + 1]) for i in range(5)]

        self._build_fused_params()

    # ---- build the padded / fused parameter set consumed by the kernel ----
    def _build_fused_params(self):
        f32 = jnp.float32
        H = self.state_dim
        Hp = _round_up(H, 128)
        self.Hp = Hp

        def pad_gates(w):  # (in, 3H) -> (in, 3Hp), each gate padded to Hp lanes
            parts = [jnp.pad(w[:, g * H:(g + 1) * H], ((0, 0), (0, Hp - H)))
                     for g in range(3)]
            return jnp.concatenate(parts, axis=1)

        p_w_ih = pad_gates(self.w_ih)
        p_w_hh = pad_gates(jnp.pad(self.w_hh, ((0, Hp - H), (0, 0))))
        p_b_ih = pad_gates(self.b_ih)
        p_b_hh = pad_gates(self.b_hh)
        self.gru_params = (p_w_ih, p_w_hh, p_b_ih, p_b_hh)

        # MLP widths padded to lane multiples; both heads fused.
        D1, D2, D3, D4 = (_round_up(d, 128) for d in (500, 300, 100, 20))
        OUTW = 128   # lane-dense output: q1 -> col 0, q2 -> col 1, rest zero

        def cat_cols(wa, wb, outp):   # heads side by side along output axis, zero padded
            pa = jnp.pad(wa, ((0, 0), (0, outp - wa.shape[1])))
            pb = jnp.pad(wb, ((0, 0), (0, outp - wb.shape[1])))
            return jnp.concatenate([pa, pb], axis=1)

        def blockdiag(wa, wb, inp, outp):  # block-diagonal so heads stay independent
            blk = jnp.zeros((2 * inp, 2 * outp), f32)
            blk = blk.at[:wa.shape[0], :wa.shape[1]].set(wa)
            blk = blk.at[inp:inp + wb.shape[0], outp:outp + wb.shape[1]].set(wb)
            return blk

        BS, DB = self.bs_size, self.db_size
        (w1a, b1a), (w2a, b2a), (w3a, b3a), (w4a, b4a), (w5a, b5a) = self.head1
        (w1b, b1b), (w2b, b2b), (w3b, b3b), (w4b, b4b), (w5b, b5b) = self.head2

        def split1(w):  # layer-1 rows correspond to cat([h, bs, db, act])
            return (w[:H], w[H:H + BS], w[H + BS:H + BS + DB], w[H + BS + DB:])

        h_a, bs_a, db_a, act_a = split1(w1a)
        h_b, bs_b, db_b, act_b = split1(w1b)
        w1h = jnp.pad(cat_cols(h_a, h_b, D1), ((0, Hp - H), (0, 0)))   # (Hp, 2*D1)
        w1bs = cat_cols(bs_a, bs_b, D1)
        w1db = cat_cols(db_a, db_b, D1)
        w1act = cat_cols(act_a, act_b, D1)
        b1 = cat_cols(b1a, b1b, D1)

        w2 = blockdiag(w2a, w2b, D1, D2); b2 = cat_cols(b2a, b2b, D2)
        w3 = blockdiag(w3a, w3b, D2, D3); b3 = cat_cols(b3a, b3b, D3)
        w4 = blockdiag(w4a, w4b, D3, D4); b4 = cat_cols(b4a, b4b, D4)

        w5 = jnp.zeros((2 * D4, OUTW), f32)
        w5 = w5.at[:w5a.shape[0], 0:1].set(w5a)
        w5 = w5.at[D4:D4 + w5b.shape[0], 1:2].set(w5b)
        b5 = jnp.zeros((1, OUTW), f32)
        b5 = b5.at[0, 0].set(b5a[0, 0]).at[0, 1].set(b5b[0, 0])

        self.mlp_params = ((w1h, w1bs, w1db, w1act, b1),
                           (w2, b2), (w3, b3), (w4, b4), (w5, b5))

    # ---- public API mirroring the torch module ----
    def forward(self, ctx_tokens, bs_label, db_label, act):
        out = _fused_forward(ctx_tokens, bs_label, db_label, act,
                             self.emb_table, self.gru_params, self.mlp_params)
        return out[:, 0:1], out[:, 1:2]

    def q1(self, ctx_tokens, bs_label, db_label, act):
        out = _fused_forward(ctx_tokens, bs_label, db_label, act,
                             self.emb_table, self.gru_params, self.mlp_params)
        return out[:, 0:1]

    # ---- pure-JAX (unpadded, unfused) reference of the original module ----
    def reference_forward(self, ctx_tokens, bs_label, db_label, act):
        H = self.state_dim
        hp = jax.lax.Precision.HIGHEST
        x = jnp.take(self.emb_table, ctx_tokens, axis=0)        # (B, T, E)
        B = x.shape[0]

        def gru_step(h, x_t):
            gi = jnp.dot(x_t, self.w_ih, precision=hp) + self.b_ih
            gh = jnp.dot(h, self.w_hh, precision=hp) + self.b_hh
            r = jax.nn.sigmoid(gi[:, :H] + gh[:, :H])
            z = jax.nn.sigmoid(gi[:, H:2 * H] + gh[:, H:2 * H])
            n = jnp.tanh(gi[:, 2 * H:] + r * gh[:, 2 * H:])
            return (1.0 - z) * n + z * h, None

        h, _ = lax.scan(gru_step, jnp.zeros((B, H), jnp.float32),
                        jnp.transpose(x, (1, 0, 2)))
        sa = jnp.concatenate([h, bs_label, db_label, act], axis=1)

        def head(params):
            v = sa
            for li, (w, b) in enumerate(params):
                v = jnp.dot(v, w, precision=hp) + b
                if 1 <= li <= 3:                 # relu after q12/q13/q14 only
                    v = jax.nn.relu(v)
            return v

        return head(self.head1), head(self.head2)


# --------------------------------------------------------------------------
# Demo
# --------------------------------------------------------------------------

if __name__ == "__main__":
    B, T = 2, 8            # batch, context length
    VOCAB, E = 50, 16      # vocab, embedding dim
    H = 32                 # state_dim (utt_encoder output size)
    BS, DB, A = 12, 6, 10  # bs_size, db_size, action_dim (y_size)

    key = jax.random.PRNGKey(0)
    k_model, k_ctx, k_bs, k_db, k_act = jax.random.split(key, 5)

    critic = RecurrentCriticPallas(k_model, VOCAB, E, H, BS, DB, A)

    ctx = jax.random.randint(k_ctx, (B, T), 0, VOCAB, dtype=jnp.int32)
    bs_label = jax.random.uniform(k_bs, (B, BS), jnp.float32)
    db_label = jax.random.uniform(k_db, (B, DB), jnp.float32)
    act = jax.random.normal(k_act, (B, A), jnp.float32)

    q1, q2 = critic.forward(ctx, bs_label, db_label, act)
    q1_only = critic.q1(ctx, bs_label, db_label, act)
    jax.block_until_ready((q1, q2, q1_only))

    assert q1.shape == (B, 1) and q2.shape == (B, 1)
    assert q1.dtype == jnp.float32 and q2.dtype == jnp.float32

    # Correctness check against the pure-JAX unpadded/unfused reference.
    r1, r2 = critic.reference_forward(ctx, bs_label, db_label, act)
    assert jnp.allclose(q1, r1, rtol=1e-2, atol=1e-2)
    assert jnp.allclose(q2, r2, rtol=1e-2, atol=1e-2)
    assert jnp.allclose(q1_only, r1, rtol=1e-2, atol=1e-2)

    print("KERNEL_OK")
</pallas_src>

<mosaic_0001>
module attributes {stable_mosaic.version = 11 : i64} {
  func.func @fused_critic_kernel(%arg0: memref<64x16xf32, #tpu.memory_space<vmem>>, %arg1: memref<16x384xf32, #tpu.memory_space<vmem>>, %arg2: memref<128x384xf32, #tpu.memory_space<vmem>>, %arg3: memref<1x384xf32, #tpu.memory_space<vmem>>, %arg4: memref<1x384xf32, #tpu.memory_space<vmem>>, %arg5: memref<8x12xf32, #tpu.memory_space<vmem>>, %arg6: memref<8x6xf32, #tpu.memory_space<vmem>>, %arg7: memref<8x10xf32, #tpu.memory_space<vmem>>, %arg8: memref<128x1024xf32, #tpu.memory_space<vmem>>, %arg9: memref<12x1024xf32, #tpu.memory_space<vmem>>, %arg10: memref<6x1024xf32, #tpu.memory_space<vmem>>, %arg11: memref<10x1024xf32, #tpu.memory_space<vmem>>, %arg12: memref<1x1024xf32, #tpu.memory_space<vmem>>, %arg13: memref<1024x768xf32, #tpu.memory_space<vmem>>, %arg14: memref<1x768xf32, #tpu.memory_space<vmem>>, %arg15: memref<768x256xf32, #tpu.memory_space<vmem>>, %arg16: memref<1x256xf32, #tpu.memory_space<vmem>>, %arg17: memref<256x256xf32, #tpu.memory_space<vmem>>, %arg18: memref<1x256xf32, #tpu.memory_space<vmem>>, %arg19: memref<256x128xf32, #tpu.memory_space<vmem>>, %arg20: memref<1x128xf32, #tpu.memory_space<vmem>>, %arg21: memref<8x128xf32, #tpu.memory_space<vmem>>, %arg22: memref<64x384xf32, #tpu.memory_space<vmem>>) attributes {dimension_semantics = [], scalar_prefetch = 0 : i64, scratch_operands = 1 : i64, tpu.core_type = #tpu.core_type<tc>} {
    %c0 = arith.constant 0 : index
    %c0_0 = arith.constant 0 : index
    %0 = vector.load %arg0[%c0, %c0_0] : memref<64x16xf32, #tpu.memory_space<vmem>>, vector<64x16xf32>
    %c0_1 = arith.constant 0 : index
    %c0_2 = arith.constant 0 : index
    %1 = vector.load %arg1[%c0_1, %c0_2] : memref<16x384xf32, #tpu.memory_space<vmem>>, vector<16x384xf32>
    %cst = arith.constant dense<0.000000e+00> : vector<64x384xf32>
    %2 = tpu.matmul %0, %1, %cst {dimension_numbers = #tpu.dot_dimension_numbers<[1], [0], [0], [1], [0, 0, 1, 1], [], []>} : vector<64x16xf32>, vector<16x384xf32>, vector<64x384xf32> -> vector<64x384xf32>
    %c0_3 = arith.constant 0 : index
    %c0_4 = arith.constant 0 : index
    %3 = vector.load %arg3[%c0_3, %c0_4] : memref<1x384xf32, #tpu.memory_space<vmem>>, vector<1x384xf32>
    %4 = vector.broadcast %3 : vector<1x384xf32> to vector<64x384xf32>
    %5 = arith.addf %2, %4 : vector<64x384xf32>
    %c0_5 = arith.constant 0 : index
    %c0_6 = arith.constant 0 : index
    %6 = vector.load %arg22[%c0_5, %c0_6] : memref<64x384xf32, #tpu.memory_space<vmem>>, vector<64x384xf32>
    tpu.vector_store %arg22[%c0_5, %c0_6], %5 {strides = array<i32>} : memref<64x384xf32, #tpu.memory_space<vmem>>, vector<64x384xf32>,
    %c0_7 = arith.constant 0 : index
    %c0_8 = arith.constant 0 : index
    %7 = vector.load %arg2[%c0_7, %c0_8] : memref<128x384xf32, #tpu.memory_space<vmem>>, vector<128x384xf32>
    %c0_9 = arith.constant 0 : index
    %c0_10 = arith.constant 0 : index
    %8 = vector.load %arg4[%c0_9, %c0_10] : memref<1x384xf32, #tpu.memory_space<vmem>>, vector<1x384xf32>
    %cst_11 = arith.constant 0.000000e+00 : f32
    %9 = vector.broadcast %cst_11 : f32 to vector<8x128xf32>
    %c0_i32 = arith.constant 0 : i32
    %c8_i32 = arith.constant 8 : i32
    %10 = arith.addi %c0_i32, %c8_i32 : i32
    %c1_i32 = arith.constant 1 : i32
    %11 = scf.for %arg23 = %c0_i32 to %10 step %c1_i32 iter_args(%arg24 = %9) -> (vector<8x128xf32>)  : i32 {
      %c8_i32_58 = arith.constant 8 : i32
      %56 = arith.muli %arg23, %c8_i32_58 : i32
      %57 = tpu.assume_multiple %56, 8 : i32
      %58 = arith.index_cast %57 : i32 to index
      %c0_59 = arith.constant 0 : index
      %59 = vector.load %arg22[%58, %c0_59] : memref<64x384xf32, #tpu.memory_space<vmem>>, vector<8x384xf32>
      %cst_60 = arith.constant dense<0.000000e+00> : vector<8x384xf32>
      %60 = tpu.matmul %arg24, %7, %cst_60 {dimension_numbers = #tpu.dot_dimension_numbers<[1], [0], [0], [1], [0, 0, 1, 1], [], []>} : vector<8x128xf32>, vector<128x384xf32>, vector<8x384xf32> -> vector<8x384xf32>
      %61 = vector.broadcast %8 : vector<1x384xf32> to vector<8x384xf32>
      %62 = arith.addf %60, %61 : vector<8x384xf32>
      %63 = vector.extract_strided_slice %59 {offsets = [0, 0], sizes = [8, 128], strides = [1, 1]} : vector<8x384xf32> to vector<8x128xf32>
      %64 = vector.extract_strided_slice %62 {offsets = [0, 0], sizes = [8, 128], strides = [1, 1]} : vector<8x384xf32> to vector<8x128xf32>
      %65 = arith.addf %63, %64 : vector<8x128xf32>
      %66 = arith.negf %65 : vector<8x128xf32>
      %67 = math.exp %66 : vector<8x128xf32>
      %cst_61 = arith.constant 1.000000e+00 : f32
      %68 = vector.broadcast %cst_61 : f32 to vector<8x128xf32>
      %69 = arith.addf %68, %67 : vector<8x128xf32>
      %70 = arith.divf %68, %69 : vector<8x128xf32>
      %71 = vector.extract_strided_slice %59 {offsets = [0, 128], sizes = [8, 128], strides = [1, 1]} : vector<8x384xf32> to vector<8x128xf32>
      %72 = vector.extract_strided_slice %62 {offsets = [0, 128], sizes = [8, 128], strides = [1, 1]} : vector<8x384xf32> to vector<8x128xf32>
      %73 = arith.addf %71, %72 : vector<8x128xf32>
      %74 = arith.negf %73 : vector<8x128xf32>
      %75 = math.exp %74 : vector<8x128xf32>
      %cst_62 = arith.constant 1.000000e+00 : f32
      %76 = vector.broadcast %cst_62 : f32 to vector<8x128xf32>
      %77 = arith.addf %76, %75 : vector<8x128xf32>
      %78 = arith.divf %76, %77 : vector<8x128xf32>
      %79 = vector.extract_strided_slice %59 {offsets = [0, 256], sizes = [8, 128], strides = [1, 1]} : vector<8x384xf32> to vector<8x128xf32>
      %80 = vector.extract_strided_slice %62 {offsets = [0, 256], sizes = [8, 128], strides = [1, 1]} : vector<8x384xf32> to vector<8x128xf32>
      %81 = arith.mulf %70, %80 : vector<8x128xf32>
      %82 = arith.addf %79, %81 : vector<8x128xf32>
      %83 = math.tanh %82 : vector<8x128xf32>
      %cst_63 = arith.constant 1.000000e+00 : f32
      %84 = vector.broadcast %cst_63 : f32 to vector<8x128xf32>
      %85 = arith.subf %84, %78 : vector<8x128xf32>
      %86 = arith.mulf %85, %83 : vector<8x128xf32>
      %87 = arith.mulf %78, %arg24 : vector<8x128xf32>
      %88 = arith.addf %86, %87 : vector<8x128xf32>
      scf.yield %88 : vector<8x128xf32>
    }
    %c8_i32_12 = arith.constant 8 : i32
    %c0_13 = arith.constant 0 : index
    %c0_14 = arith.constant 0 : index
    %12 = vector.load %arg8[%c0_13, %c0_14] : memref<128x1024xf32, #tpu.memory_space<vmem>>, vector<128x1024xf32>
    %cst_15 = arith.constant dense<0.000000e+00> : vector<8x1024xf32>
    %13 = tpu.matmul %11, %12, %cst_15 {dimension_numbers = #tpu.dot_dimension_numbers<[1], [0], [0], [1], [0, 0, 1, 1], [], []>} : vector<8x128xf32>, vector<128x1024xf32>, vector<8x1024xf32> -> vector<8x1024xf32>
    %c0_16 = arith.constant 0 : index
    %c0_17 = arith.constant 0 : index
    %14 = vector.load %arg5[%c0_16, %c0_17] : memref<8x12xf32, #tpu.memory_space<vmem>>, vector<8x12xf32>
    %c0_18 = arith.constant 0 : index
    %c0_19 = arith.constant 0 : index
    %15 = vector.load %arg9[%c0_18, %c0_19] : memref<12x1024xf32, #tpu.memory_space<vmem>>, vector<12x1024xf32>
    %cst_20 = arith.constant dense<0.000000e+00> : vector<8x1024xf32>
    %16 = tpu.matmul %14, %15, %cst_20 {dimension_numbers = #tpu.dot_dimension_numbers<[1], [0], [0], [1], [0, 0, 1, 1], [], []>} : vector<8x12xf32>, vector<12x1024xf32>, vector<8x1024xf32> -> vector<8x1024xf32>
    %17 = arith.addf %13, %16 : vector<8x1024xf32>
    %c0_21 = arith.constant 0 : index
    %c0_22 = arith.constant 0 : index
    %18 = vector.load %arg6[%c0_21, %c0_22] : memref<8x6xf32, #tpu.memory_space<vmem>>, vector<8x6xf32>
    %c0_23 = arith.constant 0 : index
    %c0_24 = arith.constant 0 : index
    %19 = vector.load %arg10[%c0_23, %c0_24] : memref<6x1024xf32, #tpu.memory_space<vmem>>, vector<6x1024xf32>
    %cst_25 = arith.constant dense<0.000000e+00> : vector<8x1024xf32>
    %20 = tpu.matmul %18, %19, %cst_25 {dimension_numbers = #tpu.dot_dimension_numbers<[1], [0], [0], [1], [0, 0, 1, 1], [], []>} : vector<8x6xf32>, vector<6x1024xf32>, vector<8x1024xf32> -> vector<8x1024xf32>
    %21 = arith.addf %17, %20 : vector<8x1024xf32>
    %c0_26 = arith.constant 0 : index
    %c0_27 = arith.constant 0 : index
    %22 = vector.load %arg7[%c0_26, %c0_27] : memref<8x10xf32, #tpu.memory_space<vmem>>, vector<8x10xf32>
    %c0_28 = arith.constant 0 : index
    %c0_29 = arith.constant 0 : index
    %23 = vector.load %arg11[%c0_28, %c0_29] : memref<10x1024xf32, #tpu.memory_space<vmem>>, vector<10x1024xf32>
    %cst_30 = arith.constant dense<0.000000e+00> : vector<8x1024xf32>
    %24 = tpu.matmul %22, %23, %cst_30 {dimension_numbers = #tpu.dot_dimension_numbers<[1], [0], [0], [1], [0, 0, 1, 1], [], []>} : vector<8x10xf32>, vector<10x1024xf32>, vector<8x1024xf32> -> vector<8x1024xf32>
    %25 = arith.addf %21, %24 : vector<8x1024xf32>
    %c0_31 = arith.constant 0 : index
    %c0_32 = arith.constant 0 : index
    %26 = vector.load %arg12[%c0_31, %c0_32] : memref<1x1024xf32, #tpu.memory_space<vmem>>, vector<1x1024xf32>
    %27 = vector.broadcast %26 : vector<1x1024xf32> to vector<8x1024xf32>
    %28 = arith.addf %25, %27 : vector<8x1024xf32>
    %c0_33 = arith.constant 0 : index
    %c0_34 = arith.constant 0 : index
    %29 = vector.load %arg13[%c0_33, %c0_34] : memref<1024x768xf32, #tpu.memory_space<vmem>>, vector<1024x768xf32>
    %cst_35 = arith.constant dense<0.000000e+00> : vector<8x768xf32>
    %30 = tpu.matmul %28, %29, %cst_35 {dimension_numbers = #tpu.dot_dimension_numbers<[1], [0], [0], [1], [0, 0, 1, 1], [], []>} : vector<8x1024xf32>, vector<1024x768xf32>, vector<8x768xf32> -> vector<8x768xf32>
    %c0_36 = arith.constant 0 : index
    %c0_37 = arith.constant 0 : index
    %31 = vector.load %arg14[%c0_36, %c0_37] : memref<1x768xf32, #tpu.memory_space<vmem>>, vector<1x768xf32>
    %32 = vector.broadcast %31 : vector<1x768xf32> to vector<8x768xf32>
    %33 = arith.addf %30, %32 : vector<8x768xf32>
    %cst_38 = arith.constant 0.000000e+00 : f32
    %34 = vector.broadcast %cst_38 : f32 to vector<8x768xf32>
    %35 = arith.maximumf %33, %34 : vector<8x768xf32>
    %c0_39 = arith.constant 0 : index
    %c0_40 = arith.constant 0 : index
    %36 = vector.load %arg15[%c0_39, %c0_40] : memref<768x256xf32, #tpu.memory_space<vmem>>, vector<768x256xf32>
    %cst_41 = arith.constant dense<0.000000e+00> : vector<8x256xf32>
    %37 = tpu.matmul %35, %36, %cst_41 {dimension_numbers = #tpu.dot_dimension_numbers<[1], [0], [0], [1], [0, 0, 1, 1], [], []>} : vector<8x768xf32>, vector<768x256xf32>, vector<8x256xf32> -> vector<8x256xf32>
    %c0_42 = arith.constant 0 : index
    %c0_43 = arith.constant 0 : index
    %38 = vector.load %arg16[%c0_42, %c0_43] : memref<1x256xf32, #tpu.memory_space<vmem>>, vector<1x256xf32>
    %39 = vector.broadcast %38 : vector<1x256xf32> to vector<8x256xf32>
    %40 = arith.addf %37, %39 : vector<8x256xf32>
    %cst_44 = arith.constant 0.000000e+00 : f32
    %41 = vector.broadcast %cst_44 : f32 to vector<8x256xf32>
    %42 = arith.maximumf %40, %41 : vector<8x256xf32>
    %c0_45 = arith.constant 0 : index
    %c0_46 = arith.constant 0 : index
    %43 = vector.load %arg17[%c0_45, %c0_46] : memref<256x256xf32, #tpu.memory_space<vmem>>, vector<256x256xf32>
    %cst_47 = arith.constant dense<0.000000e+00> : vector<8x256xf32>
    %44 = tpu.matmul %42, %43, %cst_47 {dimension_numbers = #tpu.dot_dimension_numbers<[1], [0], [0], [1], [0, 0, 1, 1], [], []>} : vector<8x256xf32>, vector<256x256xf32>, vector<8x256xf32> -> vector<8x256xf32>
    %c0_48 = arith.constant 0 : index
    %c0_49 = arith.constant 0 : index
    %45 = vector.load %arg18[%c0_48, %c0_49] : memref<1x256xf32, #tpu.memory_space<vmem>>, vector<1x256xf32>
    %46 = vector.broadcast %45 : vector<1x256xf32> to vector<8x256xf32>
    %47 = arith.addf %44, %46 : vector<8x256xf32>
    %cst_50 = arith.constant 0.000000e+00 : f32
    %48 = vector.broadcast %cst_50 : f32 to vector<8x256xf32>
    %49 = arith.maximumf %47, %48 : vector<8x256xf32>
    %c0_51 = arith.constant 0 : index
    %c0_52 = arith.constant 0 : index
    %50 = vector.load %arg19[%c0_51, %c0_52] : memref<256x128xf32, #tpu.memory_space<vmem>>, vector<256x128xf32>
    %cst_53 = arith.constant dense<0.000000e+00> : vector<8x128xf32>
    %51 = tpu.matmul %49, %50, %cst_53 {dimension_numbers = #tpu.dot_dimension_numbers<[1], [0], [0], [1], [0, 0, 1, 1], [], []>} : vector<8x256xf32>, vector<256x128xf32>, vector<8x128xf32> -> vector<8x128xf32>
    %c0_54 = arith.constant 0 : index
    %c0_55 = arith.constant 0 : index
    %52 = vector.load %arg20[%c0_54, %c0_55] : memref<1x128xf32, #tpu.memory_space<vmem>>, vector<1x128xf32>
    %53 = vector.broadcast %52 : vector<1x128xf32> to vector<8x128xf32>
    %54 = arith.addf %51, %53 : vector<8x128xf32>
    %c0_56 = arith.constant 0 : index
    %c0_57 = arith.constant 0 : index
    %55 = vector.load %arg21[%c0_56, %c0_57] : memref<8x128xf32, #tpu.memory_space<vmem>>, vector<8x128xf32>
    tpu.vector_store %arg21[%c0_56, %c0_57], %54 {strides = array<i32>} : memref<8x128xf32, #tpu.memory_space<vmem>>, vector<8x128xf32>,
    return
  }
}

</mosaic_0001>

<bundles_post_ra>
// kernel: _fused_forward.1
= control target key start
LH: loop header
LB: loop body
LE: loop exit
PB: predicated region body
PF: predicated region fallthrough
CT: control target
= control target key end

     0   :  { %s5412_s0 = inlined_call_operand.vmem [shape: f32[64,16], index: 0, kind: input, shape index: {}]   ;;  %s5413_s1 = inlined_call_operand.hbm [shape: f32[16,384], index: 1, kind: input, shape index: {}]   ;;  %s5414_s2 = inlined_call_operand.hbm [shape: f32[128,384], index: 2, kind: input, shape index: {}]   ;;  %s5415_s3 = inlined_call_operand.hbm [shape: f32[1,384], index: 3, kind: input, shape index: {}]   ;;  %s5416_s4 = inlined_call_operand.hbm [shape: f32[1,384], index: 4, kind: input, shape index: {}]   ;;  %s5417_s5 = inlined_call_operand.vmem [shape: f32[8,12], index: 5, kind: input, shape index: {}]   ;;  %s5418_s6 = inlined_call_operand.vmem [shape: f32[8,6], index: 6, kind: input, shape index: {}]   ;;  %s5419_s7 = inlined_call_operand.vmem [shape: f32[8,10], index: 7, kind: input, shape index: {}]   ;;  %s5420_s8 = inlined_call_operand.hbm [shape: f32[128,1024], index: 8, kind: input, shape index: {}]   ;;  %s5421_s9 = inlined_call_operand.hbm [shape: f32[12,1024], index: 9, kind: input, shape index: {}]   ;;  %s5422_s10 = inlined_call_operand.hbm [shape: f32[6,1024], index: 10, kind: input, shape index: {}]   ;;  %s5423_s11 = inlined_call_operand.hbm [shape: f32[10,1024], index: 11, kind: input, shape index: {}]   ;;  %s5424_s12 = inlined_call_operand.hbm [shape: f32[1,1024], index: 12, kind: input, shape index: {}]   ;;  %s5425_s13 = inlined_call_operand.hbm [shape: f32[1024,768], index: 13, kind: input, shape index: {}]   ;;  %s5426_s14 = inlined_call_operand.hbm [shape: f32[1,768], index: 14, kind: input, shape index: {}]   ;;  %s5427_s15 = inlined_call_operand.hbm [shape: f32[768,256], index: 15, kind: input, shape index: {}]   ;;  %s5428_s16 = inlined_call_operand.hbm [shape: f32[1,256], index: 16, kind: input, shape index: {}]   ;;  %s5429_s17 = inlined_call_operand.hbm [shape: f32[256,256], index: 17, kind: input, shape index: {}]   ;;  %s5430_s18 = inlined_call_operand.hbm [shape: f32[1,256], index: 18, kind: input, shape index: {}]   ;;  %s5431_s19 = inlined_call_operand.hbm [shape: f32[256,128], index: 19, kind: input, shape index: {}]   ;;  %s5432_s20 = inlined_call_operand.hbm [shape: f32[1,128], index: 20, kind: input, shape index: {}]   ;;  %s5433_s21 = inlined_call_operand.vmem [shape: f32[8,128], index: 21, kind: output, shape index: {}]  }
   0x1   :  { %5437 = sst [smem:[#allocation49_spill]] %s5412_s0 }
   0x2   :  { %5438 = sst [smem:[#allocation50_spill]] %s5413_s1 }
   0x3   :  { %5439 = sst [smem:[#allocation51_spill]] %s5414_s2 }
   0x4   :  { %5440 = sst [smem:[#allocation52_spill]] %s5415_s3 }
   0x5   :  { %5441 = sst [smem:[#allocation53_spill]] %s5416_s4 }
   0x6   :  { %5442 = sst [smem:[#allocation54_spill]] %s5417_s5 }
   0x7   :  { %5443 = sst [smem:[#allocation55_spill]] %s5419_s7 }
   0x8   :  { %5444 = sst [smem:[#allocation56_spill]] %s5433_s21 }
   0x9   :  { %26 = vsyncpa [#allocation4], 0 }
   0xa   :  { %27 = vsyncpa [#allocation6], 0 }
   0xb   :  { %28 = vsyncpa [#allocation9], 0 }
   0xc   :  { %29 = vsyncpa [#allocation12], 0 }
   0xd   :  { %30 = vsyncpa [#allocation15], 0 }
   0xe   :  { %31 = vsyncpa [#allocation18], 0 }
   0xf   :  { %32 = vsyncpa [#allocation21], 0 }
  0x10   :  { %33 = vsyncpa [#allocation24], 0 }
  0x11   :  { %34 = vsyncpa [#allocation27], 0  ;;  %s5445_s26 = sld [smem:[#allocation51_spill]]  ;;  %s4649_s3 = smov [#allocation5]  }
  0x12   :  { %s56_s28 = sshll.u32 %s4649_s3, 4  ;;  %s5446_s4 = sld [smem:[#allocation53_spill]]  ;;  %s57_s28 = int_to_ptr.vmem [resolvable:$true] %s56_s28 }
  0x13   :  { %s4650_s5 = smov 384   ;;  %s4651_s22 = smov 24  }
  0x14   :  { %s4652_s23 = smov [#allocation8]   ;;  %s108_s25 = sshll.u32 %s5421_s9, 4  ;;  %s109_s25 = int_to_ptr.hbm [resolvable:$true] %s108_s25 }
  0x15   :  { %s81_s1 = sshll.u32 %s4652_s23, 4  ;;  %s5435_s21 = smov 1024   ;;  %s82_s1 = int_to_ptr.vmem [resolvable:$true] %s81_s1 }
  0x16   :  { %s4655_s7 = smov 64   ;;  %s156_s9 = sshll.u32 %s5425_s13, 4  ;;  %s157_s9 = int_to_ptr.hbm [resolvable:$true] %s156_s9 }
  0x17   :  { %s54_s27 = sshll.u32 %s5445_s26, 4  ;;  %s4653_s26 = smov [#allocation11]   ;;  %s55_s27 = int_to_ptr.hbm [resolvable:$true] %s54_s27 }
  0x18   :  { %s79_s30 = sshll.u32 %s5446_s4, 4  ;;  %s110_s3 = sshll.u32 %s4653_s26, 4  ;;  %s80_s30 = int_to_ptr.hbm [resolvable:$true] %s79_s30  ;;  %s111_s3 = int_to_ptr.vmem [resolvable:$true] %s110_s3 }
  0x19   :  { %62 = dma.hbm_to_vmem [thread:$0]  %s55_s27, 6144, %s57_s28, [#allocation6], %s4650_s5, %s4650_s5, %s4651_s22  }
  0x1a   :  { %84 = dma.hbm_to_vmem [thread:$0]  %s80_s30, 48, %s82_s1, [#allocation9]  }
  0x1b   :  { %s132_s4 = sshll.u32 %s5423_s11, 4  ;;  %s4656_s27 = smov [#allocation14]   ;;  %s133_s4 = int_to_ptr.hbm [resolvable:$true] %s132_s4 }
  0x1c   :  { %116 = dma.hbm_to_vmem [thread:$0]  %s109_s25, 2048, %s111_s3, [#allocation12], %s5435_s21, %s5435_s21, %s4655_s7  }
  0x1d   :  { %s134_s28 = sshll.u32 %s4656_s27, 4  ;;  %s4657_s11 = smov [#allocation17]   ;;  %s135_s28 = int_to_ptr.vmem [resolvable:$true] %s134_s28 }
  0x1e   :  { %140 = dma.hbm_to_vmem [thread:$0]  %s133_s4, 2048, %s135_s28, [#allocation15], %s5435_s21, %s5435_s21, %s4655_s7  }
  0x1f   :  { %s158_s1 = sshll.u32 %s4657_s11, 4  ;;  %s180_s25 = sshll.u32 %s5427_s15, 4  ;;  %s159_s1 = int_to_ptr.vmem [resolvable:$true] %s158_s1  ;;  %s181_s25 = int_to_ptr.hbm [resolvable:$true] %s180_s25 }
  0x20   :  { %s4658_s26 = smov 768   ;;  %s4659_s3 = smov 48  }
  0x21   :  { %164 = dma.hbm_to_vmem [thread:$0]  %s157_s9, 98304, %s159_s1, [#allocation18], %s4658_s26, %s4658_s26, %s4659_s3  }
  0x22   :  { %s4660_s29 = smov [#allocation20]   ;;  %s4661_s13 = smov 256  }
  0x23   :  { %s182_s0 = sshll.u32 %s4660_s29, 4  ;;  %s4662_s27 = smov 16   ;;  %s183_s0 = int_to_ptr.vmem [resolvable:$true] %s182_s0 }
  0x24   :  { %188 = dma.hbm_to_vmem [thread:$0]  %s181_s25, 24576, %s183_s0, [#allocation21], %s4661_s13, %s4661_s13, %s4662_s27  }
  0x25   :  { %s204_s4 = sshll.u32 %s5429_s17, 4  ;;  %s4663_s28 = smov [#allocation23]   ;;  %s205_s4 = int_to_ptr.hbm [resolvable:$true] %s204_s4 }
  0x26   :  { %s206_s11 = sshll.u32 %s4663_s28, 4  ;;  %s228_s2 = sshll.u32 %s5431_s19, 4  ;;  %s207_s11 = int_to_ptr.vmem [resolvable:$true] %s206_s11  ;;  %s229_s2 = int_to_ptr.hbm [resolvable:$true] %s228_s2 }
  0x27   :  { %212 = dma.hbm_to_vmem [thread:$0]  %s205_s4, 8192, %s207_s11, [#allocation24], %s4661_s13, %s4661_s13, %s4662_s27  }
  0x28   :  { %s4664_s9 = smov [#allocation26]   ;;  %s4665_s26 = smov 128  }
  0x29   :  { %s230_s1 = sshll.u32 %s4664_s9, 4  ;;  %s4666_s3 = smov 8   ;;  %s231_s1 = int_to_ptr.vmem [resolvable:$true] %s230_s1 }
  0x2a   :  { %236 = dma.hbm_to_vmem [thread:$0]  %s229_s2, 4096, %s231_s1, [#allocation27], %s4665_s26, %s4665_s26, %s4666_s3  }
  0x2b   :  { %s5447_s0 = sld [smem:[#allocation50_spill]]  ;;  %s4667_s30 = smov [#allocation3]  }
  0x2c   :  { %s43_s23 = sshll.u32 %s4667_s30, 4  ;;  %s5448_s24 = sld [smem:[#allocation52_spill]]  ;;  %s44_s23 = int_to_ptr.vmem [resolvable:$true] %s43_s23 }
  0x2d   :  { %s4668_s13 = smov [#allocation7]   ;;  %s95_s15 = sshll.u32 %s5420_s8, 4  ;;  %s96_s15 = int_to_ptr.hbm [resolvable:$true] %s95_s15 }
  0x2e   :  { %s70_s27 = sshll.u32 %s4668_s13, 4  ;;  %s122_s1 = sshll.u32 %s5422_s10, 4  ;;  %s71_s27 = int_to_ptr.vmem [resolvable:$true] %s70_s27  ;;  %s123_s1 = int_to_ptr.hbm [resolvable:$true] %s122_s1 }
  0x2f   :  { %s4669_s21 = smov [#allocation10]   ;;  %s146_s8 = sshll.u32 %s5424_s12, 4  ;;  %s147_s8 = int_to_ptr.hbm [resolvable:$true] %s146_s8 }
  0x30   :  { %s97_s26 = sshll.u32 %s4669_s21, 4  ;;  %s170_s10 = sshll.u32 %s5426_s14, 4  ;;  %s98_s26 = int_to_ptr.vmem [resolvable:$true] %s97_s26  ;;  %s171_s10 = int_to_ptr.hbm [resolvable:$true] %s170_s10 }
  0x31   :  { %s41_s17 = sshll.u32 %s5447_s0, 4  ;;  %s4671_s30 = smov [#allocation16]   ;;  %s42_s17 = int_to_ptr.hbm [resolvable:$true] %s41_s17 }
  0x32   :  { %s68_s19 = sshll.u32 %s5448_s24, 4  ;;  %s4672_s28 = smov [#allocation19]   ;;  %s69_s19 = int_to_ptr.hbm [resolvable:$true] %s68_s19 }
  0x33   :  { %49 = dma.hbm_to_vmem [thread:$0]  %s42_s17, 768, %s44_s23, [#allocation4], %s4650_s5, %s4650_s5, %s4651_s22  }
  0x34   :  { %73 = dma.hbm_to_vmem [thread:$0]  %s69_s19, 48, %s71_s27, [#allocation6]  }
  0x35   :  { %s5449_s5 = smov 1024   ;;  %s4670_s22 = smov [#allocation13]  }
  0x36   :  { %103 = dma.hbm_to_vmem [thread:$0]  %s96_s15, 16384, %s98_s26, [#allocation9], %s5449_s5, %s5449_s5, %s4655_s7  }
  0x37   :  { %s124_s3 = sshll.u32 %s4670_s22, 4  ;;  %s148_s23 = sshll.u32 %s4671_s30, 4  ;;  %s125_s3 = int_to_ptr.vmem [resolvable:$true] %s124_s3  ;;  %s149_s23 = int_to_ptr.vmem [resolvable:$true] %s148_s23 }
  0x38   :  { %127 = dma.hbm_to_vmem [thread:$0]  %s123_s1, 1024, %s125_s3, [#allocation12]  }
  0x39   :  { %151 = dma.hbm_to_vmem [thread:$0]  %s147_s8, 128, %s149_s23, [#allocation15]  }
  0x3a   :  { %s172_s7 = sshll.u32 %s4672_s28, 4  ;;  %s194_s13 = sshll.u32 %s5428_s16, 4  ;;  %s173_s7 = int_to_ptr.vmem [resolvable:$true] %s172_s7  ;;  %s195_s13 = int_to_ptr.hbm [resolvable:$true] %s194_s13 }
  0x3b   :  { %175 = dma.hbm_to_vmem [thread:$0]  %s171_s10, 96, %s173_s7, [#allocation18]  }
  0x3c   :  { %s218_s4 = sshll.u32 %s5430_s18, 4  ;;  %s4673_s11 = smov [#allocation22]   ;;  %s219_s4 = int_to_ptr.hbm [resolvable:$true] %s218_s4 }
  0x3d   :  { %s196_s14 = sshll.u32 %s4673_s11, 4  ;;  %s4674_s15 = smov [#allocation25]   ;;  %s197_s14 = int_to_ptr.vmem [resolvable:$true] %s196_s14 }
  0x3e   :  { %199 = dma.hbm_to_vmem [thread:$0]  %s195_s13, 32, %s197_s14, [#allocation21]  }
  0x3f   :  { %s220_s2 = sshll.u32 %s4674_s15, 4  ;;  %s242_s21 = sshll.u32 %s5432_s20, 4  ;;  %s221_s2 = int_to_ptr.vmem [resolvable:$true] %s220_s2  ;;  %s243_s21 = int_to_ptr.hbm [resolvable:$true] %s242_s21 }
  0x40   :  { %223 = dma.hbm_to_vmem [thread:$0]  %s219_s4, 32, %s221_s2, [#allocation24]  }
  0x41   :  { %s4675_s16 = smov [#allocation28]  }
  0x42   :  { %s244_s26 = sshll.u32 %s4675_s16, 4  ;;  %s245_s26 = int_to_ptr.vmem [resolvable:$true] %s244_s26 }
  0x43   :  { %247 = dma.hbm_to_vmem [thread:$0]  %s243_s21, 16, %s245_s26, [#allocation27]  }
  0x44   :  { %4623 = dma.done.wait [#allocation4], 768  }
  0x45   :  { %4624 = vsyncadd [#allocation4], 4294966528 }
  0x46   :  { %4625 = dma.done.wait [#allocation6], 6192  }
  0x47   :  { %4626 = vsyncadd [#allocation6], 4294961104 }
  0x48   :  { %4627 = dma.done.wait [#allocation9], 16432  }
  0x49   :  { %4628 = vsyncadd [#allocation9], 4294950864 }
  0x4a   :  { %4629 = dma.done.wait [#allocation12], 3072  }
  0x4b   :  { %4630 = vsyncadd [#allocation12], 4294964224 }
  0x4c   :  { %4631 = dma.done.wait [#allocation15], 2176  }
  0x4d   :  { %4632 = vsyncadd [#allocation15], 4294965120 }
  0x4e   :  { %4633 = dma.done.wait [#allocation18], 98400  }
  0x4f   :  { %4634 = vsyncadd [#allocation18], 4294868896 }
  0x50   :  { %4635 = dma.done.wait [#allocation21], 24608  }
  0x51   :  { %4636 = vsyncadd [#allocation21], 4294942688 }
  0x52   :  { %4637 = dma.done.wait [#allocation24], 8224  }
  0x53   :  { %4638 = vsyncadd [#allocation24], 4294959072 }
  0x54   :  { %4639 = dma.done.wait [#allocation27], 4112  }
  0x55   :  { %4640 = vsyncadd [#allocation27], 4294963184  ;;  %v4852_v0 = vld [vmem:[#allocation5] sm:$0xff]  ;;  %v4854_v1 = vld [vmem:[#allocation5 + $0x8] sm:$0xff]  ;;  %s5461_s5 = sld [smem:[#allocation49_spill]]  ;;  %vm338_vm0 = vcmask 130048  }
  0x56   :  { %5450 = vst [vmem:[#allocation38_spill] sm:$0xff] %v4852_v0  ;;  %v4856_v2 = vld [vmem:[#allocation5 + $0x10] sm:$0xff]  ;;  %v4858_v3 = vld [vmem:[#allocation5 + $0x18] sm:$0xff]  ;;  %v4860_v4 = vld [vmem:[#allocation5 + $0x20] sm:$0xff]  ;;  %s5030_s13 = smov 0  }
  0x57   :  { %5451 = vst [vmem:[#allocation39_spill] sm:$0xff] %v4854_v1  ;;  %v4862_v5 = vld [vmem:[#allocation5 + $0x28] sm:$0xff]  ;;  %v4864_v6 = vld [vmem:[#allocation5 + $0x30] sm:$0xff]  ;;  %v4866_v7 = vld [vmem:[#allocation5 + $0x38] sm:$0xff] }
  0x58   :  { %5452 = vst [vmem:[#allocation40_spill] sm:$0xff] %v4856_v2  ;;  %v4868_v8 = vld [vmem:[#allocation5 + $0x40] sm:$0xff]  ;;  %v4870_v9 = vld [vmem:[#allocation5 + $0x48] sm:$0xff]  ;;  %v4872_v10 = vld [vmem:[#allocation5 + $0x50] sm:$0xff] }
  0x59   :  { %5453 = vst [vmem:[#allocation41_spill] sm:$0xff] %v4858_v3  ;;  %v4874_v11 = vld [vmem:[#allocation5 + $0x58] sm:$0xff]  ;;  %v4876_v12 = vld [vmem:[#allocation5 + $0x60] sm:$0xff]  ;;  %v4878_v13 = vld [vmem:[#allocation5 + $0x68] sm:$0xff] }
  0x5a   :  { %5454 = vst [vmem:[#allocation42_spill] sm:$0xff] %v4860_v4  ;;  %v4880_v14 = vld [vmem:[#allocation5 + $0x70] sm:$0xff]  ;;  %v4882_v15 = vld [vmem:[#allocation5 + $0x78] sm:$0xff]  ;;  %v4884_v16 = vld [vmem:[#allocation5 + $0x80] sm:$0xff] }
  0x5b   :  { %5455 = vst [vmem:[#allocation43_spill] sm:$0xff] %v4862_v5  ;;  %v4886_v17 = vld [vmem:[#allocation5 + $0x88] sm:$0xff]  ;;  %v4888_v18 = vld [vmem:[#allocation5 + $0x90] sm:$0xff]  ;;  %v4890_v19 = vld [vmem:[#allocation5 + $0x98] sm:$0xff] }
  0x5c   :  { %5456 = vst [vmem:[#allocation44_spill] sm:$0xff] %v4864_v6  ;;  %v4892_v20 = vld [vmem:[#allocation5 + $0xa0] sm:$0xff]  ;;  %v4894_v21 = vld [vmem:[#allocation5 + $0xa8] sm:$0xff]  ;;  %v4896_v22 = vld [vmem:[#allocation5 + $0xb0] sm:$0xff] }
  0x5d   :  { %5457 = vst [vmem:[#allocation45_spill] sm:$0xff] %v4866_v7  ;;  %v4898_v23 = vld [vmem:[#allocation5 + $0xb8] sm:$0xff]  ;;  %v4900_v24 = vld [vmem:[#allocation5 + $0xc0] sm:$0xff]  ;;  %v4902_v25 = vld [vmem:[#allocation5 + $0xc8] sm:$0xff] }
  0x5e   :  { %5458 = vst [vmem:[#allocation46_spill] sm:$0xff] %v4868_v8  ;;  %v4904_v26 = vld [vmem:[#allocation5 + $0xd0] sm:$0xff]  ;;  %v4906_v27 = vld [vmem:[#allocation5 + $0xd8] sm:$0xff]  ;;  %v4908_v28 = vld [vmem:[#allocation5 + $0xe0] sm:$0xff] }
  0x5f   :  { %5459 = vst [vmem:[#allocation47_spill] sm:$0xff] %v4870_v9  ;;  %v4910_v29 = vld [vmem:[#allocation5 + $0xe8] sm:$0xff]  ;;  %v4912_v30 = vld [vmem:[#allocation5 + $0xf0] sm:$0xff]  ;;  %v4914_v31 = vld [vmem:[#allocation5 + $0xf8] sm:$0xff] }
  0x60   :  { %v4916_v32 = vld [vmem:[#allocation5 + $0x100] sm:$0xff]  ;;  %v4918_v33 = vld [vmem:[#allocation5 + $0x108] sm:$0xff]  ;;  %v4920_v34 = vld [vmem:[#allocation5 + $0x110] sm:$0xff] }
  0x61   :  { %v4922_v35 = vld [vmem:[#allocation5 + $0x118] sm:$0xff]  ;;  %v4924_v36 = vld [vmem:[#allocation5 + $0x120] sm:$0xff]  ;;  %v4926_v37 = vld [vmem:[#allocation5 + $0x128] sm:$0xff] }
  0x62   :  { %v4928_v38 = vld [vmem:[#allocation5 + $0x130] sm:$0xff]  ;;  %v4930_v39 = vld [vmem:[#allocation5 + $0x138] sm:$0xff]  ;;  %v4932_v40 = vld [vmem:[#allocation5 + $0x140] sm:$0xff] }
  0x63   :  { %v4934_v41 = vld [vmem:[#allocation5 + $0x148] sm:$0xff]  ;;  %v4936_v42 = vld [vmem:[#allocation5 + $0x150] sm:$0xff]  ;;  %v4938_v43 = vld [vmem:[#allocation5 + $0x158] sm:$0xff] }
  0x64   :  { %v4940_v44 = vld [vmem:[#allocation5 + $0x160] sm:$0xff]  ;;  %v4942_v45 = vld [vmem:[#allocation5 + $0x168] sm:$0xff]  ;;  %v4944_v46 = vld [vmem:[#allocation5 + $0x170] sm:$0xff] }
  0x65   :  { %v4946_v47 = vld [vmem:[#allocation5 + $0x178] sm:$0xff]  ;;  %v4948_v48 = vld [vmem:[#allocation8] sm:$0x7]  ;;  %v327_v49 = vld [vmem:[#allocation3 + $0x18] sm:$0xff] }
  0x66   :  { %5460 = vst [vmem:[#allocation48_spill] sm:$0xff] %v4948_v48  ;;  %v329_v50 = vld [vmem:[#allocation3 + $0x28] sm:$0xff]  ;;  %4146 = vmatpush.msra.mxu3 %v327_v49  ;;  %v324_v51 = vld [vmem:[#allocation3] sm:$0xff]  ;;  %v326_v52 = vld [vmem:[#allocation3 + $0x10] sm:$0xff]  ;;  %377 = vmatpush.msra.mxu0 %v327_v49 }
  0x67   :  { %459 = vmatpush.msra.mxu2 %v329_v50  ;;  %v322_v53 = vld [vmem:[%s5461_s5 + $0x30] sm:$0xff]  ;;  %v328_v54 = vld [vmem:[#allocation3 + $0x20] sm:$0xff]  ;;  %v325_v56 = vld [vmem:[#allocation3 + $0x8] sm:$0xff] }
  0x68   :  { %v316_v55 = vld [vmem:[%s5461_s5] sm:$0xff]  ;;  %4147 = vmatpush.msra.mxu3 %v324_v51  ;;  %418 = vmatpush.msra.mxu1 %v328_v54  ;;  %v323_v57 = vld [vmem:[%s5461_s5 + $0x38] sm:$0xff]  ;;  %v317_v58 = vld [vmem:[%s5461_s5 + $0x8] sm:$0xff] }
  0x69   :  { %460 = vmatpush.msra.mxu2 %v326_v52  ;;  %4075 = vmatmul.msk.f32.vlgmr.msra.gmra.mxu3 %vm338_vm0, %v322_v53  ;;  %v318_v59 = vld [vmem:[%s5461_s5 + $0x10] sm:$0xff]  ;;  %v319_v60 = vld [vmem:[%s5461_s5 + $0x18] sm:$0xff]  ;;  %v320_v61 = vld [vmem:[%s5461_s5 + $0x20] sm:$0xff] }
  0x6a   :  { %4085 = vmatmul.msk.f32.vlgmr.msra.gmra.mxu2 %vm338_vm0, %v316_v55  ;;  %4148 = vmatpush.msrb.mxu3 %v328_v54  ;;  %v321_v62 = vld [vmem:[%s5461_s5 + $0x28] sm:$0xff]  ;;  %v330_v63 = vld [vmem:[#allocation7] sm:$0x7] }
  0x6b   :  { %378 = vmatpush.msra.mxu0 %v324_v51  ;;  %419 = vmatpush.msra.mxu1 %v325_v56  ;;  %v4998_v49 = vperm.slane %v330_v63, 0 }
  0x6c   :  { %4069 = vmatmul.msk.f32.vlgmr.msra.gmra.mxu0 %vm338_vm0, %v316_v55  ;;  %4077 = vmatmul.msk.f32.vlgmr.msra.gmra.mxu1 %vm338_vm0, %v316_v55 }
  0x6d   :  { %4149 = vmatpush.msrb.mxu3 %v325_v56 }
  0x6f   :  { %4150 = vmatpush.msra.mxu3 %v329_v50  ;;  %v5000_v50 = vperm.slane %v330_v63, 1 }
  0x71   :  { %4151 = vmatpush.msra.mxu3 %v326_v52  ;;  %v5002_v52 = vperm.slane %v330_v63, 2 }
  0x72   :  { %4076 = vmatmul.msk.f32.gmra.mxu3 %vm338_vm0, %v323_v57  ;;  %4086 = vmatmul.msk.f32.gmra.mxu2 %vm338_vm0, %v317_v58 }
  0x74   :  { %4070 = vmatmul.msk.f32.gmra.mxu0 %vm338_vm0, %v317_v58  ;;  %4078 = vmatmul.msk.f32.gmra.mxu1 %vm338_vm0, %v317_v58 }
  0x7a   :  { %4083 = vmatmul.msk.f32.vlgmr.msrb.gmra.mxu3 %vm338_vm0, %v322_v53  ;;  %4087 = vmatmul.msk.f32.gmra.mxu2 %vm338_vm0, %v318_v59 }
  0x7c   :  { %4071 = vmatmul.msk.f32.gmra.mxu0 %vm338_vm0, %v318_v59  ;;  %4079 = vmatmul.msk.f32.gmra.mxu1 %vm338_vm0, %v318_v59 }
  0x82   :  { %4084 = vmatmul.msk.f32.gmra.mxu3 %vm338_vm0, %v323_v57  ;;  %4088 = vmatmul.msk.f32.gmra.mxu2 %vm338_vm0, %v319_v60 }
  0x84   :  { %4072 = vmatmul.msk.f32.gmra.mxu0 %vm338_vm0, %v319_v60  ;;  %4080 = vmatmul.msk.f32.gmra.mxu1 %vm338_vm0, %v319_v60 }
  0x8a   :  { %4089 = vmatmul.msk.f32.gmra.mxu2 %vm338_vm0, %v320_v61  ;;  %4091 = vmatmul.msk.f32.vlgmr.msra.gmra.mxu3 %vm338_vm0, %v322_v53 }
  0x8c   :  { %4073 = vmatmul.msk.f32.gmra.mxu0 %vm338_vm0, %v320_v61  ;;  %4081 = vmatmul.msk.f32.gmra.mxu1 %vm338_vm0, %v320_v61 }
  0x92   :  { %4090 = vmatmul.msk.f32.gmra.mxu2 %vm338_vm0, %v321_v62  ;;  %4092 = vmatmul.msk.f32.gmra.mxu3 %vm338_vm0, %v323_v57 }
  0x94   :  { %4074 = vmatmul.msk.f32.gmra.mxu0 %vm338_vm0, %v321_v62  ;;  %4082 = vmatmul.msk.f32.gmra.mxu1 %vm338_vm0, %v321_v62 }
  0xe9   :  { %v380_v51 = vpop.f32.mrf.mxu0  ;;  %v421_v54 = vpop.f32.mrf.mxu1 }
  0xea   :  { %v381_v53 = vadd.f32 %v380_v51, %v4998_v49  ;;  %v422_v55 = vadd.f32 %v421_v54, %v5000_v50 }
  0xec   :  { %486 = vst [vmem:[#allocation2] sm:$0xff] %v381_v53  ;;  %v398_v56 = vpop.f32.mrf.mxu3 }
  0xed   :  { %v462_v57 = vpop.f32.mrf.mxu2  ;;  %v399_v58 = vadd.f32 %v398_v56, %v4998_v49  ;;  %487 = vst [vmem:[#allocation2 + $0x8] sm:$0xff] %v422_v55 }
  0xee   :  { %v463_v59 = vadd.f32 %v462_v57, %v5002_v52 }
  0xef   :  { %504 = vst [vmem:[#allocation2 + $0x90] sm:$0xff] %v399_v58 }
  0xf0   :  { %488 = vst [vmem:[#allocation2 + $0x10] sm:$0xff] %v463_v59 }
  0xf1   :  { %v383_v60 = vpop.f32.mrf.mxu0  ;;  %v424_v62 = vpop.f32.mrf.mxu1 }
  0xf2   :  { %v384_v61 = vadd.f32 %v383_v60, %v4998_v49  ;;  %v425_v63 = vadd.f32 %v424_v62, %v5000_v50 }
  0xf4   :  { %489 = vst [vmem:[#allocation2 + $0x18] sm:$0xff] %v384_v61 }
  0xf5   :  { %v401_v51 = vpop.f32.mrf.mxu3  ;;  %v465_v48 = vpop.f32.mrf.mxu2  ;;  %490 = vst [vmem:[#allocation2 + $0x20] sm:$0xff] %v425_v63 }
  0xf6   :  { %v402_v53 = vadd.f32 %v401_v51, %v4998_v49  ;;  %v466_v54 = vadd.f32 %v465_v48, %v5002_v52 }
  0xf8   :  { %507 = vst [vmem:[#allocation2 + $0xa8] sm:$0xff] %v402_v53 }
  0xf9   :  { %491 = vst [vmem:[#allocation2 + $0x28] sm:$0xff] %v466_v54  ;;  %v386_v55 = vpop.f32.mrf.mxu0  ;;  %v427_v57 = vpop.f32.mrf.mxu1 }
  0xfa   :  { %v387_v56 = vadd.f32 %v386_v55, %v4998_v49  ;;  %v428_v58 = vadd.f32 %v427_v57, %v5000_v50 }
  0xfc   :  { %492 = vst [vmem:[#allocation2 + $0x30] sm:$0xff] %v387_v56 }
  0xfd   :  { %v439_v59 = vpop.f32.mrf.mxu3  ;;  %v468_v60 = vpop.f32.mrf.mxu2  ;;  %493 = vst [vmem:[#allocation2 + $0x38] sm:$0xff] %v428_v58 }
  0xfe   :  { %v440_v61 = vadd.f32 %v439_v59, %v5000_v50  ;;  %v469_v62 = vadd.f32 %v468_v60, %v5002_v52 }
 0x100   :  { %505 = vst [vmem:[#allocation2 + $0x98] sm:$0xff] %v440_v61 }
 0x101   :  { %494 = vst [vmem:[#allocation2 + $0x40] sm:$0xff] %v469_v62  ;;  %v389_v63 = vpop.f32.mrf.mxu0  ;;  %v430_v51 = vpop.f32.mrf.mxu1 }
 0x102   :  { %v390_v48 = vadd.f32 %v389_v63, %v4998_v49  ;;  %v431_v53 = vadd.f32 %v430_v51, %v5000_v50 }
 0x104   :  { %495 = vst [vmem:[#allocation2 + $0x48] sm:$0xff] %v390_v48 }
 0x105   :  { %v442_v54 = vpop.f32.mrf.mxu3  ;;  %v471_v55 = vpop.f32.mrf.mxu2  ;;  %496 = vst [vmem:[#allocation2 + $0x50] sm:$0xff] %v431_v53 }
 0x106   :  { %v443_v56 = vadd.f32 %v442_v54, %v5000_v50  ;;  %v472_v57 = vadd.f32 %v471_v55, %v5002_v52 }
 0x108   :  { %508 = vst [vmem:[#allocation2 + $0xb0] sm:$0xff] %v443_v56 }
 0x109   :  { %497 = vst [vmem:[#allocation2 + $0x58] sm:$0xff] %v472_v57  ;;  %v392_v58 = vpop.f32.mrf.mxu0  ;;  %v433_v60 = vpop.f32.mrf.mxu1 }
 0x10a   :  { %v393_v59 = vadd.f32 %v392_v58, %v4998_v49  ;;  %v434_v61 = vadd.f32 %v433_v60, %v5000_v50 }
 0x10c   :  { %498 = vst [vmem:[#allocation2 + $0x60] sm:$0xff] %v393_v59 }
 0x10d   :  { %v474_v62 = vpop.f32.mrf.mxu2  ;;  %v480_v63 = vpop.f32.mrf.mxu3  ;;  %499 = vst [vmem:[#allocation2 + $0x68] sm:$0xff] %v434_v61  ;;  %v5028_v61 = vmov 0.0  }
 0x10e   :  { %v475_v48 = vadd.f32 %v474_v62, %v5002_v52  ;;  %v481_v51 = vadd.f32 %v480_v63, %v5002_v52 }
 0x110   :  { %500 = vst [vmem:[#allocation2 + $0x70] sm:$0xff] %v475_v48 }
 0x111   :  { %506 = vst [vmem:[#allocation2 + $0xa0] sm:$0xff] %v481_v51  ;;  %v395_v53 = vpop.f32.mrf.mxu0  ;;  %v436_v55 = vpop.f32.mrf.mxu1 }
 0x112   :  { %v396_v54 = vadd.f32 %v395_v53, %v4998_v49  ;;  %v437_v56 = vadd.f32 %v436_v55, %v5000_v50 }
 0x114   :  { %501 = vst [vmem:[#allocation2 + $0x78] sm:$0xff] %v396_v54 }
 0x115   :  { %v477_v57 = vpop.f32.mrf.mxu2  ;;  %v483_v58 = vpop.f32.mrf.mxu3  ;;  %502 = vst [vmem:[#allocation2 + $0x80] sm:$0xff] %v437_v56 }
 0x116   :  { %v478_v59 = vadd.f32 %v477_v57, %v5002_v52  ;;  %v484_v60 = vadd.f32 %v483_v58, %v5002_v52 }
 0x118   :  { %503 = vst [vmem:[#allocation2 + $0x88] sm:$0xff] %v478_v59 }
 0x119   :  { %509 = vst [vmem:[#allocation2 + $0xb8] sm:$0xff] %v484_v60 }
 0x11a LB: > { %582 = vmatpush.msra.mxu0 %v4942_v45  ;;  %602 = vmatpush.msra.mxu1 %v4944_v46  ;;  %v5462_v9 = vld [vmem:[#allocation47_spill] sm:$0xff]  ;;  %v5463_v6 = vld [vmem:[#allocation44_spill] sm:$0xff]  ;;  %v5464_v7 = vld [vmem:[#allocation45_spill] sm:$0xff]  ;;  %s4093_s12 = sshll.u32 %s4647_s13, 3  ;;  %s564_s13 = sadd.s32 1, %s4647_s13   ;;  %s4647_s13 = sphi %s5030_s13, %s564_s13   ;;  %v4643_v61 = vphi %v5028_v61, %v5474_v61  }
 0x11b   : > { %622 = vmatpush.msra.mxu2 %v4946_v47  ;;  %v5465_v8 = vld [vmem:[#allocation46_spill] sm:$0xff]  ;;  %v5466_v3 = vld [vmem:[#allocation41_spill] sm:$0xff]  ;;  %v5468_v5 = vld [vmem:[#allocation43_spill] sm:$0xff]  ;;  %s567_s27 = sshra.s32 %s4093_s12, 3  ;;  %p561_p0 = scmp.ge.s32.totalorder %s564_s13, 8  }
 0x11c   : > { %583 = vmatpush.msra.mxu0 %v4936_v42  ;;  %603 = vmatpush.msra.mxu1 %v4938_v43  ;;  %v5467_v4 = vld [vmem:[#allocation42_spill] sm:$0xff]  ;;  %v5470_v1 = vld [vmem:[#allocation39_spill] sm:$0xff]  ;;  %v5471_v2 = vld [vmem:[#allocation40_spill] sm:$0xff]  ;;  %s4145_s4 = smul.u32 24, %s567_s27  ;;  %vm838_vm9 = vcmask (%p561_p0), 1043456   ;;  %s5475_s2 = sld [smem:[#allocation54_spill]] (%p561_p0) }
 0x11d   : > { %623 = vmatpush.msra.mxu2 %v4940_v44  ;;  %v5469_v0 = vld [vmem:[#allocation38_spill] sm:$0xff]  ;;  %v5472_v49 = vld [vmem:[#allocation48_spill] sm:$0xff]  ;;  %vm834_vm10 = vcmask (%p561_p0), 97280   ;;  %vm1196_vm11 = vcmask (%p561_p0), 1045504   ;;  %vm1410_vm12 = vcmask (%p561_p0), 1041408   ;;  %vm1192_vm13 = vcmask (%p561_p0), 48128  }
 0x11e   : > { %584 = vmatpush.msra.mxu0 %v4930_v39  ;;  %604 = vmatpush.msra.mxu1 %v4932_v40  ;;  %v576_v50 = vperm.slane %v5472_v49, 0  ;;  %v577_v52 = vperm.slane %v5472_v49, 1  ;;  %s5092_s11 = scalar_lea.vmem [#allocation2], %s4145_s4  ;;  %v753_v39 = vld [vmem:[#allocation10 + $0x200] sm:$0xff] (%p561_p0)  ;;  %v754_v40 = vld [vmem:[#allocation10 + $0x208] sm:$0xff] (%p561_p0)  ;;  %v788_v42 = vld [vmem:[#allocation10 + $0x318] sm:$0xff] (%p561_p0) }
 0x11f   : > { %624 = vmatpush.msra.mxu2 %v4934_v41  ;;  %v787_v41 = vld [vmem:[#allocation10 + $0x310] sm:$0xff] (%p561_p0)  ;;  %v745_v43 = vld [vmem:[#allocation10 + $0x1c0] sm:$0xff] (%p561_p0)  ;;  %v746_v44 = vld [vmem:[#allocation10 + $0x1c8] sm:$0xff] (%p561_p0)  ;;  %s5476_s16 = sld [smem:[#allocation55_spill]] (%p561_p0)  ;;  %vm1406_vm14 = vcmask (%p561_p0), 80896  }
 0x120   : > { %585 = vmatpush.msra.mxu0 %v4924_v36  ;;  %605 = vmatpush.msra.mxu1 %v4926_v37  ;;  %v572_v62 = vld [vmem:[%s5092_s11] sm:$0xff]  ;;  %v573_v48 = vld [vmem:[%s5092_s11 + $0x8] sm:$0xff]  ;;  %v780_v46 = vld [vmem:[#allocation10 + $0x2d8] sm:$0xff] (%p561_p0)  ;;  %s5477_s20 = sld [smem:[#allocation56_spill]] (%p561_p0) }
 0x121   : > { %625 = vmatpush.msra.mxu2 %v4928_v38  ;;  %v762_v36 = vld [vmem:[#allocation10 + $0x248] sm:$0xff] (%p561_p0)  ;;  %v795_v37 = vld [vmem:[#allocation10 + $0x350] sm:$0xff] (%p561_p0)  ;;  %v796_v38 = vld [vmem:[#allocation10 + $0x358] sm:$0xff] (%p561_p0) }
 0x122   : > { %586 = vmatpush.msra.mxu0 %v4918_v33  ;;  %606 = vmatpush.msra.mxu1 %v4920_v34  ;;  %v803_v33 = vld [vmem:[#allocation10 + $0x390] sm:$0xff] (%p561_p0)  ;;  %v804_v34 = vld [vmem:[#allocation10 + $0x398] sm:$0xff] (%p561_p0)  ;;  %v737_v47 = vld [vmem:[#allocation10 + $0x180] sm:$0xff] (%p561_p0) }
 0x123   : > { %626 = vmatpush.msra.mxu2 %v4922_v35  ;;  %v761_v35 = vld [vmem:[#allocation10 + $0x240] sm:$0xff] (%p561_p0)  ;;  %v779_v45 = vld [vmem:[#allocation10 + $0x2d0] sm:$0xff] (%p561_p0) }
 0x124   : > { %587 = vmatpush.msra.mxu0 %v4912_v30  ;;  %607 = vmatpush.msra.mxu1 %v4914_v31  ;;  %v812_v30 = vld [vmem:[#allocation10 + $0x3d8] sm:$0xff] (%p561_p0)  ;;  %v769_v31 = vld [vmem:[#allocation10 + $0x280] sm:$0xff] (%p561_p0) }
 0x125   : > { %627 = vmatpush.msra.mxu2 %v4916_v32  ;;  %v770_v32 = vld [vmem:[#allocation10 + $0x288] sm:$0xff] (%p561_p0) }
 0x126   : > { %588 = vmatpush.msra.mxu0 %v4906_v27  ;;  %608 = vmatpush.msra.mxu1 %v4908_v28  ;;  %v777_v27 = vld [vmem:[#allocation10 + $0x2c0] sm:$0xff] (%p561_p0)  ;;  %v778_v28 = vld [vmem:[#allocation10 + $0x2c8] sm:$0xff] (%p561_p0) }
 0x127   : > { %628 = vmatpush.msra.mxu2 %v4910_v29  ;;  %v811_v29 = vld [vmem:[#allocation10 + $0x3d0] sm:$0xff] (%p561_p0) }
 0x128   : > { %589 = vmatpush.msra.mxu0 %v4900_v24  ;;  %609 = vmatpush.msra.mxu1 %v4902_v25  ;;  %v786_v24 = vld [vmem:[#allocation10 + $0x308] sm:$0xff] (%p561_p0)  ;;  %v824_v25 = vld [vmem:[#allocation11 + $0x30] sm:$0xff] (%p561_p0) }
 0x129   : > { %629 = vmatpush.msra.mxu2 %v4904_v26  ;;  %v825_v26 = vld [vmem:[#allocation11 + $0x38] sm:$0xff] (%p561_p0) }
 0x12a   : > { %590 = vmatpush.msra.mxu0 %v4894_v21  ;;  %610 = vmatpush.msra.mxu1 %v4896_v22  ;;  %v832_v21 = vld [vmem:[#allocation11 + $0x70] sm:$0xf] (%p561_p0)  ;;  %v833_v22 = vld [vmem:[#allocation11 + $0x78] sm:$0xf] (%p561_p0) }
 0x12b   : > { %630 = vmatpush.msra.mxu2 %v4898_v23  ;;  %v785_v23 = vld [vmem:[#allocation10 + $0x300] sm:$0xff] (%p561_p0) }
 0x12c   : > { %591 = vmatpush.msra.mxu0 %v4888_v18  ;;  %611 = vmatpush.msra.mxu1 %v4890_v19  ;;  %v821_v18 = vld [vmem:[#allocation11 + $0x18] sm:$0xff] (%p561_p0)  ;;  %v793_v19 = vld [vmem:[#allocation10 + $0x340] sm:$0xff] (%p561_p0) }
 0x12d   : > { %631 = vmatpush.msra.mxu2 %v4892_v20  ;;  %v794_v20 = vld [vmem:[#allocation10 + $0x348] sm:$0xff] (%p561_p0) }
 0x12e   : > { %592 = vmatpush.msra.mxu0 %v4882_v15  ;;  %612 = vmatpush.msra.mxu1 %v4884_v16  ;;  %v801_v15 = vld [vmem:[#allocation10 + $0x380] sm:$0xff] (%p561_p0)  ;;  %v802_v16 = vld [vmem:[#allocation10 + $0x388] sm:$0xff] (%p561_p0) }
 0x12f   : > { %632 = vmatpush.msra.mxu2 %v4886_v17  ;;  %v820_v17 = vld [vmem:[#allocation11 + $0x10] sm:$0xff] (%p561_p0) }
 0x130   : > { %593 = vmatpush.msra.mxu0 %v4876_v12  ;;  %613 = vmatpush.msra.mxu1 %v4878_v13  ;;  %v810_v12 = vld [vmem:[#allocation10 + $0x3c8] sm:$0xff] (%p561_p0)  ;;  %v828_v13 = vld [vmem:[#allocation11 + $0x50] sm:$0xf] (%p561_p0) }
 0x131   : > { %633 = vmatpush.msra.mxu2 %v4880_v14  ;;  %v829_v14 = vld [vmem:[#allocation11 + $0x58] sm:$0xf] (%p561_p0) }
 0x132   : > { %594 = vmatpush.msra.mxu0 %v5462_v9  ;;  %614 = vmatpush.msra.mxu1 %v4872_v10  ;;  %v5114_v10 = vld [vmem:[%s5475_s2] sm:$0xff] (%p561_p0) }
 0x133   : > { %634 = vmatpush.msra.mxu2 %v4874_v11  ;;  %v809_v11 = vld [vmem:[#allocation10 + $0x3c0] sm:$0xff] (%p561_p0) }
 0x134   : > { %595 = vmatpush.msra.mxu0 %v5463_v6  ;;  %615 = vmatpush.msra.mxu1 %v5464_v7  ;;  %v578_v6 = vperm.slane %v5472_v49, 2  ;;  %v738_v49 = vld [vmem:[#allocation10 + $0x188] sm:$0xff] (%p561_p0) }
 0x135   : > { %635 = vmatpush.msra.mxu2 %v5465_v8 }
 0x136   : > { %596 = vmatpush.msra.mxu0 %v5466_v3  ;;  %616 = vmatpush.msra.mxu1 %v5467_v4 }
 0x137   : > { %636 = vmatpush.msra.mxu2 %v5468_v5 }
 0x138   : > { %597 = vmatpush.msra.mxu0 %v5469_v0  ;;  %617 = vmatpush.msra.mxu1 %v5470_v1 }
 0x139   : > { %598 = vmatmul.f32.vlgmr.msra.gmra.mxu0 %v4643_v61  ;;  %618 = vmatmul.f32.vlgmr.msra.gmra.mxu1 %v4643_v61 }
 0x13a   : > { %637 = vmatpush.msra.mxu2 %v5471_v2 }
 0x13b   : > { %638 = vmatmul.f32.vlgmr.msra.gmra.mxu2 %v4643_v61 }
 0x1b6   : > { %v599_v63 = vpop.f32.mrf.mxu0  ;;  %v619_v51 = vpop.f32.mrf.mxu1 }
 0x1b7   : > { %v600_v53 = vadd.f32 %v599_v63, %v576_v50  ;;  %v620_v54 = vadd.f32 %v619_v51, %v577_v52 }
 0x1b9   : > { %v642_v55 = vadd.f32 %v600_v53, %v572_v62  ;;  %v662_v56 = vadd.f32 %v620_v54, %v573_v48 }
 0x1bb   : > { %v4095_v57 = vmul.f32 -1.442695, %v642_v55  ;;  %v4096_v58 = vmul.f32 -1.442695, %v662_v56 }
 0x1bd   : > { %4195 = vpow2.f32 %v4095_v57 }
 0x1be   : > { %4197 = vpow2.f32 %v4096_v58  ;;  %v639_v62 = vpop.f32.mrf.mxu2  ;;  %v574_v58 = vld [vmem:[%s5092_s11 + $0x10] sm:$0xff] }
 0x1bf   : > { %v640_v54 = vadd.f32 %v639_v62, %v578_v6 }
 0x1c3   : > { %v4196_v59 = vpop.eup %4195 }
 0x1c4   : > { %v4198_v60 = vpop.eup %4197  ;;  %v646_v0 = vadd.f32 1.0, %v4196_v59 }
 0x1c5   : > { %v666_v1 = vadd.f32 1.0, %v4198_v60 }
 0x1c6   : > { %4199 = vrcp.f32 %v646_v0  ;;  %v658_v63 = vand.u32 2147483648, %v646_v0  ;;  %v656_v51 = vand.u32 2147483647, %v646_v0  ;;  %vm652_vm2 = vweird.f32 %v646_v0 }
 0x1c7   : > { %4201 = vrcp.f32 %v666_v1  ;;  %vm672_vm5 = vweird.f32 %v666_v1  ;;  %v676_v7 = vand.u32 2147483647, %v666_v1 }
 0x1c8   : > { %v659_v56 = vor.u32 1.1754944e-38, %v658_v63  ;;  %vm657_vm4 = vcmp.eq.f32.partialorder %v656_v51, 8.507059e+37  ;;  %v823_v51 = vld [vmem:[#allocation11 + $0x28] sm:$0xff] (%p561_p0) }
 0x1c9   : > { %vm677_vm8 = vcmp.eq.f32.partialorder %v676_v7, 8.507059e+37  ;;  %v818_v7 = vld [vmem:[#allocation11] sm:$0xff] (%p561_p0) }
 0x1cc   : > { %v4200_v2 = vpop.eup %4199 }
 0x1cd   : > { %v4202_v3 = vpop.eup %4201  ;;  %v648_v4 = vmul.f32 %v4200_v2, %v646_v0  ;;  %vm653_vm1 = vweird.f32 %v4200_v2 }
 0x1ce   : > { %v668_v5 = vmul.f32 %v4202_v3, %v666_v1  ;;  %vm654_vm3 = vmor %vm652_vm2, %vm653_vm1  ;;  %vm673_vm6 = vweird.f32 %v4202_v3 }
 0x1cf   : > { %v649_v50 = vsub.f32 1.0, %v648_v4  ;;  %vm674_vm7 = vmor %vm672_vm5, %vm673_vm6 }
 0x1d0   : > { %v669_v52 = vsub.f32 1.0, %v668_v5  ;;  %v678_v5 = vand.u32 2147483648, %v666_v1  ;;  %v826_v1 = vld [vmem:[#allocation11 + $0x40] sm:$0xf] (%p561_p0) }
 0x1d1   : > { %v650_v48 = vmul.f32 %v4200_v2, %v649_v50  ;;  %4097 = vmatpush.msk.msra.mxu2 (%p561_p0), %vm838_vm9, %v826_v1  ;;  %v739_v1 = vld [vmem:[#allocation10 + $0x190] sm:$0xff] (%p561_p0) }
 0x1d2   : > { %v670_v53 = vmul.f32 %v4202_v3, %v669_v52  ;;  %v679_v9 = vor.u32 1.1754944e-38, %v678_v5  ;;  %v755_v5 = vld [vmem:[#allocation10 + $0x210] sm:$0xff] (%p561_p0) }
 0x1d3   : > { %v651_v55 = vadd.f32 %v4200_v2, %v650_v48  ;;  %v822_v48 = vld [vmem:[#allocation11 + $0x20] sm:$0xff] (%p561_p0)  ;;  %878 = vmatpush.msra.mxu2 (%p561_p0), %v818_v7 }
 0x1d4   : > { %v671_v4 = vadd.f32 %v4202_v3, %v670_v53  ;;  %4098 = vmatmul.msk.f32.vlgmr.msra.gmra.mxu2 (%p561_p0), %vm834_vm10, %v5114_v10  ;;  %v771_v53 = vld [vmem:[#allocation10 + $0x290] sm:$0xff] (%p561_p0)  ;;  %v697_v7 = vld [vmem:[#allocation10 + $0x40] sm:$0xff] (%p561_p0) }
 0x1d5   : > { %v655_v57 = vsel %vm654_vm3, %v4200_v2, %v651_v55  ;;  %4101 = vmatpush.msk.msrb.mxu2 (%p561_p0), %vm838_vm9, %v828_v13  ;;  %v729_v55 = vld [vmem:[#allocation10 + $0x140] sm:$0xff] (%p561_p0) }
 0x1d6   : > { %v660_v59 = vsel %vm657_vm4, %v659_v56, %v655_v57  ;;  %v675_v8 = vsel %vm674_vm7, %v4202_v3, %v671_v4  ;;  %v827_v3 = vld [vmem:[#allocation11 + $0x48] sm:$0xf] (%p561_p0)  ;;  %v763_v57 = vld [vmem:[#allocation10 + $0x250] sm:$0xff] (%p561_p0)  ;;  %v813_v13 = vld [vmem:[#allocation10 + $0x3e0] sm:$0xff] (%p561_p0) }
 0x1d7   : > { %v682_v60 = vmul.f32 %v660_v59, %v640_v54  ;;  %v680_v6 = vsel %vm677_vm8, %v679_v9, %v675_v8  ;;  %4099 = vmatpush.msk.msra.mxu3 (%p561_p0), %vm838_vm9, %v827_v3  ;;  %v830_v8 = vld [vmem:[#allocation11 + $0x60] sm:$0xf] (%p561_p0)  ;;  %v831_v9 = vld [vmem:[#allocation11 + $0x68] sm:$0xf] (%p561_p0)  ;;  %918 = vmatpush.msrb.mxu2 (%p561_p0), %v820_v17  ;;  %v772_v54 = vld [vmem:[#allocation10 + $0x298] sm:$0xff] (%p561_p0) }
 0x1d8   : > { %v685_v0 = vsub.f32 1.0, %v680_v6  ;;  %v687_v2 = vmul.f32 %v4643_v61, %v680_v6  ;;  %4105 = vmatpush.msk.msra.mxu0 (%p561_p0), %vm838_vm9, %v830_v8  ;;  %4107 = vmatpush.msk.msra.mxu1 (%p561_p0), %vm838_vm9, %v831_v9  ;;  %v730_v56 = vld [vmem:[#allocation10 + $0x148] sm:$0xff] (%p561_p0)  ;;  %v721_v59 = vld [vmem:[#allocation10 + $0x100] sm:$0xff] (%p561_p0)  ;;  %v740_v3 = vld [vmem:[#allocation10 + $0x198] sm:$0xff] (%p561_p0) }
 0x1d9   : > { %v683_v50 = vadd.f32 %v682_v60, %v574_v58  ;;  %4109 = vmatpush.msk.msra.mxu2 (%p561_p0), %vm838_vm9, %v832_v21  ;;  %v764_v58 = vld [vmem:[#allocation10 + $0x258] sm:$0xff] (%p561_p0)  ;;  %v722_v4 = vld [vmem:[#allocation10 + $0x108] sm:$0xff] (%p561_p0)  ;;  %v731_v9 = vld [vmem:[#allocation10 + $0x150] sm:$0xff] (%p561_p0) }
 0x1da   :  { %958 = vmatpush.msra.mxu0 (%p561_p0), %v822_v48  ;;  %978 = vmatpush.msra.mxu1 (%p561_p0), %v823_v51  ;;  %v756_v60 = vld [vmem:[#allocation10 + $0x218] sm:$0xff] (%p561_p0)  ;;  %v714_v6 = vld [vmem:[#allocation10 + $0xc8] sm:$0xff] (%p561_p0)  ;;  %v689_v48 = vld [vmem:[#allocation10] sm:$0xff] (%p561_p0) }
 0x1db   : > { %4203 = vtanh.f32 %v683_v50  ;;  %998 = vmatpush.msra.mxu2 (%p561_p0), %v824_v25  ;;  %v713_v50 = vld [vmem:[#allocation10 + $0xc0] sm:$0xff] (%p561_p0)  ;;  %4106 = vmatmul.msk.f32.vlgmr.msra.gmra.mxu0 (%p561_p0), %vm834_vm10, %v5114_v10  ;;  %v698_v8 = vld [vmem:[#allocation10 + $0x48] sm:$0xff] (%p561_p0) }
 0x1dc   :  { %1023 = vmatpush.msrb.mxu0 (%p561_p0), %v809_v11  ;;  %1043 = vmatpush.msrb.mxu1 (%p561_p0), %v810_v12  ;;  %v690_v51 = vld [vmem:[#allocation10 + $0x8] sm:$0xff] (%p561_p0)  ;;  %v723_v11 = vld [vmem:[#allocation10 + $0x110] sm:$0xff] (%p561_p0)  ;;  %v724_v12 = vld [vmem:[#allocation10 + $0x118] sm:$0xff] (%p561_p0) }
 0x1dd   :  { %4102 = vmatmul.msk.f32.vlgmr.msrb.gmra.mxu2 (%p561_p0), %vm834_vm10, %v5114_v10  ;;  %4108 = vmatmul.msk.f32.vlgmr.msra.gmra.mxu1 (%p561_p0), %vm834_vm10, %v5114_v10  ;;  %v805_v17 = vld [vmem:[#allocation10 + $0x3a0] sm:$0xff] (%p561_p0)  ;;  %v790_v25 = vld [vmem:[#allocation10 + $0x328] sm:$0xff] (%p561_p0) }
 0x1de   :  { %1024 = vmatpush.msrb.mxu0 (%p561_p0), %v801_v15  ;;  %1044 = vmatpush.msrb.mxu1 (%p561_p0), %v802_v16  ;;  %v715_v15 = vld [vmem:[#allocation10 + $0xd0] sm:$0xff] (%p561_p0)  ;;  %v716_v16 = vld [vmem:[#allocation10 + $0xd8] sm:$0xff] (%p561_p0)  ;;  %v797_v21 = vld [vmem:[#allocation10 + $0x360] sm:$0xff] (%p561_p0) }
 0x1df   :  { %1063 = vmatpush.msrb.mxu2 (%p561_p0), %v811_v29  ;;  %v782_v29 = vld [vmem:[#allocation10 + $0x2e8] sm:$0xff] (%p561_p0) }
 0x1e0   :  { %1025 = vmatpush.msrb.mxu0 (%p561_p0), %v793_v19  ;;  %1045 = vmatpush.msrb.mxu1 (%p561_p0), %v794_v20  ;;  %v707_v19 = vld [vmem:[#allocation10 + $0x90] sm:$0xff] (%p561_p0)  ;;  %v708_v20 = vld [vmem:[#allocation10 + $0x98] sm:$0xff] (%p561_p0) }
 0x1e1   : > { %v4204_v52 = vpop.eup %4203  ;;  %1064 = vmatpush.msrb.mxu2 (%p561_p0), %v803_v33  ;;  %v774_v33 = vld [vmem:[#allocation10 + $0x2a8] sm:$0xff] (%p561_p0) }
 0x1e2   : > { %v686_v62 = vmul.f32 %v4204_v52, %v685_v0  ;;  %1026 = vmatpush.msrb.mxu0 (%p561_p0), %v785_v23  ;;  %1046 = vmatpush.msrb.mxu1 (%p561_p0), %v786_v24  ;;  %v747_v0 = vld [vmem:[#allocation10 + $0x1d0] sm:$0xff] (%p561_p0)  ;;  %v748_v52 = vld [vmem:[#allocation10 + $0x1d8] sm:$0xff] (%p561_p0)  ;;  %v789_v24 = vld [vmem:[#allocation10 + $0x320] sm:$0xff] (%p561_p0) }
 0x1e3   :  { %563 = sbr.rel (!%p561_p0) target bundleno = 282 (0x11a), region = 180  ;;  %1065 = vmatpush.msrb.mxu2 (%p561_p0), %v795_v37  ;;  %v699_v23 = vld [vmem:[#allocation10 + $0x50] sm:$0xff] (%p561_p0)  ;;  %v766_v37 = vld [vmem:[#allocation10 + $0x268] sm:$0xff] (%p561_p0) }
 0x1e4   : > { %v5099_v61 = vadd.f32 %v687_v2, %v686_v62   ;;  %1027 = vmatpush.msrb.mxu0 (%p561_p0), %v777_v27  ;;  %1047 = vmatpush.msrb.mxu1 (%p561_p0), %v778_v28  ;;  %v705_v62 = vld [vmem:[#allocation10 + $0x80] sm:$0xff] (%p561_p0)  ;;  %v706_v2 = vld [vmem:[#allocation10 + $0x88] sm:$0xff] (%p561_p0)  ;;  %v692_v27 = vld [vmem:[#allocation10 + $0x18] sm:$0xff] (%p561_p0) }
 0x1e5   :  { %1066 = vmatpush.msrb.mxu2 (%p561_p0), %v787_v41  ;;  %v781_v28 = vld [vmem:[#allocation10 + $0x2e0] sm:$0xff] (%p561_p0)  ;;  %v758_v41 = vld [vmem:[#allocation10 + $0x228] sm:$0xff] (%p561_p0) }
 0x1e6   : > { %v5473_v63 = vmov %v5099_v61  ;;  %1028 = vmatpush.msrb.mxu0 (%p561_p0), %v769_v31  ;;  %1048 = vmatpush.msrb.mxu1 (%p561_p0), %v770_v32  ;;  %v816_v31 = vld [vmem:[#allocation10 + $0x3f8] sm:$0xff] (%p561_p0)  ;;  %v773_v32 = vld [vmem:[#allocation10 + $0x2a0] sm:$0xff] (%p561_p0) }
 0x1e7   : > { %v5474_v61 = vmov %v5473_v63  ;;  %1067 = vmatpush.msrb.mxu2 (%p561_p0), %v779_v45  ;;  %v750_v45 = vld [vmem:[#allocation10 + $0x1e8] sm:$0xff] (%p561_p0) }
 0x1e8   :  { %v819_v61 = vld [vmem:[#allocation11 + $0x8] sm:$0xff]  ;;  %1029 = vmatpush.msrb.mxu0 %v761_v35  ;;  %1049 = vmatpush.msrb.mxu1 %v762_v36  ;;  %v808_v35 = vld [vmem:[#allocation10 + $0x3b8] sm:$0xff]  ;;  %v765_v36 = vld [vmem:[#allocation10 + $0x260] sm:$0xff] }
 0x1e9   :  { %898 = vmatpush.msra.mxu3 %v819_v61  ;;  %1068 = vmatpush.msrb.mxu2 %v771_v53  ;;  %v732_v61 = vld [vmem:[#allocation10 + $0x158] sm:$0xff]  ;;  %v742_v53 = vld [vmem:[#allocation10 + $0x1a8] sm:$0xff] }
 0x1ea   :  { %4100 = vmatmul.msk.f32.vlgmr.msra.gmra.mxu3 %vm834_vm10, %v5114_v10  ;;  %1030 = vmatpush.msrb.mxu0 %v753_v39  ;;  %v800_v39 = vld [vmem:[#allocation10 + $0x378] sm:$0xff] }
 0x1eb   :  { %4103 = vmatpush.msk.msrb.mxu3 %vm838_vm9, %v829_v14  ;;  %1050 = vmatpush.msrb.mxu1 %v754_v40  ;;  %v814_v14 = vld [vmem:[#allocation10 + $0x3e8] sm:$0xff]  ;;  %v757_v40 = vld [vmem:[#allocation10 + $0x220] sm:$0xff] }
 0x1ec   :  { %1031 = vmatpush.msrb.mxu0 %v745_v43  ;;  %1069 = vmatpush.msrb.mxu2 %v763_v57  ;;  %v792_v43 = vld [vmem:[#allocation10 + $0x338] sm:$0xff]  ;;  %v734_v57 = vld [vmem:[#allocation10 + $0x168] sm:$0xff] }
 0x1ed   :  { %938 = vmatpush.msrb.mxu3 %v821_v18  ;;  %1051 = vmatpush.msrb.mxu1 %v746_v44  ;;  %v806_v18 = vld [vmem:[#allocation10 + $0x3a8] sm:$0xff]  ;;  %v749_v44 = vld [vmem:[#allocation10 + $0x1e0] sm:$0xff] }
 0x1ee   :  { %1032 = vmatpush.msrb.mxu0 %v737_v47  ;;  %1070 = vmatpush.msrb.mxu2 %v755_v5  ;;  %v784_v47 = vld [vmem:[#allocation10 + $0x2f8] sm:$0xff]  ;;  %v726_v5 = vld [vmem:[#allocation10 + $0x128] sm:$0xff] }
 0x1ef   :  { %4111 = vmatpush.msk.msra.mxu3 %vm838_vm9, %v833_v22  ;;  %1052 = vmatpush.msrb.mxu1 %v738_v49  ;;  %v798_v22 = vld [vmem:[#allocation10 + $0x368] sm:$0xff]  ;;  %v741_v49 = vld [vmem:[#allocation10 + $0x1a0] sm:$0xff] }
 0x1f0   :  { %1033 = vmatpush.msrb.mxu0 %v729_v55  ;;  %1071 = vmatpush.msrb.mxu2 %v747_v0  ;;  %v776_v55 = vld [vmem:[#allocation10 + $0x2b8] sm:$0xff]  ;;  %v718_v0 = vld [vmem:[#allocation10 + $0xe8] sm:$0xff] }
 0x1f1   :  { %1018 = vmatpush.msra.mxu3 %v825_v26  ;;  %1053 = vmatpush.msrb.mxu1 %v730_v56  ;;  %v691_v26 = vld [vmem:[#allocation10 + $0x10] sm:$0xff]  ;;  %v733_v56 = vld [vmem:[#allocation10 + $0x160] sm:$0xff] }
 0x1f2   :  { %4104 = vmatmul.msk.f32.vlgmr.msrb.gmra.mxu3 %vm834_vm10, %v5114_v10  ;;  %1034 = vmatpush.msrb.mxu0 %v721_v59  ;;  %v768_v59 = vld [vmem:[#allocation10 + $0x278] sm:$0xff] }
 0x1f3   :  { %1083 = vmatpush.msrb.mxu3 %v812_v30  ;;  %1054 = vmatpush.msrb.mxu1 %v722_v4  ;;  %v815_v30 = vld [vmem:[#allocation10 + $0x3f0] sm:$0xff]  ;;  %v725_v4 = vld [vmem:[#allocation10 + $0x120] sm:$0xff] }
 0x1f4   :  { %1035 = vmatpush.msrb.mxu0 %v713_v50  ;;  %1072 = vmatpush.msrb.mxu2 %v739_v1  ;;  %v760_v50 = vld [vmem:[#allocation10 + $0x238] sm:$0xff]  ;;  %v710_v1 = vld [vmem:[#allocation10 + $0xa8] sm:$0xff] }
 0x1f5   :  { %1084 = vmatpush.msrb.mxu3 %v804_v34  ;;  %1055 = vmatpush.msrb.mxu1 %v714_v6  ;;  %v807_v34 = vld [vmem:[#allocation10 + $0x3b0] sm:$0xff]  ;;  %v717_v6 = vld [vmem:[#allocation10 + $0xe0] sm:$0xff] }
 0x1f6   :  { %1036 = vmatpush.msrb.mxu0 %v705_v62  ;;  %1073 = vmatpush.msrb.mxu2 %v731_v9  ;;  %v752_v62 = vld [vmem:[#allocation10 + $0x1f8] sm:$0xff]  ;;  %v702_v9 = vld [vmem:[#allocation10 + $0x68] sm:$0xff] }
 0x1f7   :  { %1085 = vmatpush.msrb.mxu3 %v796_v38  ;;  %1056 = vmatpush.msrb.mxu1 %v706_v2  ;;  %v799_v38 = vld [vmem:[#allocation10 + $0x370] sm:$0xff]  ;;  %v709_v2 = vld [vmem:[#allocation10 + $0xa0] sm:$0xff] }
 0x1f8   :  { %1037 = vmatpush.msrb.mxu0 %v697_v7  ;;  %1074 = vmatpush.msrb.mxu2 %v723_v11  ;;  %v744_v7 = vld [vmem:[#allocation10 + $0x1b8] sm:$0xff]  ;;  %v694_v11 = vld [vmem:[#allocation10 + $0x28] sm:$0xff] }
 0x1f9   :  { %1086 = vmatpush.msrb.mxu3 %v788_v42  ;;  %1057 = vmatpush.msrb.mxu1 %v698_v8  ;;  %v791_v42 = vld [vmem:[#allocation10 + $0x330] sm:$0xff]  ;;  %v701_v8 = vld [vmem:[#allocation10 + $0x60] sm:$0xff] }
 0x1fa   :  { %1038 = vmatpush.msrb.mxu0 %v689_v48  ;;  %4110 = vmatmul.msk.f32.vlgmr.msra.gmra.mxu2 %vm834_vm10, %v5114_v10  ;;  %v736_v48 = vld [vmem:[#allocation10 + $0x178] sm:$0xff] }
 0x1fb   :  { %1087 = vmatpush.msrb.mxu3 %v780_v46  ;;  %1058 = vmatpush.msrb.mxu1 %v690_v51  ;;  %v783_v46 = vld [vmem:[#allocation10 + $0x2f0] sm:$0xff]  ;;  %v693_v51 = vld [vmem:[#allocation10 + $0x20] sm:$0xff] }
 0x1fc   :  { %4112 = vmatmul.msk.f32.vlgmr.msra.gmra.mxu3 %vm834_vm10, %v5114_v10  ;;  %1039 = vmatmul.f32.vlgmr.msrb.gmra.mxu0 %v5473_v63  ;;  %v700_v10 = vld [vmem:[#allocation10 + $0x58] sm:$0xff] }
 0x1fd   :  { %1088 = vmatpush.msrb.mxu3 %v772_v54  ;;  %1059 = vmatmul.f32.vlgmr.msrb.gmra.mxu1 %v5473_v63  ;;  %v775_v54 = vld [vmem:[#allocation10 + $0x2b0] sm:$0xff] }
 0x1fe   :  { %1103 = vmatpush.msra.mxu0 %v813_v13  ;;  %1123 = vmatpush.msra.mxu1 %v814_v14  ;;  %v728_v13 = vld [vmem:[#allocation10 + $0x138] sm:$0xff]  ;;  %v719_v14 = vld [vmem:[#allocation10 + $0xf0] sm:$0xff] }
 0x1ff   :  { %1089 = vmatpush.msrb.mxu3 %v764_v58  ;;  %1075 = vmatpush.msrb.mxu2 %v715_v15  ;;  %v767_v58 = vld [vmem:[#allocation10 + $0x270] sm:$0xff]  ;;  %v720_v15 = vld [vmem:[#allocation10 + $0xf8] sm:$0xff] }
 0x200   :  { %1104 = vmatpush.msra.mxu0 %v805_v17  ;;  %1124 = vmatpush.msra.mxu1 %v806_v18  ;;  %v1189_v17 = vld [vmem:[#allocation13 + $0x28] sm:$0x3f]  ;;  %v711_v18 = vld [vmem:[#allocation10 + $0xb0] sm:$0xff] }
 0x201   :  { %1090 = vmatpush.msrb.mxu3 %v756_v60  ;;  %1076 = vmatpush.msrb.mxu2 %v707_v19  ;;  %v759_v60 = vld [vmem:[#allocation10 + $0x230] sm:$0xff]  ;;  %v712_v19 = vld [vmem:[#allocation10 + $0xb8] sm:$0xff] }
 0x202   :  { %1105 = vmatpush.msra.mxu0 %v797_v21  ;;  %1125 = vmatpush.msra.mxu1 %v798_v22  ;;  %v1399_v21 = vld [vmem:[#allocation14 + $0x48] sm:$0x3]  ;;  %v703_v22 = vld [vmem:[#allocation10 + $0x70] sm:$0xff] }
 0x203   :  { %1091 = vmatpush.msrb.mxu3 %v748_v52  ;;  %1077 = vmatpush.msrb.mxu2 %v699_v23  ;;  %v751_v52 = vld [vmem:[#allocation10 + $0x1f0] sm:$0xff]  ;;  %v704_v23 = vld [vmem:[#allocation10 + $0x78] sm:$0xff] }
 0x204   :  { %1106 = vmatpush.msra.mxu0 %v789_v24  ;;  %1126 = vmatpush.msra.mxu1 %v790_v25  ;;  %v1391_v24 = vld [vmem:[#allocation14 + $0x8] sm:$0xff]  ;;  %v695_v25 = vld [vmem:[#allocation10 + $0x30] sm:$0xff] }
 0x205   :  { %1092 = vmatpush.msrb.mxu3 %v740_v3  ;;  %1078 = vmatpush.msrb.mxu2 %v691_v26  ;;  %v743_v3 = vld [vmem:[#allocation10 + $0x1b0] sm:$0xff]  ;;  %v696_v26 = vld [vmem:[#allocation10 + $0x38] sm:$0xff] }
 0x206   :  { %1079 = vmatmul.f32.vlgmr.msrb.gmra.mxu2 %v5473_v63  ;;  %1107 = vmatpush.msra.mxu0 %v781_v28  ;;  %v1184_v28 = vld [vmem:[#allocation13] sm:$0x3f] }
 0x207   :  { %1093 = vmatpush.msrb.mxu3 %v732_v61  ;;  %1127 = vmatpush.msra.mxu1 %v782_v29  ;;  %v735_v61 = vld [vmem:[#allocation10 + $0x170] sm:$0xff]  ;;  %v1185_v29 = vld [vmem:[#allocation13 + $0x8] sm:$0x3f] }
 0x208   :  { %1143 = vmatpush.msra.mxu2 %v815_v30  ;;  %1108 = vmatpush.msra.mxu0 %v773_v32  ;;  %v1402_v30 = vld [vmem:[#allocation14 + $0x60] sm:$0x3]  ;;  %v1186_v32 = vld [vmem:[#allocation13 + $0x10] sm:$0x3f] }
 0x209   :  { %1094 = vmatpush.msrb.mxu3 %v724_v12  ;;  %1128 = vmatpush.msra.mxu1 %v774_v33  ;;  %v727_v12 = vld [vmem:[#allocation10 + $0x130] sm:$0xff]  ;;  %v1187_v33 = vld [vmem:[#allocation13 + $0x18] sm:$0x3f] }
 0x20a   :  { %1144 = vmatpush.msra.mxu2 %v807_v34  ;;  %1109 = vmatpush.msra.mxu0 %v765_v36  ;;  %v1394_v34 = vld [vmem:[#allocation14 + $0x20] sm:$0xff]  ;;  %v1190_v36 = vld [vmem:[#allocation13 + $0x30] sm:$0x3f] }
 0x20b   :  { %1095 = vmatpush.msrb.mxu3 %v716_v16  ;;  %1129 = vmatpush.msra.mxu1 %v766_v37  ;;  %v1188_v16 = vld [vmem:[#allocation13 + $0x20] sm:$0x3f]  ;;  %v1191_v37 = vld [vmem:[#allocation13 + $0x38] sm:$0x3f] }
 0x20c   :  { %1145 = vmatpush.msra.mxu2 %v799_v38  ;;  %1110 = vmatpush.msra.mxu0 %v757_v40  ;;  %v1400_v38 = vld [vmem:[#allocation14 + $0x50] sm:$0x3] }
 0x20d   :  { %1096 = vmatpush.msrb.mxu3 %v708_v20  ;;  %1130 = vmatpush.msra.mxu1 %v758_v41  ;;  %v1398_v20 = vld [vmem:[#allocation14 + $0x40] sm:$0x3]  ;;  %v1392_v40 = vld [vmem:[#allocation14 + $0x10] sm:$0xff]  ;;  %v1393_v41 = vld [vmem:[#allocation14 + $0x18] sm:$0xff] }
 0x20e   :  { %1146 = vmatpush.msra.mxu2 %v791_v42  ;;  %1111 = vmatpush.msra.mxu0 %v749_v44  ;;  %v1404_v42 = vld [vmem:[#allocation14 + $0x70] sm:$0x3] }
 0x20f   :  { %1097 = vmatpush.msrb.mxu3 %v700_v10  ;;  %1131 = vmatpush.msra.mxu1 %v750_v45  ;;  %v1390_v10 = vld [vmem:[#allocation14] sm:$0xff]  ;;  %v1396_v44 = vld [vmem:[#allocation14 + $0x30] sm:$0xff]  ;;  %v1397_v45 = vld [vmem:[#allocation14 + $0x38] sm:$0xff] }
 0x210   :  { %1147 = vmatpush.msra.mxu2 %v783_v46  ;;  %1112 = vmatpush.msra.mxu0 %v741_v49  ;;  %v1719_v46 = vld [vmem:[#allocation17 + $0x2d0] sm:$0xff]  ;;  %v1713_v49 = vld [vmem:[#allocation17 + $0x2a0] sm:$0xff] }
 0x211   :  { %1098 = vmatpush.msrb.mxu3 %v692_v27  ;;  %1132 = vmatpush.msra.mxu1 %v742_v53  ;;  %v1183_v27 = vld [vmem:[%s5418_s6] sm:$0xff] }
 0x212   :  { %1099 = vmatmul.f32.vlgmr.msrb.gmra.mxu3 %v5473_v63  ;;  %1148 = vmatpush.msra.mxu2 %v775_v54  ;;  %v1809_v53 = vld [vmem:[#allocation17 + $0x5a0] sm:$0xff]  ;;  %v1707_v54 = vld [vmem:[#allocation17 + $0x270] sm:$0xff] }
 0x213   :  { %1163 = vmatpush.msra.mxu3 %v816_v31  ;;  %1113 = vmatpush.msra.mxu0 %v733_v56  ;;  %v1403_v31 = vld [vmem:[#allocation14 + $0x68] sm:$0x3] }
 0x214   :  { %1133 = vmatpush.msra.mxu1 %v734_v57  ;;  %1149 = vmatpush.msra.mxu2 %v767_v58  ;;  %v1701_v56 = vld [vmem:[#allocation17 + $0x240] sm:$0xff]  ;;  %v1695_v58 = vld [vmem:[#allocation17 + $0x210] sm:$0xff] }
 0x215   :  { %1164 = vmatpush.msra.mxu3 %v808_v35  ;;  %1114 = vmatpush.msra.mxu0 %v725_v4  ;;  %v1395_v35 = vld [vmem:[#allocation14 + $0x28] sm:$0xff] }
 0x216   :  { %1134 = vmatpush.msra.mxu1 %v726_v5  ;;  %1150 = vmatpush.msra.mxu2 %v759_v60  ;;  %v1797_v57 = vld [vmem:[#allocation17 + $0x540] sm:$0xff]  ;;  %v1683_v60 = vld [vmem:[#allocation17 + $0x1b0] sm:$0xff] }
 0x217   :  { %1165 = vmatpush.msra.mxu3 %v800_v39  ;;  %1115 = vmatpush.msra.mxu0 %v717_v6  ;;  %v1401_v39 = vld [vmem:[#allocation14 + $0x58] sm:$0x3]  ;;  %v1689_v4 = vld [vmem:[#allocation17 + $0x1e0] sm:$0xff] }
 0x218   :  { %1135 = vmatpush.msra.mxu1 %v718_v0  ;;  %1151 = vmatpush.msra.mxu2 %v751_v52  ;;  %v1785_v5 = vld [vmem:[#allocation17 + $0x4e0] sm:$0xff]  ;;  %v1671_v52 = vld [vmem:[#allocation17 + $0x150] sm:$0xff] }
 0x219   :  { %1166 = vmatpush.msra.mxu3 %v792_v43  ;;  %1116 = vmatpush.msra.mxu0 %v709_v2  ;;  %v1405_v43 = vld [vmem:[#allocation14 + $0x78] sm:$0x3]  ;;  %v1677_v6 = vld [vmem:[#allocation17 + $0x180] sm:$0xff] }
 0x21a   :  { %1136 = vmatpush.msra.mxu1 %v710_v1  ;;  %1152 = vmatpush.msra.mxu2 %v743_v3  ;;  %v1773_v0 = vld [vmem:[#allocation17 + $0x480] sm:$0xff]  ;;  %v1659_v3 = vld [vmem:[#allocation17 + $0xf0] sm:$0xff] }
 0x21b   :  { %1167 = vmatpush.msra.mxu3 %v784_v47  ;;  %1117 = vmatpush.msra.mxu0 %v701_v8  ;;  %v1815_v47 = vld [vmem:[#allocation17 + $0x5d0] sm:$0xff]  ;;  %v1665_v2 = vld [vmem:[#allocation17 + $0x120] sm:$0xff] }
 0x21c   :  { %1137 = vmatpush.msra.mxu1 %v702_v9  ;;  %1153 = vmatpush.msra.mxu2 %v735_v61  ;;  %v1761_v1 = vld [vmem:[#allocation17 + $0x420] sm:$0xff]  ;;  %v1911_v8 = vld [vmem:[#allocation17 + $0x8d0] sm:$0xff] }
 0x21d   :  { %1168 = vmatpush.msra.mxu3 %v776_v55  ;;  %1118 = vmatpush.msra.mxu0 %v693_v51  ;;  %v1803_v55 = vld [vmem:[#allocation17 + $0x570] sm:$0xff]  ;;  %v1653_v9 = vld [vmem:[#allocation17 + $0xc0] sm:$0xff] }
 0x21e   :  { %1138 = vmatpush.msra.mxu1 %v694_v11  ;;  %1154 = vmatpush.msra.mxu2 %v727_v12  ;;  %v2007_v61 = vld [vmem:[#allocation17 + $0xbd0] sm:$0xff]  ;;  %v1905_v51 = vld [vmem:[#allocation17 + $0x8a0] sm:$0xff] }
 0x21f   :  { %1169 = vmatpush.msra.mxu3 %v768_v59  ;;  %1119 = vmatmul.f32.vlgmr.msra.gmra.mxu0 %v5473_v63  ;;  %v1791_v59 = vld [vmem:[#allocation17 + $0x510] sm:$0xff]  ;;  %v2001_v11 = vld [vmem:[#allocation17 + $0xba0] sm:$0xff] }
 0x220   :  { %1139 = vmatmul.f32.vlgmr.msra.gmra.mxu1 %v5473_v63  ;;  %1155 = vmatpush.msra.mxu2 %v719_v14  ;;  %v1899_v12 = vld [vmem:[#allocation17 + $0x870] sm:$0xff] }
 0x221   :  { %1170 = vmatpush.msra.mxu3 %v760_v50  ;;  %4121 = vmatpush.msk.msrb.mxu0 %vm1196_vm11, %v1188_v16  ;;  %v1779_v50 = vld [vmem:[#allocation17 + $0x4b0] sm:$0xff]  ;;  %v1893_v16 = vld [vmem:[#allocation17 + $0x840] sm:$0xff] }
 0x222   :  { %4123 = vmatpush.msk.msrb.mxu1 %vm1196_vm11, %v1189_v17  ;;  %1156 = vmatpush.msra.mxu2 %v711_v18  ;;  %v1647_v14 = vld [vmem:[#allocation17 + $0x90] sm:$0xff]  ;;  %v1989_v17 = vld [vmem:[#allocation17 + $0xb40] sm:$0xff] }
 0x223   :  { %1171 = vmatpush.msra.mxu3 %v752_v62  ;;  %4129 = vmatpush.msk.msra.mxu0 %vm1410_vm12, %v1398_v20  ;;  %v1767_v62 = vld [vmem:[#allocation17 + $0x450] sm:$0xff]  ;;  %v1641_v18 = vld [vmem:[#allocation17 + $0x60] sm:$0xff] }
 0x224   :  { %4131 = vmatpush.msk.msra.mxu1 %vm1410_vm12, %v1399_v21  ;;  %1157 = vmatpush.msra.mxu2 %v703_v22  ;;  %v1887_v20 = vld [vmem:[#allocation17 + $0x810] sm:$0xff] }
 0x225   :  { %1172 = vmatpush.msra.mxu3 %v744_v7  ;;  %1450 = vmatpush.msra.mxu0 %v1390_v10  ;;  %v1755_v7 = vld [vmem:[#allocation17 + $0x3f0] sm:$0xff]  ;;  %v1881_v10 = vld [vmem:[#allocation17 + $0x7e0] sm:$0xff] }
 0x226   :  { %1470 = vmatpush.msra.mxu1 %v1391_v24  ;;  %1158 = vmatpush.msra.mxu2 %v695_v25  ;;  %v1983_v21 = vld [vmem:[#allocation17 + $0xb10] sm:$0xff]  ;;  %v1977_v24 = vld [vmem:[#allocation17 + $0xae0] sm:$0xff] }
 0x227   :  { %1173 = vmatpush.msra.mxu3 %v736_v48  ;;  %1159 = vmatmul.f32.vlgmr.msra.gmra.mxu2 %v5473_v63  ;;  %v1749_v48 = vld [vmem:[#allocation17 + $0x3c0] sm:$0xff]  ;;  %v1635_v22 = vld [vmem:[#allocation17 + $0x30] sm:$0xff] }
 0x228   :  { %4122 = vmatmul.msk.f32.vlgmr.msrb.gmra.mxu0 %vm1192_vm13, %v1183_v27  ;;  %4124 = vmatmul.msk.f32.vlgmr.msrb.gmra.mxu1 %vm1192_vm13, %v1183_v27  ;;  %v1629_v25 = vld [vmem:[#allocation17] sm:$0xff] }
 0x229   :  { %1174 = vmatpush.msra.mxu3 %v728_v13  ;;  %4113 = vmatpush.msk.msrb.mxu2 %vm1196_vm11, %v1184_v28  ;;  %v1995_v13 = vld [vmem:[#allocation17 + $0xb70] sm:$0xff] }
 0x22a   :  { %4137 = vmatpush.msk.msrb.mxu0 %vm1410_vm12, %v1402_v30  ;;  %4139 = vmatpush.msk.msrb.mxu1 %vm1410_vm12, %v1403_v31  ;;  %v2199_v28 = vld [vmem:[#allocation17 + $0x11d0] sm:$0xff]  ;;  %v2193_v30 = vld [vmem:[#allocation17 + $0x11a0] sm:$0xff] }
 0x22b   :  { %1175 = vmatpush.msra.mxu3 %v720_v15  ;;  %4117 = vmatpush.msk.msra.mxu2 %vm1196_vm11, %v1186_v32  ;;  %v1743_v15 = vld [vmem:[#allocation17 + $0x390] sm:$0xff] }
 0x22c   :  { %1530 = vmatpush.msrb.mxu0 %v1394_v34  ;;  %1550 = vmatpush.msrb.mxu1 %v1395_v35  ;;  %v1875_v31 = vld [vmem:[#allocation17 + $0x7b0] sm:$0xff]  ;;  %v1869_v35 = vld [vmem:[#allocation17 + $0x780] sm:$0xff] }
 0x22d   :  { %1176 = vmatpush.msra.mxu3 %v712_v19  ;;  %v1737_v19 = vld [vmem:[#allocation17 + $0x360] sm:$0xff]  ;;  %v1971_v32 = vld [vmem:[#allocation17 + $0xab0] sm:$0xff] }
 0x22e   :  { %v2187_v34 = vld [vmem:[#allocation17 + $0x1170] sm:$0xff] }
 0x22f   :  { %1177 = vmatpush.msra.mxu3 %v704_v23  ;;  %4114 = vmatmul.msk.f32.vlgmr.msrb.gmra.mxu2 %vm1192_vm13, %v1183_v27  ;;  %v1731_v23 = vld [vmem:[#allocation17 + $0x330] sm:$0xff] }
 0x230   :  { %4125 = vmatpush.msk.msrb.mxu2 %vm1196_vm11, %v1190_v36  ;;  %v2085_v36 = vld [vmem:[#allocation17 + $0xe40] sm:$0xff] }
 0x231   :  { %1178 = vmatpush.msra.mxu3 %v696_v26  ;;  %v1725_v26 = vld [vmem:[#allocation17 + $0x300] sm:$0xff] }
 0x232   :  { %1179 = vmatmul.f32.vlgmr.msra.gmra.mxu3 %v5473_v63  ;;  %v1389_v63 = vld [vmem:[%s5476_s16] sm:$0xff] }
 0x233   :  { %4115 = vmatpush.msk.msrb.mxu3 %vm1196_vm11, %v1185_v29  ;;  %4130 = vmatmul.msk.f32.vlgmr.msra.gmra.mxu0 %vm1406_vm14, %v1389_v63  ;;  %v2097_v29 = vld [vmem:[#allocation17 + $0xea0] sm:$0xff] }
 0x234   :  { %4132 = vmatmul.msk.f32.vlgmr.msra.gmra.mxu1 %vm1406_vm14, %v1389_v63  ;;  %2411 = vmatpush.msra.mxu0 %v1719_v46  ;;  %v1851_v46 = vld [vmem:[#allocation17 + $0x6f0] sm:$0xff] }
 0x235   :  { %4119 = vmatpush.msk.msra.mxu3 %vm1196_vm11, %v1187_v33  ;;  %2431 = vmatpush.msra.mxu1 %v1815_v47  ;;  %v2091_v33 = vld [vmem:[#allocation17 + $0xe70] sm:$0xff] }
 0x236   :  { %2412 = vmatpush.msra.mxu0 %v1713_v49  ;;  %v1947_v47 = vld [vmem:[#allocation17 + $0x9f0] sm:$0xff] }
 0x237   :  { %4118 = vmatmul.msk.f32.vlgmr.msra.gmra.mxu2 %vm1192_vm13, %v1183_v27  ;;  %2432 = vmatpush.msra.mxu1 %v1809_v53 }
 0x238   :  { %4133 = vmatpush.msk.msra.mxu2 %vm1410_vm12, %v1400_v38  ;;  %2413 = vmatpush.msra.mxu0 %v1707_v54  ;;  %v1863_v38 = vld [vmem:[#allocation17 + $0x750] sm:$0xff] }
 0x239   :  { %2433 = vmatpush.msra.mxu1 %v1803_v55  ;;  %v2067_v54 = vld [vmem:[#allocation17 + $0xdb0] sm:$0xff] }
 0x23a   :  { %4116 = vmatmul.msk.f32.vlgmr.msrb.gmra.mxu3 %vm1192_vm13, %v1183_v27  ;;  %1490 = vmatpush.msra.mxu2 %v1392_v40  ;;  %v2079_v40 = vld [vmem:[#allocation17 + $0xe10] sm:$0xff] }
 0x23b   :  { %4127 = vmatpush.msk.msrb.mxu3 %vm1196_vm11, %v1191_v37  ;;  %4138 = vmatmul.msk.f32.vlgmr.msrb.gmra.mxu0 %vm1406_vm14, %v1389_v63  ;;  %v2181_v37 = vld [vmem:[#allocation17 + $0x1140] sm:$0xff]  ;;  %v2163_v55 = vld [vmem:[#allocation17 + $0x10b0] sm:$0xff] }
 0x23c   :  { %4140 = vmatmul.msk.f32.vlgmr.msrb.gmra.mxu1 %vm1406_vm14, %v1389_v63  ;;  %2414 = vmatpush.msra.mxu0 %v1701_v56  ;;  %v1845_v56 = vld [vmem:[#allocation17 + $0x6c0] sm:$0xff] }
 0x23d   :  { %2434 = vmatpush.msra.mxu1 %v1797_v57  ;;  %v1941_v57 = vld [vmem:[#allocation17 + $0x9c0] sm:$0xff] }
 0x23e   :  { %2415 = vmatpush.msra.mxu0 %v1695_v58  ;;  %v2061_v58 = vld [vmem:[#allocation17 + $0xd80] sm:$0xff] }
 0x23f   :  { %4126 = vmatmul.msk.f32.vlgmr.msrb.gmra.mxu2 %vm1192_vm13, %v1183_v27  ;;  %2435 = vmatpush.msra.mxu1 %v1791_v59  ;;  %v2157_v59 = vld [vmem:[#allocation17 + $0x1080] sm:$0xff] }
 0x240   :  { %4141 = vmatpush.msk.msrb.mxu2 %vm1410_vm12, %v1404_v42  ;;  %2416 = vmatpush.msra.mxu0 %v1689_v4  ;;  %v1857_v42 = vld [vmem:[#allocation17 + $0x720] sm:$0xff]  ;;  %v1839_v4 = vld [vmem:[#allocation17 + $0x690] sm:$0xff] }
 0x241   :  { %2436 = vmatpush.msra.mxu1 %v1785_v5  ;;  %v1935_v5 = vld [vmem:[#allocation17 + $0x990] sm:$0xff] }
 0x242   :  { %4120 = vmatmul.msk.f32.vlgmr.msra.gmra.mxu3 %vm1192_vm13, %v1183_v27  ;;  %1570 = vmatpush.msrb.mxu2 %v1396_v44  ;;  %v2073_v44 = vld [vmem:[#allocation17 + $0xde0] sm:$0xff] }
 0x243   :  { %4135 = vmatpush.msk.msra.mxu3 %vm1410_vm12, %v1401_v39  ;;  %2417 = vmatpush.msra.mxu0 %v1683_v60  ;;  %v1959_v39 = vld [vmem:[#allocation17 + $0xa50] sm:$0xff] }
 0x244   :  { %2437 = vmatpush.msra.mxu1 %v1779_v50 }
 0x245   :  { %1510 = vmatpush.msra.mxu3 %v1393_v41  ;;  %2418 = vmatpush.msra.mxu0 %v1677_v6  ;;  %v2175_v41 = vld [vmem:[#allocation17 + $0x1110] sm:$0xff] }
 0x246   :  { %2438 = vmatpush.msra.mxu1 %v1773_v0  ;;  %v2055_v6 = vld [vmem:[#allocation17 + $0xd50] sm:$0xff] }
 0x247   :  { %4134 = vmatmul.msk.f32.vlgmr.msra.gmra.mxu2 %vm1406_vm14, %v1389_v63  ;;  %2419 = vmatpush.msra.mxu0 %v1671_v52  ;;  %v2151_v0 = vld [vmem:[#allocation17 + $0x1050] sm:$0xff]  ;;  %v1833_v52 = vld [vmem:[#allocation17 + $0x660] sm:$0xff] }
 0x248   :  { %2439 = vmatpush.msra.mxu1 %v1767_v62  ;;  %2451 = vmatpush.msra.mxu2 %v1911_v8  ;;  %v1929_v62 = vld [vmem:[#allocation17 + $0x960] sm:$0xff]  ;;  %v2043_v8 = vld [vmem:[#allocation17 + $0xcf0] sm:$0xff] }
 0x249   :  { %2420 = vmatpush.msra.mxu0 %v1665_v2  ;;  %v2049_v2 = vld [vmem:[#allocation17 + $0xd20] sm:$0xff] }
 0x24a   :  { %4128 = vmatmul.msk.f32.vlgmr.msrb.gmra.mxu3 %vm1192_vm13, %v1183_v27  ;;  %2440 = vmatpush.msra.mxu1 %v1761_v1  ;;  %v2103_v27 = vld [vmem:[#allocation17 + $0xed0] sm:$0xff]  ;;  %v2145_v1 = vld [vmem:[#allocation17 + $0x1020] sm:$0xff] }
 0x24b   :  { %4143 = vmatpush.msk.msrb.mxu3 %vm1410_vm12, %v1405_v43  ;;  %2421 = vmatpush.msra.mxu0 %v1659_v3  ;;  %v1953_v43 = vld [vmem:[#allocation17 + $0xa20] sm:$0xff]  ;;  %v1827_v3 = vld [vmem:[#allocation17 + $0x630] sm:$0xff] }
 0x24c   :  { %2441 = vmatpush.msra.mxu1 %v1755_v7  ;;  %2452 = vmatpush.msra.mxu2 %v1905_v51  ;;  %v1923_v7 = vld [vmem:[#allocation17 + $0x930] sm:$0xff]  ;;  %v2037_v51 = vld [vmem:[#allocation17 + $0xcc0] sm:$0xff] }
 0x24d   :  { %1590 = vmatpush.msrb.mxu3 %v1397_v45  ;;  %2422 = vmatpush.msra.mxu0 %v1653_v9  ;;  %v2169_v45 = vld [vmem:[#allocation17 + $0x10e0] sm:$0xff]  ;;  %v2139_v9 = vld [vmem:[#allocation17 + $0xff0] sm:$0xff] }
 0x24e   :  { %2442 = vmatpush.msra.mxu1 %v1749_v48  ;;  %2453 = vmatpush.msra.mxu2 %v1899_v12  ;;  %v1917_v48 = vld [vmem:[#allocation17 + $0x900] sm:$0xff]  ;;  %v2295_v12 = vld [vmem:[#allocation17 + $0x14d0] sm:$0xff] }
 0x24f   :  { %4142 = vmatmul.msk.f32.vlgmr.msrb.gmra.mxu2 %vm1406_vm14, %v1389_v63  ;;  %2423 = vmatpush.msra.mxu0 %v1647_v14 }
 0x250   :  { %2443 = vmatpush.msra.mxu1 %v1743_v15  ;;  %2454 = vmatpush.msra.mxu2 %v1893_v16  ;;  %v2391_v15 = vld [vmem:[#allocation17 + $0x17d0] sm:$0xff] }
 0x251   :  { %2424 = vmatpush.msra.mxu0 %v1641_v18  ;;  %v2031_v16 = vld [vmem:[#allocation17 + $0xc90] sm:$0xff]  ;;  %v2289_v18 = vld [vmem:[#allocation17 + $0x14a0] sm:$0xff] }
 0x252   :  { %4136 = vmatmul.msk.f32.vlgmr.msra.gmra.mxu3 %vm1406_vm14, %v1389_v63  ;;  %2444 = vmatpush.msra.mxu1 %v1737_v19  ;;  %v2385_v19 = vld [vmem:[#allocation17 + $0x17a0] sm:$0xff] }
 0x253   :  { %2471 = vmatpush.msra.mxu3 %v2007_v61  ;;  %2455 = vmatpush.msra.mxu2 %v1887_v20  ;;  %v1821_v61 = vld [vmem:[#allocation17 + $0x600] sm:$0xff] }
 0x254   :  { %2425 = vmatpush.msra.mxu0 %v1635_v22  ;;  %2445 = vmatpush.msra.mxu1 %v1731_v23  ;;  %v2025_v22 = vld [vmem:[#allocation17 + $0xc60] sm:$0xff] }
 0x255   :  { %2472 = vmatpush.msra.mxu3 %v2001_v11  ;;  %2456 = vmatpush.msra.mxu2 %v1881_v10  ;;  %v2133_v11 = vld [vmem:[#allocation17 + $0xfc0] sm:$0xff]  ;;  %v2283_v10 = vld [vmem:[#allocation17 + $0x1470] sm:$0xff] }
 0x256   :  { %2426 = vmatpush.msra.mxu0 %v1629_v25  ;;  %2446 = vmatpush.msra.mxu1 %v1725_v26  ;;  %v2121_v23 = vld [vmem:[#allocation17 + $0xf60] sm:$0xff]  ;;  %v2019_v25 = vld [vmem:[#allocation17 + $0xc30] sm:$0xff] }
 0x257   :  { %2473 = vmatpush.msra.mxu3 %v1995_v13  ;;  %2457 = vmatpush.msra.mxu2 %v1875_v31  ;;  %v5182_v49 = vpop.f32.mrf.mxu2  ;;  %v2115_v26 = vld [vmem:[#allocation17 + $0xf30] sm:$0xff]  ;;  %v2013_v31 = vld [vmem:[#allocation17 + $0xc00] sm:$0xff] }
 0x258   :  { %2491 = vmatpush.msrb.mxu0 %v2103_v27  ;;  %2511 = vmatpush.msrb.mxu1 %v2199_v28  ;;  %v5186_v60 = vpop.f32.mrf.mxu0  ;;  %v2277_v27 = vld [vmem:[#allocation17 + $0x1440] sm:$0xff] }
 0x259   :  { %2474 = vmatpush.msra.mxu3 %v1989_v17  ;;  %2458 = vmatpush.msra.mxu2 %v1869_v35  ;;  %v2127_v17 = vld [vmem:[#allocation17 + $0xf90] sm:$0xff]  ;;  %v2373_v28 = vld [vmem:[#allocation17 + $0x1740] sm:$0xff] }
 0x25a   :  { %4144 = vmatmul.msk.f32.vlgmr.msrb.gmra.mxu3 %vm1406_vm14, %v1389_v63  ;;  %2492 = vmatpush.msrb.mxu0 %v2097_v29  ;;  %v1965_v63 = vld [vmem:[#allocation17 + $0xa80] sm:$0xff]  ;;  %v5188_v50 = vpop.f32.mrf.mxu1 }
 0x25b   :  { %2475 = vmatpush.msra.mxu3 %v1983_v21  ;;  %2512 = vmatpush.msrb.mxu1 %v2193_v30  ;;  %v2265_v35 = vld [vmem:[#allocation17 + $0x13e0] sm:$0xff] }
 0x25c   :  { %2493 = vmatpush.msrb.mxu0 %v2091_v33  ;;  %2459 = vmatpush.msra.mxu2 %v1863_v38  ;;  %v2271_v33 = vld [vmem:[#allocation17 + $0x1410] sm:$0xff] }
 0x25d   :  { %2476 = vmatpush.msra.mxu3 %v1977_v24  ;;  %2513 = vmatpush.msrb.mxu1 %v2187_v34  ;;  %v2379_v24 = vld [vmem:[#allocation17 + $0x1770] sm:$0xff] }
 0x25e   :  { %2494 = vmatpush.msrb.mxu0 %v2085_v36  ;;  %2460 = vmatpush.msra.mxu2 %v1857_v42  ;;  %v2367_v34 = vld [vmem:[#allocation17 + $0x1710] sm:$0xff] }
 0x25f   :  { %2477 = vmatpush.msra.mxu3 %v1971_v32  ;;  %2514 = vmatpush.msrb.mxu1 %v2181_v37  ;;  %v2109_v32 = vld [vmem:[#allocation17 + $0xf00] sm:$0xff]  ;;  %v2259_v38 = vld [vmem:[#allocation17 + $0x13b0] sm:$0xff] }
 0x260   :  { %2495 = vmatpush.msrb.mxu0 %v2079_v40  ;;  %2461 = vmatpush.msra.mxu2 %v1851_v46  ;;  %v5190_v13 = vpop.f32.mrf.mxu2  ;;  %v2253_v40 = vld [vmem:[#allocation17 + $0x1380] sm:$0xff]  ;;  %v2247_v42 = vld [vmem:[#allocation17 + $0x1350] sm:$0xff] }
 0x261   :  { %2478 = vmatpush.msra.mxu3 %v1965_v63  ;;  %2515 = vmatpush.msrb.mxu1 %v2175_v41  ;;  %v2361_v63 = vld [vmem:[#allocation17 + $0x16e0] sm:$0xff] }
 0x262   :  { %2496 = vmatpush.msrb.mxu0 %v2073_v44  ;;  %2462 = vmatpush.msra.mxu2 %v1845_v56  ;;  %v2349_v41 = vld [vmem:[#allocation17 + $0x1680] sm:$0xff] }
 0x263   :  { %2479 = vmatpush.msra.mxu3 %v1959_v39  ;;  %2516 = vmatpush.msrb.mxu1 %v2169_v45  ;;  %v2355_v39 = vld [vmem:[#allocation17 + $0x16b0] sm:$0xff]  ;;  %v2241_v46 = vld [vmem:[#allocation17 + $0x1320] sm:$0xff] }
 0x264   :  { %2497 = vmatpush.msrb.mxu0 %v2067_v54  ;;  %2463 = vmatpush.msra.mxu2 %v1839_v4  ;;  %v2235_v54 = vld [vmem:[#allocation17 + $0x12f0] sm:$0xff] }
 0x265   :  { %2480 = vmatpush.msra.mxu3 %v1953_v43  ;;  %2517 = vmatpush.msrb.mxu1 %v2163_v55  ;;  %v2343_v43 = vld [vmem:[#allocation17 + $0x1650] sm:$0xff] }
 0x266   :  { %2498 = vmatpush.msrb.mxu0 %v2061_v58  ;;  %2464 = vmatpush.msra.mxu2 %v1833_v52  ;;  %v2331_v55 = vld [vmem:[#allocation17 + $0x15f0] sm:$0xff]  ;;  %v2229_v58 = vld [vmem:[#allocation17 + $0x12c0] sm:$0xff] }
 0x267   :  { %2481 = vmatpush.msra.mxu3 %v1947_v47  ;;  %2518 = vmatpush.msrb.mxu1 %v2157_v59  ;;  %v2337_v47 = vld [vmem:[#allocation17 + $0x1620] sm:$0xff]  ;;  %v2223_v4 = vld [vmem:[#allocation17 + $0x1290] sm:$0xff] }
 0x268   :  { %2499 = vmatpush.msrb.mxu0 %v2055_v6  ;;  %2465 = vmatpush.msra.mxu2 %v1827_v3  ;;  %v2325_v59 = vld [vmem:[#allocation17 + $0x15c0] sm:$0xff] }
 0x269   :  { %2482 = vmatpush.msra.mxu3 %v1941_v57  ;;  %2519 = vmatpush.msrb.mxu1 %v2151_v0  ;;  %v2217_v52 = vld [vmem:[#allocation17 + $0x1260] sm:$0xff] }
 0x26a   :  { %2500 = vmatpush.msrb.mxu0 %v2049_v2  ;;  %2466 = vmatpush.msra.mxu2 %v1821_v61  ;;  %v2211_v2 = vld [vmem:[#allocation17 + $0x1230] sm:$0xff]  ;;  %v5214_v61 = vld [vmem:[#allocation16] sm:$0xff] }
 0x26b   :  { %2483 = vmatpush.msra.mxu3 %v1935_v5  ;;  %2520 = vmatpush.msrb.mxu1 %v2145_v1  ;;  %v2319_v5 = vld [vmem:[#allocation17 + $0x1590] sm:$0xff] }
 0x26c   :  { %2501 = vmatpush.msrb.mxu0 %v2043_v8  ;;  %2531 = vmatpush.msrb.mxu2 %v2295_v12  ;;  %v2307_v1 = vld [vmem:[#allocation17 + $0x1530] sm:$0xff]  ;;  %v2205_v8 = vld [vmem:[#allocation17 + $0x1200] sm:$0xff] }
 0x26d   :  { %v5184_v53 = vpop.f32.mrf.mxu3  ;;  %2484 = vmatpush.msra.mxu3 %v1929_v62  ;;  %2521 = vmatpush.msrb.mxu1 %v2139_v9  ;;  %v2313_v62 = vld [vmem:[#allocation17 + $0x1560] sm:$0xff] }
 0x26e   :  { %2502 = vmatpush.msrb.mxu0 %v2037_v51  ;;  %2532 = vmatpush.msrb.mxu2 %v2289_v18  ;;  %v2301_v9 = vld [vmem:[#allocation17 + $0x1500] sm:$0xff]  ;;  %v1606_v18 = vperm.slane %v5214_v61, 1 }
 0x26f   :  { %2485 = vmatpush.msra.mxu3 %v1923_v7  ;;  %2522 = vmatpush.msrb.mxu1 %v2133_v11 }
 0x270   :  { %2503 = vmatpush.msrb.mxu0 %v2031_v16  ;;  %2533 = vmatpush.msrb.mxu2 %v2283_v10  ;;  %v1605_v16 = vperm.slane %v5214_v61, 0 }
 0x271   :  { %2486 = vmatpush.msra.mxu3 %v1917_v48  ;;  %2523 = vmatpush.msrb.mxu1 %v2127_v17 }
 0x272   :  { %2504 = vmatpush.msrb.mxu0 %v2025_v22  ;;  %2534 = vmatpush.msrb.mxu2 %v2277_v27 }
 0x273   :  { %2551 = vmatpush.msrb.mxu3 %v2391_v15  ;;  %2524 = vmatpush.msrb.mxu1 %v2121_v23 }
 0x274   :  { %2505 = vmatpush.msrb.mxu0 %v2019_v25  ;;  %2535 = vmatpush.msrb.mxu2 %v2271_v33  ;;  %v1609_v33 = vperm.slane %v5214_v61, 4 }
 0x275   :  { %v5192_v14 = vpop.f32.mrf.mxu3  ;;  %2552 = vmatpush.msrb.mxu3 %v2385_v19  ;;  %2525 = vmatpush.msrb.mxu1 %v2115_v26 }
 0x276   :  { %2506 = vmatpush.msrb.mxu0 %v2013_v31  ;;  %2536 = vmatpush.msrb.mxu2 %v2265_v35  ;;  %v1810_v31 = vld [vmem:[#allocation17 + $0x5a8] sm:$0xff]  ;;  %v1610_v35 = vperm.slane %v5214_v61, 5 }
 0x277   :  { %2553 = vmatpush.msrb.mxu3 %v2379_v24  ;;  %2526 = vmatpush.msrb.mxu1 %v2109_v32 }
 0x278   :  { %2537 = vmatpush.msrb.mxu2 %v2259_v38  ;;  %v1798_v38 = vld [vmem:[#allocation17 + $0x548] sm:$0xff] }
 0x279   :  { %v5194_v20 = vpop.f32.mrf.mxu0  ;;  %2554 = vmatpush.msrb.mxu3 %v2373_v28  ;;  %v1714_v28 = vld [vmem:[#allocation17 + $0x2a8] sm:$0xff] }
 0x27a   :  { %v5196_v21 = vpop.f32.mrf.mxu1  ;;  %2538 = vmatpush.msrb.mxu2 %v2253_v40  ;;  %v1041_v48 = vadd.f32 %v5194_v20, %v5182_v49 }
 0x27b   :  { %2555 = vmatpush.msrb.mxu3 %v2367_v34  ;;  %v1061_v51 = vadd.f32 %v5196_v21, %v5184_v53  ;;  %v1720_v53 = vld [vmem:[#allocation17 + $0x2d8] sm:$0xff] }
 0x27c   :  { %2539 = vmatpush.msrb.mxu2 %v2247_v42  ;;  %v1816_v21 = vld [vmem:[#allocation17 + $0x5d8] sm:$0xff] }
 0x27d   :  { %v5198_v29 = vpop.f32.mrf.mxu2  ;;  %2556 = vmatpush.msrb.mxu3 %v2361_v63  ;;  %v1708_v63 = vld [vmem:[#allocation17 + $0x278] sm:$0xff] }
 0x27e   :  { %2540 = vmatpush.msrb.mxu2 %v2241_v46  ;;  %v1792_v42 = vld [vmem:[#allocation17 + $0x518] sm:$0xff]  ;;  %v1786_v46 = vld [vmem:[#allocation17 + $0x4e8] sm:$0xff] }
 0x27f   :  { %v5200_v30 = vpop.f32.mrf.mxu3  ;;  %2557 = vmatpush.msrb.mxu3 %v2355_v39 }
 0x280   :  { %2541 = vmatpush.msrb.mxu2 %v2235_v54 }
 0x281   :  { %2558 = vmatpush.msrb.mxu3 %v2349_v41  ;;  %v1696_v41 = vld [vmem:[#allocation17 + $0x218] sm:$0xff] }
 0x282   :  { %2542 = vmatpush.msrb.mxu2 %v2229_v58  ;;  %v1774_v58 = vld [vmem:[#allocation17 + $0x488] sm:$0xff] }
 0x283   :  { %2559 = vmatpush.msrb.mxu3 %v2343_v43  ;;  %v1690_v43 = vld [vmem:[#allocation17 + $0x1e8] sm:$0xff] }
 0x284   :  { %2543 = vmatpush.msrb.mxu2 %v2223_v4 }
 0x285   :  { %2560 = vmatpush.msrb.mxu3 %v2337_v47 }
 0x286   :  { %2544 = vmatpush.msrb.mxu2 %v2217_v52  ;;  %v1768_v52 = vld [vmem:[#allocation17 + $0x458] sm:$0xff] }
 0x287   :  { %2561 = vmatpush.msrb.mxu3 %v2331_v55  ;;  %v1684_v55 = vld [vmem:[#allocation17 + $0x1b8] sm:$0xff] }
 0x288   :  { %2545 = vmatpush.msrb.mxu2 %v2211_v2 }
 0x289   :  { %v5206_v44 = vpop.f32.mrf.mxu2  ;;  %2562 = vmatpush.msrb.mxu3 %v2325_v59 }
 0x28a   :  { %2546 = vmatpush.msrb.mxu2 %v2205_v8  ;;  %v1081_v59 = vadd.f32 %v5206_v44, %v5190_v13  ;;  %v1762_v8 = vld [vmem:[#allocation17 + $0x428] sm:$0xff] }
 0x28b   :  { %2563 = vmatpush.msrb.mxu3 %v2319_v5  ;;  %v1672_v5 = vld [vmem:[#allocation17 + $0x158] sm:$0xff] }
 0x28d   :  { %2564 = vmatpush.msrb.mxu3 %v2313_v62 }
 0x28f   :  { %2565 = vmatpush.msrb.mxu3 %v2307_v1  ;;  %v1607_v1 = vperm.slane %v5214_v61, 2 }
 0x291   :  { %2566 = vmatpush.msrb.mxu3 %v2301_v9 }
 0x295   :  { %v5208_v45 = vpop.f32.mrf.mxu3 }
 0x296   :  { %v1101_v4 = vadd.f32 %v5208_v45, %v5192_v14  ;;  %v1756_v14 = vld [vmem:[#allocation17 + $0x3f8] sm:$0xff] }
 0x29c   :  { %v5202_v36 = vpop.f32.mrf.mxu0 }
 0x29d   :  { %v5204_v37 = vpop.f32.mrf.mxu1  ;;  %v1121_v23 = vadd.f32 %v5202_v36, %v5186_v60  ;;  %v1804_v36 = vld [vmem:[#allocation17 + $0x578] sm:$0xff] }
 0x29e   :  { %v1141_v10 = vadd.f32 %v5204_v37, %v5188_v50  ;;  %v1702_v37 = vld [vmem:[#allocation17 + $0x248] sm:$0xff] }
 0x2a5   :  { %v1318_v56 = vpop.f32.mrf.mxu0  ;;  %v1338_v57 = vpop.f32.mrf.mxu1 }
 0x2a6   :  { %v1385_v26 = vadd.f32 %v1318_v56, %v1121_v23  ;;  %v1386_v27 = vadd.f32 %v1338_v57, %v1141_v10  ;;  %v1780_v56 = vld [vmem:[#allocation17 + $0x4b8] sm:$0xff]  ;;  %v1678_v57 = vld [vmem:[#allocation17 + $0x188] sm:$0xff] }
 0x2a7   :  { %v1744_v23 = vld [vmem:[#allocation17 + $0x398] sm:$0xff]  ;;  %v1906_v10 = vld [vmem:[#allocation17 + $0x8a8] sm:$0xff] }
 0x2aa   :  { %v5210_v6 = vpop.f32.mrf.mxu2 }
 0x2b0   :  { %v1452_v3 = vpop.f32.mrf.mxu0 }
 0x2b1   :  { %v1472_v7 = vpop.f32.mrf.mxu1 }
 0x2b2   :  { %v1238_v11 = vpop.f32.mrf.mxu2 }
 0x2b3   :  { %v1381_v15 = vadd.f32 %v1238_v11, %v1041_v48 }
 0x2b5   :  { %v5212_v0 = vpop.f32.mrf.mxu3  ;;  %v1595_v19 = vadd.f32 %v1452_v3, %v1381_v15  ;;  %v1608_v3 = vperm.slane %v5214_v61, 3  ;;  %v1750_v15 = vld [vmem:[#allocation17 + $0x3c8] sm:$0xff] }
 0x2b7   :  { %v5226_v49 = vadd.f32 %v1605_v16, %v1595_v19  ;;  %v1912_v16 = vld [vmem:[#allocation17 + $0x8d8] sm:$0xff]  ;;  %v1181_v19 = vadd.f32 %v5212_v0, %v5200_v30  ;;  %v1738_v30 = vld [vmem:[#allocation17 + $0x368] sm:$0xff] }
 0x2b8   :  { %v1532_v24 = vpop.f32.mrf.mxu0 }
 0x2b9   :  { %v1552_v25 = vpop.f32.mrf.mxu1  ;;  %2427 = vmatmul.f32.vlgmr.msra.gmra.mxu0 %v5226_v49  ;;  %v1599_v32 = vadd.f32 %v1532_v24, %v1385_v26 }
 0x2ba   :  { %2571 = vmatpush.msra.mxu0 %v1720_v53  ;;  %v1278_v60 = vpop.f32.mrf.mxu2  ;;  %v1600_v34 = vadd.f32 %v1552_v25, %v1386_v27  ;;  %v2002_v53 = vld [vmem:[#allocation17 + $0xba8] sm:$0xff]  ;;  %v1611_v25 = vperm.slane %v5214_v61, 6  ;;  %v1900_v27 = vld [vmem:[#allocation17 + $0x878] sm:$0xff] }
 0x2bb   :  { %v5234_v39 = vadd.f32 %v1609_v33, %v1599_v32  ;;  %v1383_v62 = vadd.f32 %v1278_v60, %v1081_v59  ;;  %v1732_v32 = vld [vmem:[#allocation17 + $0x338] sm:$0xff]  ;;  %v1894_v33 = vld [vmem:[#allocation17 + $0x848] sm:$0xff] }
 0x2bc   :  { %2572 = vmatpush.msra.mxu0 %v1714_v28  ;;  %v5236_v40 = vadd.f32 %v1610_v35, %v1600_v34  ;;  %v1996_v28 = vld [vmem:[#allocation17 + $0xb78] sm:$0xff]  ;;  %v1990_v34 = vld [vmem:[#allocation17 + $0xb48] sm:$0xff] }
 0x2bd   :  { %v1258_v12 = vpop.f32.mrf.mxu3  ;;  %v1870_v59 = vld [vmem:[#allocation17 + $0x788] sm:$0xff] }
 0x2be   :  { %v1382_v17 = vadd.f32 %v1258_v12, %v1061_v51  ;;  %2573 = vmatpush.msra.mxu0 %v1708_v63  ;;  %v1660_v51 = vld [vmem:[#allocation17 + $0xf8] sm:$0xff]  ;;  %v1654_v12 = vld [vmem:[#allocation17 + $0xc8] sm:$0xff] }
 0x2bf   :  { %v1630_v63 = vld [vmem:[#allocation17 + $0x8] sm:$0xff] }
 0x2c0   :  { %v1596_v22 = vadd.f32 %v1472_v7, %v1382_v17  ;;  %2574 = vmatpush.msra.mxu0 %v1702_v37  ;;  %v1666_v7 = vld [vmem:[#allocation17 + $0x128] sm:$0xff]  ;;  %v2008_v17 = vld [vmem:[#allocation17 + $0xbd8] sm:$0xff] }
 0x2c1   :  { %2507 = vmatmul.f32.vlgmr.msrb.gmra.mxu0 %v5234_v39  ;;  %v1888_v37 = vld [vmem:[#allocation17 + $0x818] sm:$0xff] }
 0x2c2   :  { %v5228_v20 = vadd.f32 %v1606_v18, %v1596_v22  ;;  %2575 = vmatpush.msra.mxu0 %v1696_v41  ;;  %v1358_v47 = vpop.f32.mrf.mxu2  ;;  %v1161_v18 = vadd.f32 %v5210_v6, %v5198_v29  ;;  %v1648_v22 = vld [vmem:[#allocation17 + $0x98] sm:$0xff]  ;;  %v1612_v29 = vperm.slane %v5214_v61, 7  ;;  %v1642_v6 = vld [vmem:[#allocation17 + $0x68] sm:$0xff] }
 0x2c3   :  { %v2104_v41 = vld [vmem:[#allocation17 + $0xed8] sm:$0xff] }
 0x2c4   :  { %2447 = vmatmul.f32.vlgmr.msra.gmra.mxu1 %v5228_v20  ;;  %2576 = vmatpush.msra.mxu0 %v1690_v43  ;;  %v1882_v43 = vld [vmem:[#allocation17 + $0x7e8] sm:$0xff] }
 0x2c5   :  { %2591 = vmatpush.msra.mxu1 %v1816_v21  ;;  %v1298_v50 = vpop.f32.mrf.mxu3  ;;  %v1387_v21 = vadd.f32 %v1358_v47, %v1161_v18  ;;  %v2098_v47 = vld [vmem:[#allocation17 + $0xea8] sm:$0xff]  ;;  %v1840_v18 = vld [vmem:[#allocation17 + $0x698] sm:$0xff] }
 0x2c6   :  { %2577 = vmatpush.msra.mxu0 %v1684_v55  ;;  %v1384_v2 = vadd.f32 %v1298_v50, %v1101_v4  ;;  %v1636_v50 = vld [vmem:[#allocation17 + $0x38] sm:$0xff]  ;;  %v1966_v4 = vld [vmem:[#allocation17 + $0xa88] sm:$0xff] }
 0x2c7   :  { %2592 = vmatpush.msra.mxu1 %v1810_v31  ;;  %v1876_v55 = vld [vmem:[#allocation17 + $0x7b8] sm:$0xff] }
 0x2c8   :  { %2578 = vmatpush.msra.mxu0 %v1678_v57  ;;  %v2092_v57 = vld [vmem:[#allocation17 + $0xe78] sm:$0xff] }
 0x2c9   :  { %2593 = vmatpush.msra.mxu1 %v1804_v36  ;;  %v1726_v36 = vld [vmem:[#allocation17 + $0x308] sm:$0xff] }
 0x2ca   :  { %2579 = vmatpush.msra.mxu0 %v1672_v5  ;;  %v1492_v9 = vpop.f32.mrf.mxu2  ;;  %v2086_v5 = vld [vmem:[#allocation17 + $0xe48] sm:$0xff] }
 0x2cb   :  { %2594 = vmatpush.msra.mxu1 %v1798_v38  ;;  %v1597_v13 = vadd.f32 %v1492_v9, %v1383_v62  ;;  %v1984_v38 = vld [vmem:[#allocation17 + $0xb18] sm:$0xff]  ;;  %v2074_v9 = vld [vmem:[#allocation17 + $0xde8] sm:$0xff] }
 0x2cc   :  { %2527 = vmatmul.f32.vlgmr.msrb.gmra.mxu1 %v5236_v40  ;;  %2580 = vmatpush.msra.mxu0 %v1666_v7  ;;  %v1864_v62 = vld [vmem:[#allocation17 + $0x758] sm:$0xff]  ;;  %v1858_v7 = vld [vmem:[#allocation17 + $0x728] sm:$0xff] }
 0x2cd   :  { %2595 = vmatpush.msra.mxu1 %v1792_v42  ;;  %v1378_v54 = vpop.f32.mrf.mxu3  ;;  %v5246_v45 = vadd.f32 %v1607_v1, %v1597_v13  ;;  %v2200_v42 = vld [vmem:[#allocation17 + $0x11d8] sm:$0xff] }
 0x2ce   :  { %2581 = vmatpush.msra.mxu0 %v1660_v51  ;;  %v1388_v24 = vadd.f32 %v1378_v54, %v1181_v19  ;;  %v2194_v54 = vld [vmem:[#allocation17 + $0x11a8] sm:$0xff]  ;;  %v2080_v1 = vld [vmem:[#allocation17 + $0xe18] sm:$0xff] }
 0x2cf   :  { %2596 = vmatpush.msra.mxu1 %v1786_v46  ;;  %2467 = vmatmul.f32.vlgmr.msra.gmra.mxu2 %v5246_v45  ;;  %v1978_v46 = vld [vmem:[#allocation17 + $0xae8] sm:$0xff]  ;;  %v1852_v13 = vld [vmem:[#allocation17 + $0x6f8] sm:$0xff] }
 0x2d0   :  { %2582 = vmatpush.msra.mxu0 %v1654_v12  ;;  %2611 = vmatpush.msra.mxu2 %v1912_v16  ;;  %v2068_v51 = vld [vmem:[#allocation17 + $0xdb8] sm:$0xff]  ;;  %v1846_v12 = vld [vmem:[#allocation17 + $0x6c8] sm:$0xff] }
 0x2d1   :  { %2597 = vmatpush.msra.mxu1 %v1780_v56  ;;  %v1972_v56 = vld [vmem:[#allocation17 + $0xab8] sm:$0xff]  ;;  %v2062_v16 = vld [vmem:[#allocation17 + $0xd88] sm:$0xff] }
 0x2d2   :  { %2583 = vmatpush.msra.mxu0 %v1648_v22  ;;  %v1572_v0 = vpop.f32.mrf.mxu2  ;;  %2612 = vmatpush.msra.mxu2 %v1906_v10  ;;  %v1936_v19 = vld [vmem:[#allocation17 + $0x998] sm:$0xff]  ;;  %v1834_v10 = vld [vmem:[#allocation17 + $0x668] sm:$0xff] }
 0x2d3   :  { %2598 = vmatpush.msra.mxu1 %v1774_v58  ;;  %v1601_v31 = vadd.f32 %v1572_v0, %v1387_v21  ;;  %v2188_v58 = vld [vmem:[#allocation17 + $0x1178] sm:$0xff]  ;;  %v2050_v21 = vld [vmem:[#allocation17 + $0xd28] sm:$0xff] }
 0x2d4   :  { %2584 = vmatpush.msra.mxu0 %v1642_v6  ;;  %2613 = vmatpush.msra.mxu2 %v1900_v27  ;;  %v2056_v22 = vld [vmem:[#allocation17 + $0xd58] sm:$0xff]  ;;  %v1822_v0 = vld [vmem:[#allocation17 + $0x608] sm:$0xff] }
 0x2d5   :  { %2599 = vmatpush.msra.mxu1 %v1768_v52  ;;  %v1512_v48 = vpop.f32.mrf.mxu3  ;;  %v5258_v35 = vadd.f32 %v1611_v25, %v1601_v31  ;;  %v2182_v52 = vld [vmem:[#allocation17 + $0x1148] sm:$0xff]  ;;  %v1828_v25 = vld [vmem:[#allocation17 + $0x638] sm:$0xff] }
 0x2d6   :  { %v1598_v44 = vadd.f32 %v1512_v48, %v1384_v2  ;;  %2585 = vmatpush.msra.mxu0 %v1636_v50  ;;  %2614 = vmatpush.msra.mxu2 %v1894_v33  ;;  %v1960_v2 = vld [vmem:[#allocation17 + $0xa58] sm:$0xff]  ;;  %v2170_v48 = vld [vmem:[#allocation17 + $0x10e8] sm:$0xff] }
 0x2d7   :  { %2600 = vmatpush.msra.mxu1 %v1762_v8  ;;  %2547 = vmatmul.f32.vlgmr.msrb.gmra.mxu2 %v5258_v35  ;;  %v1954_v8 = vld [vmem:[#allocation17 + $0xa28] sm:$0xff]  ;;  %v2044_v6 = vld [vmem:[#allocation17 + $0xcf8] sm:$0xff] }
 0x2d8   :  { %v5248_v11 = vadd.f32 %v1608_v3, %v1598_v44  ;;  %2586 = vmatpush.msra.mxu0 %v1630_v63  ;;  %2615 = vmatpush.msra.mxu2 %v1888_v37  ;;  %v2176_v3 = vld [vmem:[#allocation17 + $0x1118] sm:$0xff]  ;;  %v2038_v27 = vld [vmem:[#allocation17 + $0xcc8] sm:$0xff] }
 0x2d9   :  { %2601 = vmatpush.msra.mxu1 %v1756_v14  ;;  %2587 = vmatmul.f32.vlgmr.msra.gmra.mxu0 %v5226_v49  ;;  %v1948_v44 = vld [vmem:[#allocation17 + $0x9f8] sm:$0xff]  ;;  %v2290_v33 = vld [vmem:[#allocation17 + $0x14a8] sm:$0xff] }
 0x2da   :  { %2487 = vmatmul.f32.vlgmr.msra.gmra.mxu3 %v5248_v11  ;;  %2651 = vmatpush.msrb.mxu0 %v2104_v41  ;;  %v2164_v14 = vld [vmem:[#allocation17 + $0x10b8] sm:$0xff]  ;;  %v2026_v63 = vld [vmem:[#allocation17 + $0xc68] sm:$0xff] }
 0x2db   :  { %2602 = vmatpush.msra.mxu1 %v1750_v15  ;;  %2631 = vmatpush.msra.mxu3 %v2008_v17  ;;  %v1942_v15 = vld [vmem:[#allocation17 + $0x9c8] sm:$0xff]  ;;  %v2296_v31 = vld [vmem:[#allocation17 + $0x14d8] sm:$0xff] }
 0x2dc   :  { %2616 = vmatpush.msra.mxu2 %v1882_v43  ;;  %2652 = vmatpush.msrb.mxu0 %v2098_v47  ;;  %v2158_v17 = vld [vmem:[#allocation17 + $0x1088] sm:$0xff]  ;;  %v2032_v50 = vld [vmem:[#allocation17 + $0xc98] sm:$0xff] }
 0x2dd   :  { %2603 = vmatpush.msra.mxu1 %v1744_v23  ;;  %v1592_v26 = vpop.f32.mrf.mxu3  ;;  %2632 = vmatpush.msra.mxu3 %v2002_v53  ;;  %v2152_v23 = vld [vmem:[#allocation17 + $0x1058] sm:$0xff]  ;;  %v1930_v53 = vld [vmem:[#allocation17 + $0x968] sm:$0xff] }
 0x2de   :  { %v1602_v60 = vadd.f32 %v1592_v26, %v1388_v24  ;;  %2617 = vmatpush.msra.mxu2 %v1876_v55  ;;  %2653 = vmatpush.msrb.mxu0 %v2092_v57  ;;  %v2146_v24 = vld [vmem:[#allocation17 + $0x1028] sm:$0xff]  ;;  %v2284_v37 = vld [vmem:[#allocation17 + $0x1478] sm:$0xff]  ;;  %v1721_v57 = vld [vmem:[#allocation17 + $0x2e0] sm:$0xff] }
 0x2df   :  { %2604 = vmatpush.msra.mxu1 %v1738_v30  ;;  %2633 = vmatpush.msra.mxu3 %v1996_v28  ;;  %v2140_v30 = vld [vmem:[#allocation17 + $0xff8] sm:$0xff]  ;;  %v1918_v26 = vld [vmem:[#allocation17 + $0x908] sm:$0xff] }
 0x2e0   :  { %v5260_v61 = vadd.f32 %v1612_v29, %v1602_v60  ;;  %2618 = vmatpush.msra.mxu2 %v1870_v59  ;;  %2654 = vmatpush.msrb.mxu0 %v2086_v5  ;;  %v1924_v29 = vld [vmem:[#allocation17 + $0x938] sm:$0xff]  ;;  %v2134_v28 = vld [vmem:[#allocation17 + $0xfc8] sm:$0xff]  ;;  %v1715_v5 = vld [vmem:[#allocation17 + $0x2b0] sm:$0xff] }
 0x2e1   :  { %2605 = vmatpush.msra.mxu1 %v1732_v32  ;;  %2634 = vmatpush.msra.mxu3 %v1990_v34  ;;  %v2392_v60 = vld [vmem:[#allocation17 + $0x17d8] sm:$0xff]  ;;  %v2386_v34 = vld [vmem:[#allocation17 + $0x17a8] sm:$0xff] }
 0x2e2   :  { %2567 = vmatmul.f32.vlgmr.msrb.gmra.mxu3 %v5260_v61  ;;  %2619 = vmatpush.msra.mxu2 %v1864_v62  ;;  %v2128_v32 = vld [vmem:[#allocation17 + $0xf98] sm:$0xff]  ;;  %v2278_v43 = vld [vmem:[#allocation17 + $0x1448] sm:$0xff] }
 0x2e3   :  { %2606 = vmatpush.msra.mxu1 %v1726_v36  ;;  %2635 = vmatpush.msra.mxu3 %v1984_v38  ;;  %v2122_v36 = vld [vmem:[#allocation17 + $0xf68] sm:$0xff]  ;;  %v2380_v38 = vld [vmem:[#allocation17 + $0x1778] sm:$0xff] }
 0x2e4   :  { %2607 = vmatmul.f32.vlgmr.msra.gmra.mxu1 %v5228_v20  ;;  %2655 = vmatpush.msrb.mxu0 %v2080_v1  ;;  %v2020_v41 = vld [vmem:[#allocation17 + $0xc38] sm:$0xff]  ;;  %v2014_v47 = vld [vmem:[#allocation17 + $0xc08] sm:$0xff]  ;;  %v1709_v1 = vld [vmem:[#allocation17 + $0x280] sm:$0xff] }
 0x2e5   :  { %2671 = vmatpush.msrb.mxu1 %v2200_v42  ;;  %2636 = vmatpush.msra.mxu3 %v1978_v46  ;;  %v2116_v42 = vld [vmem:[#allocation17 + $0xf38] sm:$0xff]  ;;  %v2374_v46 = vld [vmem:[#allocation17 + $0x1748] sm:$0xff] }
 0x2e6   :  { %2620 = vmatpush.msra.mxu2 %v1858_v7  ;;  %2656 = vmatpush.msrb.mxu0 %v2074_v9  ;;  %v2272_v55 = vld [vmem:[#allocation17 + $0x1418] sm:$0xff]  ;;  %v2266_v59 = vld [vmem:[#allocation17 + $0x13e8] sm:$0xff]  ;;  %v1703_v9 = vld [vmem:[#allocation17 + $0x250] sm:$0xff] }
 0x2e7   :  { %2672 = vmatpush.msrb.mxu1 %v2194_v54  ;;  %2637 = vmatpush.msra.mxu3 %v1972_v56  ;;  %v2110_v54 = vld [vmem:[#allocation17 + $0xf08] sm:$0xff]  ;;  %v2368_v56 = vld [vmem:[#allocation17 + $0x1718] sm:$0xff] }
 0x2e8   :  { %2621 = vmatpush.msra.mxu2 %v1852_v13  ;;  %2657 = vmatpush.msrb.mxu0 %v2068_v51  ;;  %v2260_v62 = vld [vmem:[#allocation17 + $0x13b8] sm:$0xff]  ;;  %v2254_v7 = vld [vmem:[#allocation17 + $0x1388] sm:$0xff]  ;;  %v1697_v51 = vld [vmem:[#allocation17 + $0x220] sm:$0xff] }
 0x2e9   :  { %2673 = vmatpush.msrb.mxu1 %v2188_v58  ;;  %2638 = vmatpush.msra.mxu3 %v1966_v4  ;;  %v1817_v58 = vld [vmem:[#allocation17 + $0x5e0] sm:$0xff]  ;;  %v2362_v4 = vld [vmem:[#allocation17 + $0x16e8] sm:$0xff]  ;;  %v2248_v13 = vld [vmem:[#allocation17 + $0x1358] sm:$0xff] }
 0x2ea   :  { %2622 = vmatpush.msra.mxu2 %v1846_v12  ;;  %2658 = vmatpush.msrb.mxu0 %v2062_v16  ;;  %v2242_v12 = vld [vmem:[#allocation17 + $0x1328] sm:$0xff]  ;;  %v1691_v16 = vld [vmem:[#allocation17 + $0x1f0] sm:$0xff] }
 0x2eb   :  { %2674 = vmatpush.msrb.mxu1 %v2182_v52  ;;  %2639 = vmatpush.msra.mxu3 %v1960_v2  ;;  %v1811_v52 = vld [vmem:[#allocation17 + $0x5b0] sm:$0xff]  ;;  %v2356_v2 = vld [vmem:[#allocation17 + $0x16b8] sm:$0xff] }
 0x2ec   :  { %2623 = vmatpush.msra.mxu2 %v1840_v18  ;;  %2659 = vmatpush.msrb.mxu0 %v2056_v22  ;;  %v2236_v18 = vld [vmem:[#allocation17 + $0x12f8] sm:$0xff]  ;;  %v1685_v22 = vld [vmem:[#allocation17 + $0x1c0] sm:$0xff] }
 0x2ed   :  { %2675 = vmatpush.msrb.mxu1 %v2176_v3  ;;  %2640 = vmatpush.msra.mxu3 %v1954_v8  ;;  %v1805_v3 = vld [vmem:[#allocation17 + $0x580] sm:$0xff]  ;;  %v2350_v8 = vld [vmem:[#allocation17 + $0x1688] sm:$0xff] }
 0x2ee   :  { %2624 = vmatpush.msra.mxu2 %v1834_v10  ;;  %2660 = vmatpush.msrb.mxu0 %v2050_v21  ;;  %v2230_v10 = vld [vmem:[#allocation17 + $0x12c8] sm:$0xff]  ;;  %v1679_v21 = vld [vmem:[#allocation17 + $0x190] sm:$0xff] }
 0x2ef   :  { %2676 = vmatpush.msrb.mxu1 %v2170_v48  ;;  %2641 = vmatpush.msra.mxu3 %v1948_v44  ;;  %v1799_v48 = vld [vmem:[#allocation17 + $0x550] sm:$0xff]  ;;  %v2344_v44 = vld [vmem:[#allocation17 + $0x1658] sm:$0xff] }
 0x2f0   :  { %2625 = vmatpush.msra.mxu2 %v1828_v25  ;;  %2661 = vmatpush.msrb.mxu0 %v2044_v6  ;;  %v2224_v25 = vld [vmem:[#allocation17 + $0x1298] sm:$0xff]  ;;  %v1673_v6 = vld [vmem:[#allocation17 + $0x160] sm:$0xff] }
 0x2f1   :  { %2677 = vmatpush.msrb.mxu1 %v2164_v14  ;;  %2642 = vmatpush.msra.mxu3 %v1942_v15  ;;  %v1793_v14 = vld [vmem:[#allocation17 + $0x520] sm:$0xff]  ;;  %v2338_v15 = vld [vmem:[#allocation17 + $0x1628] sm:$0xff] }
 0x2f2   :  { %2626 = vmatpush.msra.mxu2 %v1822_v0  ;;  %2662 = vmatpush.msrb.mxu0 %v2038_v27  ;;  %v2218_v0 = vld [vmem:[#allocation17 + $0x1268] sm:$0xff]  ;;  %v1667_v27 = vld [vmem:[#allocation17 + $0x130] sm:$0xff] }
 0x2f3   :  { %2678 = vmatpush.msrb.mxu1 %v2158_v17  ;;  %2643 = vmatpush.msra.mxu3 %v1936_v19  ;;  %v1787_v17 = vld [vmem:[#allocation17 + $0x4f0] sm:$0xff]  ;;  %v2332_v19 = vld [vmem:[#allocation17 + $0x15f8] sm:$0xff] }
 0x2f4   :  { %2627 = vmatmul.f32.vlgmr.msra.gmra.mxu2 %v5246_v45  ;;  %2663 = vmatpush.msrb.mxu0 %v2032_v50  ;;  %v1661_v50 = vld [vmem:[#allocation17 + $0x100] sm:$0xff] }
 0x2f5   :  { %2679 = vmatpush.msrb.mxu1 %v2152_v23  ;;  %2644 = vmatpush.msra.mxu3 %v1930_v53  ;;  %v1781_v23 = vld [vmem:[#allocation17 + $0x4c0] sm:$0xff]  ;;  %v2326_v53 = vld [vmem:[#allocation17 + $0x15c8] sm:$0xff] }
 0x2f6   :  { %2691 = vmatpush.msrb.mxu2 %v2296_v31  ;;  %2664 = vmatpush.msrb.mxu0 %v2026_v63  ;;  %v2212_v31 = vld [vmem:[#allocation17 + $0x1238] sm:$0xff]  ;;  %v1655_v63 = vld [vmem:[#allocation17 + $0xd0] sm:$0xff] }
 0x2f7   :  { %2680 = vmatpush.msrb.mxu1 %v2146_v24  ;;  %2645 = vmatpush.msra.mxu3 %v1924_v29  ;;  %v1775_v24 = vld [vmem:[#allocation17 + $0x490] sm:$0xff]  ;;  %v2320_v29 = vld [vmem:[#allocation17 + $0x1598] sm:$0xff] }
 0x2f8   :  { %2692 = vmatpush.msrb.mxu2 %v2290_v33  ;;  %2665 = vmatpush.msrb.mxu0 %v2020_v41  ;;  %v2206_v33 = vld [vmem:[#allocation17 + $0x1208] sm:$0xff]  ;;  %v1649_v41 = vld [vmem:[#allocation17 + $0xa0] sm:$0xff] }
 0x2f9   :  { %2681 = vmatpush.msrb.mxu1 %v2140_v30  ;;  %2646 = vmatpush.msra.mxu3 %v1918_v26  ;;  %v1769_v30 = vld [vmem:[#allocation17 + $0x460] sm:$0xff]  ;;  %v2314_v26 = vld [vmem:[#allocation17 + $0x1568] sm:$0xff] }
 0x2fa   :  { %2647 = vmatmul.f32.vlgmr.msra.gmra.mxu3 %v5248_v11  ;;  %2693 = vmatpush.msrb.mxu2 %v2284_v37  ;;  %v1913_v37 = vld [vmem:[#allocation17 + $0x8e0] sm:$0xff] }
 0x2fb   :  { %2682 = vmatpush.msrb.mxu1 %v2134_v28  ;;  %2711 = vmatpush.msrb.mxu3 %v2392_v60  ;;  %v1763_v28 = vld [vmem:[#allocation17 + $0x430] sm:$0xff]  ;;  %v2308_v60 = vld [vmem:[#allocation17 + $0x1538] sm:$0xff] }
 0x2fc   :  { %2694 = vmatpush.msrb.mxu2 %v2278_v43  ;;  %2666 = vmatpush.msrb.mxu0 %v2014_v47  ;;  %v1907_v43 = vld [vmem:[#allocation17 + $0x8b0] sm:$0xff] }
 0x2fd   :  { %2683 = vmatpush.msrb.mxu1 %v2128_v32  ;;  %2712 = vmatpush.msrb.mxu3 %v2386_v34  ;;  %v1757_v32 = vld [vmem:[#allocation17 + $0x400] sm:$0xff]  ;;  %v2302_v34 = vld [vmem:[#allocation17 + $0x1508] sm:$0xff]  ;;  %v1643_v47 = vld [vmem:[#allocation17 + $0x70] sm:$0xff] }
 0x2fe   :  { %2695 = vmatpush.msrb.mxu2 %v2272_v55  ;;  %2667 = vmatmul.f32.vlgmr.msrb.gmra.mxu0 %v5234_v39  ;;  %v1901_v55 = vld [vmem:[#allocation17 + $0x880] sm:$0xff] }
 0x2ff   :  { %2684 = vmatpush.msrb.mxu1 %v2122_v36  ;;  %2713 = vmatpush.msrb.mxu3 %v2380_v38  ;;  %v1751_v36 = vld [vmem:[#allocation17 + $0x3d0] sm:$0xff]  ;;  %v2009_v38 = vld [vmem:[#allocation17 + $0xbe0] sm:$0xff] }
 0x300   :  { %2731 = vmatpush.msra.mxu0 %v1721_v57  ;;  %2696 = vmatpush.msrb.mxu2 %v2266_v59  ;;  %v1637_v57 = vld [vmem:[#allocation17 + $0x40] sm:$0xff]  ;;  %v1895_v59 = vld [vmem:[#allocation17 + $0x850] sm:$0xff] }
 0x301   :  { %2685 = vmatpush.msrb.mxu1 %v2116_v42  ;;  %2714 = vmatpush.msrb.mxu3 %v2374_v46  ;;  %v1745_v42 = vld [vmem:[#allocation17 + $0x3a0] sm:$0xff]  ;;  %v2003_v46 = vld [vmem:[#allocation17 + $0xbb0] sm:$0xff] }
 0x302   :  { %2732 = vmatpush.msra.mxu0 %v1715_v5  ;;  %2697 = vmatpush.msrb.mxu2 %v2260_v62  ;;  %v1631_v5 = vld [vmem:[#allocation17 + $0x10] sm:$0xff]  ;;  %v1889_v62 = vld [vmem:[#allocation17 + $0x820] sm:$0xff] }
 0x303   :  { %2686 = vmatpush.msrb.mxu1 %v2110_v54  ;;  %2715 = vmatpush.msrb.mxu3 %v2368_v56  ;;  %v1739_v54 = vld [vmem:[#allocation17 + $0x370] sm:$0xff]  ;;  %v1997_v56 = vld [vmem:[#allocation17 + $0xb80] sm:$0xff] }
 0x304   :  { %2687 = vmatmul.f32.vlgmr.msrb.gmra.mxu1 %v5236_v40  ;;  %2733 = vmatpush.msra.mxu0 %v1709_v1  ;;  %v2105_v1 = vld [vmem:[#allocation17 + $0xee0] sm:$0xff] }
 0x305   :  { %2751 = vmatpush.msra.mxu1 %v1817_v58  ;;  %2716 = vmatpush.msrb.mxu3 %v2362_v4  ;;  %v1733_v58 = vld [vmem:[#allocation17 + $0x340] sm:$0xff]  ;;  %v1991_v4 = vld [vmem:[#allocation17 + $0xb50] sm:$0xff] }
 0x306   :  { %2698 = vmatpush.msrb.mxu2 %v2254_v7  ;;  %2734 = vmatpush.msra.mxu0 %v1703_v9  ;;  %v1883_v7 = vld [vmem:[#allocation17 + $0x7f0] sm:$0xff] }
 0x307   :  { %2752 = vmatpush.msra.mxu1 %v1811_v52  ;;  %2717 = vmatpush.msrb.mxu3 %v2356_v2  ;;  %v1727_v52 = vld [vmem:[#allocation17 + $0x310] sm:$0xff]  ;;  %v1985_v2 = vld [vmem:[#allocation17 + $0xb20] sm:$0xff] }
 0x308   :  { %2699 = vmatpush.msrb.mxu2 %v2248_v13  ;;  %2735 = vmatpush.msra.mxu0 %v1697_v51  ;;  %v2099_v9 = vld [vmem:[#allocation17 + $0xeb0] sm:$0xff]  ;;  %v1877_v13 = vld [vmem:[#allocation17 + $0x7c0] sm:$0xff] }
 0x309   :  { %2753 = vmatpush.msra.mxu1 %v1805_v3  ;;  %2718 = vmatpush.msrb.mxu3 %v2350_v8  ;;  %v2201_v3 = vld [vmem:[#allocation17 + $0x11e0] sm:$0xff]  ;;  %v1979_v8 = vld [vmem:[#allocation17 + $0xaf0] sm:$0xff] }
 0x30a   :  { %2700 = vmatpush.msrb.mxu2 %v2242_v12  ;;  %2736 = vmatpush.msra.mxu0 %v1691_v16  ;;  %v2093_v51 = vld [vmem:[#allocation17 + $0xe80] sm:$0xff]  ;;  %v1871_v12 = vld [vmem:[#allocation17 + $0x790] sm:$0xff] }
 0x30b   :  { %2754 = vmatpush.msra.mxu1 %v1799_v48  ;;  %2719 = vmatpush.msrb.mxu3 %v2344_v44  ;;  %v2195_v48 = vld [vmem:[#allocation17 + $0x11b0] sm:$0xff]  ;;  %v1973_v44 = vld [vmem:[#allocation17 + $0xac0] sm:$0xff] }
 0x30c   :  { %2701 = vmatpush.msrb.mxu2 %v2236_v18  ;;  %2737 = vmatpush.msra.mxu0 %v1685_v22  ;;  %v2087_v16 = vld [vmem:[#allocation17 + $0xe50] sm:$0xff]  ;;  %v1865_v18 = vld [vmem:[#allocation17 + $0x760] sm:$0xff] }
 0x30d   :  { %2755 = vmatpush.msra.mxu1 %v1793_v14  ;;  %2720 = vmatpush.msrb.mxu3 %v2338_v15  ;;  %v2189_v14 = vld [vmem:[#allocation17 + $0x1180] sm:$0xff]  ;;  %v1967_v15 = vld [vmem:[#allocation17 + $0xa90] sm:$0xff] }
 0x30e   :  { %2702 = vmatpush.msrb.mxu2 %v2230_v10  ;;  %2738 = vmatpush.msra.mxu0 %v1679_v21  ;;  %v2081_v22 = vld [vmem:[#allocation17 + $0xe20] sm:$0xff]  ;;  %v1859_v10 = vld [vmem:[#allocation17 + $0x730] sm:$0xff] }
 0x30f   :  { %2756 = vmatpush.msra.mxu1 %v1787_v17  ;;  %2721 = vmatpush.msrb.mxu3 %v2332_v19  ;;  %v2183_v17 = vld [vmem:[#allocation17 + $0x1150] sm:$0xff]  ;;  %v1961_v19 = vld [vmem:[#allocation17 + $0xa60] sm:$0xff] }
 0x310   :  { %2703 = vmatpush.msrb.mxu2 %v2224_v25  ;;  %2739 = vmatpush.msra.mxu0 %v1673_v6  ;;  %v2075_v21 = vld [vmem:[#allocation17 + $0xdf0] sm:$0xff]  ;;  %v1853_v25 = vld [vmem:[#allocation17 + $0x700] sm:$0xff] }
 0x311   :  { %2757 = vmatpush.msra.mxu1 %v1781_v23  ;;  %2722 = vmatpush.msrb.mxu3 %v2326_v53  ;;  %v2177_v23 = vld [vmem:[#allocation17 + $0x1120] sm:$0xff]  ;;  %v1955_v53 = vld [vmem:[#allocation17 + $0xa30] sm:$0xff] }
 0x312   :  { %2704 = vmatpush.msrb.mxu2 %v2218_v0  ;;  %2740 = vmatpush.msra.mxu0 %v1667_v27  ;;  %v2069_v6 = vld [vmem:[#allocation17 + $0xdc0] sm:$0xff]  ;;  %v1847_v0 = vld [vmem:[#allocation17 + $0x6d0] sm:$0xff] }
 0x313   :  { %2758 = vmatpush.msra.mxu1 %v1775_v24  ;;  %2723 = vmatpush.msrb.mxu3 %v2320_v29  ;;  %v2171_v24 = vld [vmem:[#allocation17 + $0x10f0] sm:$0xff]  ;;  %v1949_v29 = vld [vmem:[#allocation17 + $0xa00] sm:$0xff] }
 0x314   :  { %2705 = vmatpush.msrb.mxu2 %v2212_v31  ;;  %2741 = vmatpush.msra.mxu0 %v1661_v50  ;;  %v2063_v27 = vld [vmem:[#allocation17 + $0xd90] sm:$0xff]  ;;  %v1841_v31 = vld [vmem:[#allocation17 + $0x6a0] sm:$0xff] }
 0x315   :  { %2759 = vmatpush.msra.mxu1 %v1769_v30  ;;  %2724 = vmatpush.msrb.mxu3 %v2314_v26  ;;  %v2165_v30 = vld [vmem:[#allocation17 + $0x10c0] sm:$0xff]  ;;  %v1943_v26 = vld [vmem:[#allocation17 + $0x9d0] sm:$0xff] }
 0x316   :  { %2706 = vmatpush.msrb.mxu2 %v2206_v33  ;;  %2742 = vmatpush.msra.mxu0 %v1655_v63  ;;  %v2057_v50 = vld [vmem:[#allocation17 + $0xd60] sm:$0xff]  ;;  %v1835_v33 = vld [vmem:[#allocation17 + $0x670] sm:$0xff] }
 0x317   :  { %2760 = vmatpush.msra.mxu1 %v1763_v28  ;;  %2725 = vmatpush.msrb.mxu3 %v2308_v60  ;;  %v2159_v28 = vld [vmem:[#allocation17 + $0x1090] sm:$0xff]  ;;  %v1937_v60 = vld [vmem:[#allocation17 + $0x9a0] sm:$0xff] }
 0x318   :  { %2707 = vmatmul.f32.vlgmr.msrb.gmra.mxu2 %v5258_v35  ;;  %2743 = vmatpush.msra.mxu0 %v1649_v41  ;;  %v2051_v63 = vld [vmem:[#allocation17 + $0xd30] sm:$0xff]  ;;  %v2045_v41 = vld [vmem:[#allocation17 + $0xd00] sm:$0xff] }
 0x319   :  { %2761 = vmatpush.msra.mxu1 %v1757_v32  ;;  %2726 = vmatpush.msrb.mxu3 %v2302_v34  ;;  %v2153_v32 = vld [vmem:[#allocation17 + $0x1060] sm:$0xff]  ;;  %v1931_v34 = vld [vmem:[#allocation17 + $0x970] sm:$0xff] }
 0x31a   :  { %2727 = vmatmul.f32.vlgmr.msrb.gmra.mxu3 %v5260_v61  ;;  %2771 = vmatpush.msra.mxu2 %v1913_v37  ;;  %v1829_v37 = vld [vmem:[#allocation17 + $0x640] sm:$0xff] }
 0x31b   :  { %2762 = vmatpush.msra.mxu1 %v1751_v36  ;;  %2791 = vmatpush.msra.mxu3 %v2009_v38  ;;  %v2147_v36 = vld [vmem:[#allocation17 + $0x1030] sm:$0xff]  ;;  %v1925_v38 = vld [vmem:[#allocation17 + $0x940] sm:$0xff] }
 0x31c   :  { %2772 = vmatpush.msra.mxu2 %v1907_v43  ;;  %2744 = vmatpush.msra.mxu0 %v1643_v47  ;;  %v1823_v43 = vld [vmem:[#allocation17 + $0x610] sm:$0xff] }
 0x31d   :  { %2763 = vmatpush.msra.mxu1 %v1745_v42  ;;  %2792 = vmatpush.msra.mxu3 %v2003_v46  ;;  %v2141_v42 = vld [vmem:[#allocation17 + $0x1000] sm:$0xff]  ;;  %v1919_v46 = vld [vmem:[#allocation17 + $0x910] sm:$0xff] }
 0x31e   :  { %2773 = vmatpush.msra.mxu2 %v1901_v55  ;;  %2745 = vmatpush.msra.mxu0 %v1637_v57  ;;  %v2039_v47 = vld [vmem:[#allocation17 + $0xcd0] sm:$0xff]  ;;  %v2297_v55 = vld [vmem:[#allocation17 + $0x14e0] sm:$0xff] }
 0x31f   :  { %2764 = vmatpush.msra.mxu1 %v1739_v54  ;;  %2793 = vmatpush.msra.mxu3 %v1997_v56  ;;  %v2135_v54 = vld [vmem:[#allocation17 + $0xfd0] sm:$0xff]  ;;  %v2393_v56 = vld [vmem:[#allocation17 + $0x17e0] sm:$0xff] }
 0x320   :  { %2774 = vmatpush.msra.mxu2 %v1895_v59  ;;  %2746 = vmatpush.msra.mxu0 %v1631_v5  ;;  %v2033_v57 = vld [vmem:[#allocation17 + $0xca0] sm:$0xff]  ;;  %v2291_v59 = vld [vmem:[#allocation17 + $0x14b0] sm:$0xff] }
 0x321   :  { %2765 = vmatpush.msra.mxu1 %v1733_v58  ;;  %2794 = vmatpush.msra.mxu3 %v1991_v4  ;;  %v2129_v58 = vld [vmem:[#allocation17 + $0xfa0] sm:$0xff]  ;;  %v2387_v4 = vld [vmem:[#allocation17 + $0x17b0] sm:$0xff] }
 0x322   :  { %2775 = vmatpush.msra.mxu2 %v1889_v62  ;;  %2747 = vmatmul.f32.vlgmr.msra.gmra.mxu0 %v5226_v49  ;;  %v2027_v5 = vld [vmem:[#allocation17 + $0xc70] sm:$0xff]  ;;  %v2285_v62 = vld [vmem:[#allocation17 + $0x1480] sm:$0xff] }
 0x323   :  { %2766 = vmatpush.msra.mxu1 %v1727_v52  ;;  %2795 = vmatpush.msra.mxu3 %v1985_v2  ;;  %v2123_v52 = vld [vmem:[#allocation17 + $0xf70] sm:$0xff]  ;;  %v2381_v2 = vld [vmem:[#allocation17 + $0x1780] sm:$0xff] }
 0x324   :  { %2767 = vmatmul.f32.vlgmr.msra.gmra.mxu1 %v5228_v20  ;;  %2811 = vmatpush.msrb.mxu0 %v2105_v1  ;;  %v2021_v1 = vld [vmem:[#allocation17 + $0xc40] sm:$0xff] }
 0x325   :  { %2831 = vmatpush.msrb.mxu1 %v2201_v3  ;;  %2776 = vmatpush.msra.mxu2 %v1883_v7  ;;  %v2117_v3 = vld [vmem:[#allocation17 + $0xf40] sm:$0xff]  ;;  %v2279_v7 = vld [vmem:[#allocation17 + $0x1450] sm:$0xff] }
 0x326   :  { %2796 = vmatpush.msra.mxu3 %v1979_v8  ;;  %2812 = vmatpush.msrb.mxu0 %v2099_v9  ;;  %v2375_v8 = vld [vmem:[#allocation17 + $0x1750] sm:$0xff] }
 0x327   :  { %2832 = vmatpush.msrb.mxu1 %v2195_v48  ;;  %2777 = vmatpush.msra.mxu2 %v1877_v13  ;;  %v2015_v9 = vld [vmem:[#allocation17 + $0xc10] sm:$0xff]  ;;  %v2273_v13 = vld [vmem:[#allocation17 + $0x1420] sm:$0xff] }
 0x328   :  { %2797 = vmatpush.msra.mxu3 %v1973_v44  ;;  %2813 = vmatpush.msrb.mxu0 %v2093_v51  ;;  %v2111_v48 = vld [vmem:[#allocation17 + $0xf10] sm:$0xff]  ;;  %v2369_v44 = vld [vmem:[#allocation17 + $0x1720] sm:$0xff]  ;;  %v1722_v51 = vld [vmem:[#allocation17 + $0x2e8] sm:$0xff] }
 0x329   :  { %2833 = vmatpush.msrb.mxu1 %v2189_v14  ;;  %2778 = vmatpush.msra.mxu2 %v1871_v12  ;;  %v1818_v14 = vld [vmem:[#allocation17 + $0x5e8] sm:$0xff]  ;;  %v2267_v12 = vld [vmem:[#allocation17 + $0x13f0] sm:$0xff] }
 0x32a   :  { %2798 = vmatpush.msra.mxu3 %v1967_v15  ;;  %2814 = vmatpush.msrb.mxu0 %v2087_v16  ;;  %v2363_v15 = vld [vmem:[#allocation17 + $0x16f0] sm:$0xff]  ;;  %v1716_v16 = vld [vmem:[#allocation17 + $0x2b8] sm:$0xff] }
 0x32b   :  { %2834 = vmatpush.msrb.mxu1 %v2183_v17  ;;  %2779 = vmatpush.msra.mxu2 %v1865_v18  ;;  %v1812_v17 = vld [vmem:[#allocation17 + $0x5b8] sm:$0xff]  ;;  %v2261_v18 = vld [vmem:[#allocation17 + $0x13c0] sm:$0xff] }
 0x32c   :  { %2799 = vmatpush.msra.mxu3 %v1961_v19  ;;  %2815 = vmatpush.msrb.mxu0 %v2081_v22  ;;  %v2357_v19 = vld [vmem:[#allocation17 + $0x16c0] sm:$0xff]  ;;  %v1710_v22 = vld [vmem:[#allocation17 + $0x288] sm:$0xff] }
 0x32d   :  { %2835 = vmatpush.msrb.mxu1 %v2177_v23  ;;  %2780 = vmatpush.msra.mxu2 %v1859_v10  ;;  %v1806_v23 = vld [vmem:[#allocation17 + $0x588] sm:$0xff]  ;;  %v2255_v10 = vld [vmem:[#allocation17 + $0x1390] sm:$0xff] }
 0x32e   :  { %2800 = vmatpush.msra.mxu3 %v1955_v53  ;;  %2816 = vmatpush.msrb.mxu0 %v2075_v21  ;;  %v2351_v53 = vld [vmem:[#allocation17 + $0x1690] sm:$0xff]  ;;  %v1704_v21 = vld [vmem:[#allocation17 + $0x258] sm:$0xff] }
 0x32f   :  { %2836 = vmatpush.msrb.mxu1 %v2171_v24  ;;  %2781 = vmatpush.msra.mxu2 %v1853_v25  ;;  %v1800_v24 = vld [vmem:[#allocation17 + $0x558] sm:$0xff]  ;;  %v2249_v25 = vld [vmem:[#allocation17 + $0x1360] sm:$0xff] }
 0x330   :  { %2801 = vmatpush.msra.mxu3 %v1949_v29  ;;  %2817 = vmatpush.msrb.mxu0 %v2069_v6  ;;  %v2345_v29 = vld [vmem:[#allocation17 + $0x1660] sm:$0xff]  ;;  %v1698_v6 = vld [vmem:[#allocation17 + $0x228] sm:$0xff] }
 0x331   :  { %2837 = vmatpush.msrb.mxu1 %v2165_v30  ;;  %2782 = vmatpush.msra.mxu2 %v1847_v0  ;;  %v1794_v30 = vld [vmem:[#allocation17 + $0x528] sm:$0xff]  ;;  %v2243_v0 = vld [vmem:[#allocation17 + $0x1330] sm:$0xff] }
 0x332   :  { %2802 = vmatpush.msra.mxu3 %v1943_v26  ;;  %2818 = vmatpush.msrb.mxu0 %v2063_v27  ;;  %v2339_v26 = vld [vmem:[#allocation17 + $0x1630] sm:$0xff]  ;;  %v1692_v27 = vld [vmem:[#allocation17 + $0x1f8] sm:$0xff] }
 0x333   :  { %2838 = vmatpush.msrb.mxu1 %v2159_v28  ;;  %2783 = vmatpush.msra.mxu2 %v1841_v31  ;;  %v1788_v28 = vld [vmem:[#allocation17 + $0x4f8] sm:$0xff]  ;;  %v2237_v31 = vld [vmem:[#allocation17 + $0x1300] sm:$0xff] }
 0x334   :  { %2803 = vmatpush.msra.mxu3 %v1937_v60  ;;  %2819 = vmatpush.msrb.mxu0 %v2057_v50  ;;  %v2333_v60 = vld [vmem:[#allocation17 + $0x1600] sm:$0xff]  ;;  %v1686_v50 = vld [vmem:[#allocation17 + $0x1c8] sm:$0xff] }
 0x335   :  { %2839 = vmatpush.msrb.mxu1 %v2153_v32  ;;  %2784 = vmatpush.msra.mxu2 %v1835_v33  ;;  %v1782_v32 = vld [vmem:[#allocation17 + $0x4c8] sm:$0xff]  ;;  %v2231_v33 = vld [vmem:[#allocation17 + $0x12d0] sm:$0xff] }
 0x336   :  { %2804 = vmatpush.msra.mxu3 %v1931_v34  ;;  %2820 = vmatpush.msrb.mxu0 %v2051_v63  ;;  %v2327_v34 = vld [vmem:[#allocation17 + $0x15d0] sm:$0xff]  ;;  %v1680_v63 = vld [vmem:[#allocation17 + $0x198] sm:$0xff] }
 0x337   :  { %2840 = vmatpush.msrb.mxu1 %v2147_v36  ;;  %2785 = vmatpush.msra.mxu2 %v1829_v37  ;;  %v1776_v36 = vld [vmem:[#allocation17 + $0x498] sm:$0xff]  ;;  %v2225_v37 = vld [vmem:[#allocation17 + $0x12a0] sm:$0xff] }
 0x338   :  { %2805 = vmatpush.msra.mxu3 %v1925_v38  ;;  %2821 = vmatpush.msrb.mxu0 %v2045_v41  ;;  %v2321_v38 = vld [vmem:[#allocation17 + $0x15a0] sm:$0xff]  ;;  %v1674_v41 = vld [vmem:[#allocation17 + $0x168] sm:$0xff] }
 0x339   :  { %2841 = vmatpush.msrb.mxu1 %v2141_v42  ;;  %2786 = vmatpush.msra.mxu2 %v1823_v43  ;;  %v1770_v42 = vld [vmem:[#allocation17 + $0x468] sm:$0xff]  ;;  %v2219_v43 = vld [vmem:[#allocation17 + $0x1270] sm:$0xff] }
 0x33a   :  { %2806 = vmatpush.msra.mxu3 %v1919_v46  ;;  %2787 = vmatmul.f32.vlgmr.msra.gmra.mxu2 %v5246_v45  ;;  %v2315_v46 = vld [vmem:[#allocation17 + $0x1570] sm:$0xff] }
 0x33b   :  { %2807 = vmatmul.f32.vlgmr.msra.gmra.mxu3 %v5248_v11  ;;  %2822 = vmatpush.msrb.mxu0 %v2039_v47  ;;  %v1668_v47 = vld [vmem:[#allocation17 + $0x138] sm:$0xff] }
 0x33c   :  { %2842 = vmatpush.msrb.mxu1 %v2135_v54  ;;  %2851 = vmatpush.msrb.mxu2 %v2297_v55  ;;  %v1764_v54 = vld [vmem:[#allocation17 + $0x438] sm:$0xff]  ;;  %v2213_v55 = vld [vmem:[#allocation17 + $0x1240] sm:$0xff] }
 0x33d   :  { %2871 = vmatpush.msrb.mxu3 %v2393_v56  ;;  %2823 = vmatpush.msrb.mxu0 %v2033_v57  ;;  %v2309_v56 = vld [vmem:[#allocation17 + $0x1540] sm:$0xff]  ;;  %v1662_v57 = vld [vmem:[#allocation17 + $0x108] sm:$0xff] }
 0x33e   :  { %2843 = vmatpush.msrb.mxu1 %v2129_v58  ;;  %2852 = vmatpush.msrb.mxu2 %v2291_v59  ;;  %v1758_v58 = vld [vmem:[#allocation17 + $0x408] sm:$0xff]  ;;  %v2207_v59 = vld [vmem:[#allocation17 + $0x1210] sm:$0xff] }
 0x33f   :  { %2872 = vmatpush.msrb.mxu3 %v2387_v4  ;;  %2824 = vmatpush.msrb.mxu0 %v2027_v5  ;;  %v2303_v4 = vld [vmem:[#allocation17 + $0x1510] sm:$0xff]  ;;  %v1656_v5 = vld [vmem:[#allocation17 + $0xd8] sm:$0xff] }
 0x340   :  { %2844 = vmatpush.msrb.mxu1 %v2123_v52  ;;  %2853 = vmatpush.msrb.mxu2 %v2285_v62  ;;  %v1752_v52 = vld [vmem:[#allocation17 + $0x3d8] sm:$0xff]  ;;  %v1914_v62 = vld [vmem:[#allocation17 + $0x8e8] sm:$0xff] }
 0x341   :  { %2873 = vmatpush.msrb.mxu3 %v2381_v2  ;;  %2825 = vmatpush.msrb.mxu0 %v2021_v1  ;;  %v2010_v2 = vld [vmem:[#allocation17 + $0xbe8] sm:$0xff] }
 0x342   :  { %2845 = vmatpush.msrb.mxu1 %v2117_v3  ;;  %2854 = vmatpush.msrb.mxu2 %v2279_v7  ;;  %v1650_v1 = vld [vmem:[#allocation17 + $0xa8] sm:$0xff]  ;;  %v1908_v7 = vld [vmem:[#allocation17 + $0x8b8] sm:$0xff] }
 0x343   :  { %2874 = vmatpush.msrb.mxu3 %v2375_v8  ;;  %2826 = vmatpush.msrb.mxu0 %v2015_v9  ;;  %v1746_v3 = vld [vmem:[#allocation17 + $0x3a8] sm:$0xff]  ;;  %v2004_v8 = vld [vmem:[#allocation17 + $0xbb8] sm:$0xff] }
 0x344   :  { %2846 = vmatpush.msrb.mxu1 %v2111_v48  ;;  %2855 = vmatpush.msrb.mxu2 %v2273_v13  ;;  %v1644_v9 = vld [vmem:[#allocation17 + $0x78] sm:$0xff]  ;;  %v1902_v13 = vld [vmem:[#allocation17 + $0x888] sm:$0xff] }
 0x345   :  { %2875 = vmatpush.msrb.mxu3 %v2369_v44  ;;  %2827 = vmatmul.f32.vlgmr.msrb.gmra.mxu0 %v5234_v39  ;;  %v1740_v48 = vld [vmem:[#allocation17 + $0x378] sm:$0xff]  ;;  %v1998_v44 = vld [vmem:[#allocation17 + $0xb88] sm:$0xff] }
 0x346   :  { %2847 = vmatmul.f32.vlgmr.msrb.gmra.mxu1 %v5236_v40  ;;  %2891 = vmatpush.msra.mxu0 %v1722_v51  ;;  %v1638_v51 = vld [vmem:[#allocation17 + $0x48] sm:$0xff] }
 0x347   :  { %2911 = vmatpush.msra.mxu1 %v1818_v14  ;;  %2856 = vmatpush.msrb.mxu2 %v2267_v12  ;;  %v1734_v14 = vld [vmem:[#allocation17 + $0x348] sm:$0xff]  ;;  %v1896_v12 = vld [vmem:[#allocation17 + $0x858] sm:$0xff] }
 0x348   :  { %2876 = vmatpush.msrb.mxu3 %v2363_v15  ;;  %2892 = vmatpush.msra.mxu0 %v1716_v16  ;;  %v1992_v15 = vld [vmem:[#allocation17 + $0xb58] sm:$0xff] }
 0x349   :  { %2912 = vmatpush.msra.mxu1 %v1812_v17  ;;  %2857 = vmatpush.msrb.mxu2 %v2261_v18  ;;  %v1632_v16 = vld [vmem:[#allocation17 + $0x18] sm:$0xff]  ;;  %v1890_v18 = vld [vmem:[#allocation17 + $0x828] sm:$0xff] }
 0x34a   :  { %2877 = vmatpush.msrb.mxu3 %v2357_v19  ;;  %2893 = vmatpush.msra.mxu0 %v1710_v22  ;;  %v1728_v17 = vld [vmem:[#allocation17 + $0x318] sm:$0xff]  ;;  %v1986_v19 = vld [vmem:[#allocation17 + $0xb28] sm:$0xff] }
 0x34b   :  { %2913 = vmatpush.msra.mxu1 %v1806_v23  ;;  %2858 = vmatpush.msrb.mxu2 %v2255_v10  ;;  %v2106_v22 = vld [vmem:[#allocation17 + $0xee8] sm:$0xff]  ;;  %v1884_v10 = vld [vmem:[#allocation17 + $0x7f8] sm:$0xff] }
 0x34c   :  { %2878 = vmatpush.msrb.mxu3 %v2351_v53  ;;  %2894 = vmatpush.msra.mxu0 %v1704_v21  ;;  %v2202_v23 = vld [vmem:[#allocation17 + $0x11e8] sm:$0xff]  ;;  %v1980_v53 = vld [vmem:[#allocation17 + $0xaf8] sm:$0xff] }
 0x34d   :  { %2914 = vmatpush.msra.mxu1 %v1800_v24  ;;  %2859 = vmatpush.msrb.mxu2 %v2249_v25  ;;  %v2100_v21 = vld [vmem:[#allocation17 + $0xeb8] sm:$0xff]  ;;  %v1878_v25 = vld [vmem:[#allocation17 + $0x7c8] sm:$0xff] }
 0x34e   :  { %2879 = vmatpush.msrb.mxu3 %v2345_v29  ;;  %2895 = vmatpush.msra.mxu0 %v1698_v6  ;;  %v2196_v24 = vld [vmem:[#allocation17 + $0x11b8] sm:$0xff]  ;;  %v1974_v29 = vld [vmem:[#allocation17 + $0xac8] sm:$0xff] }
 0x34f   :  { %2915 = vmatpush.msra.mxu1 %v1794_v30  ;;  %2860 = vmatpush.msrb.mxu2 %v2243_v0  ;;  %v2094_v6 = vld [vmem:[#allocation17 + $0xe88] sm:$0xff]  ;;  %v1872_v0 = vld [vmem:[#allocation17 + $0x798] sm:$0xff] }
 0x350   :  { %2880 = vmatpush.msrb.mxu3 %v2339_v26  ;;  %2896 = vmatpush.msra.mxu0 %v1692_v27  ;;  %v2190_v30 = vld [vmem:[#allocation17 + $0x1188] sm:$0xff]  ;;  %v1968_v26 = vld [vmem:[#allocation17 + $0xa98] sm:$0xff] }
 0x351   :  { %2916 = vmatpush.msra.mxu1 %v1788_v28  ;;  %2861 = vmatpush.msrb.mxu2 %v2237_v31  ;;  %v2088_v27 = vld [vmem:[#allocation17 + $0xe58] sm:$0xff]  ;;  %v1866_v31 = vld [vmem:[#allocation17 + $0x768] sm:$0xff] }
 0x352   :  { %2881 = vmatpush.msrb.mxu3 %v2333_v60  ;;  %2897 = vmatpush.msra.mxu0 %v1686_v50  ;;  %v2184_v28 = vld [vmem:[#allocation17 + $0x1158] sm:$0xff]  ;;  %v1962_v60 = vld [vmem:[#allocation17 + $0xa68] sm:$0xff] }
 0x353   :  { %2917 = vmatpush.msra.mxu1 %v1782_v32  ;;  %2862 = vmatpush.msrb.mxu2 %v2231_v33  ;;  %v2082_v50 = vld [vmem:[#allocation17 + $0xe28] sm:$0xff]  ;;  %v1860_v33 = vld [vmem:[#allocation17 + $0x738] sm:$0xff] }
 0x354   :  { %2882 = vmatpush.msrb.mxu3 %v2327_v34  ;;  %2898 = vmatpush.msra.mxu0 %v1680_v63  ;;  %v2178_v32 = vld [vmem:[#allocation17 + $0x1128] sm:$0xff]  ;;  %v1956_v34 = vld [vmem:[#allocation17 + $0xa38] sm:$0xff] }
 0x355   :  { %2918 = vmatpush.msra.mxu1 %v1776_v36  ;;  %2863 = vmatpush.msrb.mxu2 %v2225_v37  ;;  %v2076_v63 = vld [vmem:[#allocation17 + $0xdf8] sm:$0xff]  ;;  %v1854_v37 = vld [vmem:[#allocation17 + $0x708] sm:$0xff] }
 0x356   :  { %2883 = vmatpush.msrb.mxu3 %v2321_v38  ;;  %2899 = vmatpush.msra.mxu0 %v1674_v41  ;;  %v2172_v36 = vld [vmem:[#allocation17 + $0x10f8] sm:$0xff]  ;;  %v1950_v38 = vld [vmem:[#allocation17 + $0xa08] sm:$0xff] }
 0x357   :  { %2919 = vmatpush.msra.mxu1 %v1770_v42  ;;  %2864 = vmatpush.msrb.mxu2 %v2219_v43  ;;  %v2070_v41 = vld [vmem:[#allocation17 + $0xdc8] sm:$0xff]  ;;  %v1848_v43 = vld [vmem:[#allocation17 + $0x6d8] sm:$0xff] }
 0x358   :  { %2884 = vmatpush.msrb.mxu3 %v2315_v46  ;;  %2900 = vmatpush.msra.mxu0 %v1668_v47  ;;  %v2166_v42 = vld [vmem:[#allocation17 + $0x10c8] sm:$0xff]  ;;  %v1944_v46 = vld [vmem:[#allocation17 + $0x9d8] sm:$0xff] }
 0x359   :  { %2920 = vmatpush.msra.mxu1 %v1764_v54  ;;  %2865 = vmatpush.msrb.mxu2 %v2213_v55  ;;  %v2064_v47 = vld [vmem:[#allocation17 + $0xd98] sm:$0xff]  ;;  %v1842_v55 = vld [vmem:[#allocation17 + $0x6a8] sm:$0xff] }
 0x35a   :  { %2885 = vmatpush.msrb.mxu3 %v2309_v56  ;;  %2901 = vmatpush.msra.mxu0 %v1662_v57  ;;  %v2160_v54 = vld [vmem:[#allocation17 + $0x1098] sm:$0xff]  ;;  %v1938_v56 = vld [vmem:[#allocation17 + $0x9a8] sm:$0xff] }
 0x35b   :  { %2921 = vmatpush.msra.mxu1 %v1758_v58  ;;  %2866 = vmatpush.msrb.mxu2 %v2207_v59  ;;  %v2058_v57 = vld [vmem:[#allocation17 + $0xd68] sm:$0xff]  ;;  %v1836_v59 = vld [vmem:[#allocation17 + $0x678] sm:$0xff] }
 0x35c   :  { %2886 = vmatpush.msrb.mxu3 %v2303_v4  ;;  %2867 = vmatmul.f32.vlgmr.msrb.gmra.mxu2 %v5258_v35  ;;  %v2154_v58 = vld [vmem:[#allocation17 + $0x1068] sm:$0xff]  ;;  %v1932_v4 = vld [vmem:[#allocation17 + $0x978] sm:$0xff] }
 0x35d   :  { %2887 = vmatmul.f32.vlgmr.msrb.gmra.mxu3 %v5260_v61  ;;  %2902 = vmatpush.msra.mxu0 %v1656_v5  ;;  %v2052_v5 = vld [vmem:[#allocation17 + $0xd38] sm:$0xff] }
 0x35e   :  { %2922 = vmatpush.msra.mxu1 %v1752_v52  ;;  %2931 = vmatpush.msra.mxu2 %v1914_v62  ;;  %v2148_v52 = vld [vmem:[#allocation17 + $0x1038] sm:$0xff]  ;;  %v1830_v62 = vld [vmem:[#allocation17 + $0x648] sm:$0xff] }
 0x35f   :  { %2951 = vmatpush.msra.mxu3 %v2010_v2  ;;  %2903 = vmatpush.msra.mxu0 %v1650_v1  ;;  %v1926_v2 = vld [vmem:[#allocation17 + $0x948] sm:$0xff] }
 0x360   :  { %2923 = vmatpush.msra.mxu1 %v1746_v3  ;;  %2932 = vmatpush.msra.mxu2 %v1908_v7  ;;  %v2046_v1 = vld [vmem:[#allocation17 + $0xd08] sm:$0xff]  ;;  %v1824_v7 = vld [vmem:[#allocation17 + $0x618] sm:$0xff] }
 0x361   :  { %2952 = vmatpush.msra.mxu3 %v2004_v8  ;;  %2904 = vmatpush.msra.mxu0 %v1644_v9  ;;  %v2142_v3 = vld [vmem:[#allocation17 + $0x1008] sm:$0xff]  ;;  %v1920_v8 = vld [vmem:[#allocation17 + $0x918] sm:$0xff] }
 0x362   :  { %2924 = vmatpush.msra.mxu1 %v1740_v48  ;;  %2933 = vmatpush.msra.mxu2 %v1902_v13  ;;  %v2040_v9 = vld [vmem:[#allocation17 + $0xcd8] sm:$0xff]  ;;  %v2298_v13 = vld [vmem:[#allocation17 + $0x14e8] sm:$0xff] }
 0x363   :  { %2953 = vmatpush.msra.mxu3 %v1998_v44  ;;  %2905 = vmatpush.msra.mxu0 %v1638_v51  ;;  %v2136_v48 = vld [vmem:[#allocation17 + $0xfd8] sm:$0xff]  ;;  %v2394_v44 = vld [vmem:[#allocation17 + $0x17e8] sm:$0xff] }
 0x364   :  { %2925 = vmatpush.msra.mxu1 %v1734_v14  ;;  %2934 = vmatpush.msra.mxu2 %v1896_v12  ;;  %v2034_v51 = vld [vmem:[#allocation17 + $0xca8] sm:$0xff]  ;;  %v2292_v12 = vld [vmem:[#allocation17 + $0x14b8] sm:$0xff] }
 0x365   :  { %2954 = vmatpush.msra.mxu3 %v1992_v15  ;;  %2906 = vmatpush.msra.mxu0 %v1632_v16  ;;  %v2130_v14 = vld [vmem:[#allocation17 + $0xfa8] sm:$0xff]  ;;  %v2388_v15 = vld [vmem:[#allocation17 + $0x17b8] sm:$0xff] }
 0x366   :  { %2926 = vmatpush.msra.mxu1 %v1728_v17  ;;  %2935 = vmatpush.msra.mxu2 %v1890_v18  ;;  %v2028_v16 = vld [vmem:[#allocation17 + $0xc78] sm:$0xff]  ;;  %v2286_v18 = vld [vmem:[#allocation17 + $0x1488] sm:$0xff] }
 0x367   :  { %2955 = vmatpush.msra.mxu3 %v1986_v19  ;;  %2907 = vmatmul.f32.vlgmr.msra.gmra.mxu0 %v5226_v49  ;;  %v2124_v17 = vld [vmem:[#allocation17 + $0xf78] sm:$0xff]  ;;  %v2382_v19 = vld [vmem:[#allocation17 + $0x1788] sm:$0xff] }
 0x368   :  { %2927 = vmatmul.f32.vlgmr.msra.gmra.mxu1 %v5228_v20  ;;  %2971 = vmatpush.msrb.mxu0 %v2106_v22  ;;  %v2022_v22 = vld [vmem:[#allocation17 + $0xc48] sm:$0xff] }
 0x369   :  { %2991 = vmatpush.msrb.mxu1 %v2202_v23  ;;  %2936 = vmatpush.msra.mxu2 %v1884_v10  ;;  %v2118_v23 = vld [vmem:[#allocation17 + $0xf48] sm:$0xff]  ;;  %v2280_v10 = vld [vmem:[#allocation17 + $0x1458] sm:$0xff] }
 0x36a   :  { %2956 = vmatpush.msra.mxu3 %v1980_v53  ;;  %2972 = vmatpush.msrb.mxu0 %v2100_v21  ;;  %v2376_v53 = vld [vmem:[#allocation17 + $0x1758] sm:$0xff] }
 0x36b   :  { %2992 = vmatpush.msrb.mxu1 %v2196_v24  ;;  %2937 = vmatpush.msra.mxu2 %v1878_v25  ;;  %v2016_v21 = vld [vmem:[#allocation17 + $0xc18] sm:$0xff]  ;;  %v2274_v25 = vld [vmem:[#allocation17 + $0x1428] sm:$0xff] }
 0x36c   :  { %2957 = vmatpush.msra.mxu3 %v1974_v29  ;;  %2973 = vmatpush.msrb.mxu0 %v2094_v6  ;;  %v2112_v24 = vld [vmem:[#allocation17 + $0xf18] sm:$0xff]  ;;  %v2370_v29 = vld [vmem:[#allocation17 + $0x1728] sm:$0xff]  ;;  %v1723_v6 = vld [vmem:[#allocation17 + $0x2f0] sm:$0xff] }
 0x36d   :  { %2993 = vmatpush.msrb.mxu1 %v2190_v30  ;;  %2938 = vmatpush.msra.mxu2 %v1872_v0  ;;  %v1819_v30 = vld [vmem:[#allocation17 + $0x5f0] sm:$0xff]  ;;  %v2268_v0 = vld [vmem:[#allocation17 + $0x13f8] sm:$0xff] }
 0x36e   :  { %2958 = vmatpush.msra.mxu3 %v1968_v26  ;;  %2974 = vmatpush.msrb.mxu0 %v2088_v27  ;;  %v2364_v26 = vld [vmem:[#allocation17 + $0x16f8] sm:$0xff]  ;;  %v1717_v27 = vld [vmem:[#allocation17 + $0x2c0] sm:$0xff] }
 0x36f   :  { %2994 = vmatpush.msrb.mxu1 %v2184_v28  ;;  %2939 = vmatpush.msra.mxu2 %v1866_v31  ;;  %v1813_v28 = vld [vmem:[#allocation17 + $0x5c0] sm:$0xff]  ;;  %v2262_v31 = vld [vmem:[#allocation17 + $0x13c8] sm:$0xff] }
 0x370   :  { %2959 = vmatpush.msra.mxu3 %v1962_v60  ;;  %2975 = vmatpush.msrb.mxu0 %v2082_v50  ;;  %v2358_v60 = vld [vmem:[#allocation17 + $0x16c8] sm:$0xff]  ;;  %v1711_v50 = vld [vmem:[#allocation17 + $0x290] sm:$0xff] }
 0x371   :  { %2995 = vmatpush.msrb.mxu1 %v2178_v32  ;;  %2940 = vmatpush.msra.mxu2 %v1860_v33  ;;  %v1807_v32 = vld [vmem:[#allocation17 + $0x590] sm:$0xff]  ;;  %v2256_v33 = vld [vmem:[#allocation17 + $0x1398] sm:$0xff] }
 0x372   :  { %2960 = vmatpush.msra.mxu3 %v1956_v34  ;;  %2976 = vmatpush.msrb.mxu0 %v2076_v63  ;;  %v2352_v34 = vld [vmem:[#allocation17 + $0x1698] sm:$0xff]  ;;  %v1705_v63 = vld [vmem:[#allocation17 + $0x260] sm:$0xff] }
 0x373   :  { %2996 = vmatpush.msrb.mxu1 %v2172_v36  ;;  %2941 = vmatpush.msra.mxu2 %v1854_v37  ;;  %v1801_v36 = vld [vmem:[#allocation17 + $0x560] sm:$0xff]  ;;  %v2250_v37 = vld [vmem:[#allocation17 + $0x1368] sm:$0xff] }
 0x374   :  { %2961 = vmatpush.msra.mxu3 %v1950_v38  ;;  %2977 = vmatpush.msrb.mxu0 %v2070_v41  ;;  %v2346_v38 = vld [vmem:[#allocation17 + $0x1668] sm:$0xff]  ;;  %v1699_v41 = vld [vmem:[#allocation17 + $0x230] sm:$0xff] }
 0x375   :  { %2997 = vmatpush.msrb.mxu1 %v2166_v42  ;;  %2942 = vmatpush.msra.mxu2 %v1848_v43  ;;  %v1795_v42 = vld [vmem:[#allocation17 + $0x530] sm:$0xff]  ;;  %v2244_v43 = vld [vmem:[#allocation17 + $0x1338] sm:$0xff] }
 0x376   :  { %2962 = vmatpush.msra.mxu3 %v1944_v46  ;;  %2978 = vmatpush.msrb.mxu0 %v2064_v47  ;;  %v2340_v46 = vld [vmem:[#allocation17 + $0x1638] sm:$0xff]  ;;  %v1693_v47 = vld [vmem:[#allocation17 + $0x200] sm:$0xff] }
 0x377   :  { %2998 = vmatpush.msrb.mxu1 %v2160_v54  ;;  %2943 = vmatpush.msra.mxu2 %v1842_v55  ;;  %v1789_v54 = vld [vmem:[#allocation17 + $0x500] sm:$0xff]  ;;  %v2238_v55 = vld [vmem:[#allocation17 + $0x1308] sm:$0xff] }
 0x378   :  { %2963 = vmatpush.msra.mxu3 %v1938_v56  ;;  %2979 = vmatpush.msrb.mxu0 %v2058_v57  ;;  %v2334_v56 = vld [vmem:[#allocation17 + $0x1608] sm:$0xff]  ;;  %v1687_v57 = vld [vmem:[#allocation17 + $0x1d0] sm:$0xff] }
 0x379   :  { %2999 = vmatpush.msrb.mxu1 %v2154_v58  ;;  %2944 = vmatpush.msra.mxu2 %v1836_v59  ;;  %v1783_v58 = vld [vmem:[#allocation17 + $0x4d0] sm:$0xff]  ;;  %v2232_v59 = vld [vmem:[#allocation17 + $0x12d8] sm:$0xff] }
 0x37a   :  { %2964 = vmatpush.msra.mxu3 %v1932_v4  ;;  %2980 = vmatpush.msrb.mxu0 %v2052_v5  ;;  %v2328_v4 = vld [vmem:[#allocation17 + $0x15d8] sm:$0xff]  ;;  %v1681_v5 = vld [vmem:[#allocation17 + $0x1a0] sm:$0xff] }
 0x37b   :  { %3000 = vmatpush.msrb.mxu1 %v2148_v52  ;;  %2945 = vmatpush.msra.mxu2 %v1830_v62  ;;  %v1777_v52 = vld [vmem:[#allocation17 + $0x4a0] sm:$0xff]  ;;  %v2226_v62 = vld [vmem:[#allocation17 + $0x12a8] sm:$0xff] }
 0x37c   :  { %2965 = vmatpush.msra.mxu3 %v1926_v2  ;;  %2981 = vmatpush.msrb.mxu0 %v2046_v1  ;;  %v2322_v2 = vld [vmem:[#allocation17 + $0x15a8] sm:$0xff]  ;;  %v1675_v1 = vld [vmem:[#allocation17 + $0x170] sm:$0xff] }
 0x37d   :  { %3001 = vmatpush.msrb.mxu1 %v2142_v3  ;;  %2946 = vmatpush.msra.mxu2 %v1824_v7  ;;  %v1771_v3 = vld [vmem:[#allocation17 + $0x470] sm:$0xff]  ;;  %v2220_v7 = vld [vmem:[#allocation17 + $0x1278] sm:$0xff] }
 0x37e   :  { %2966 = vmatpush.msra.mxu3 %v1920_v8  ;;  %2947 = vmatmul.f32.vlgmr.msra.gmra.mxu2 %v5246_v45  ;;  %v2316_v8 = vld [vmem:[#allocation17 + $0x1578] sm:$0xff] }
 0x37f   :  { %2967 = vmatmul.f32.vlgmr.msra.gmra.mxu3 %v5248_v11  ;;  %2982 = vmatpush.msrb.mxu0 %v2040_v9  ;;  %v1669_v9 = vld [vmem:[#allocation17 + $0x140] sm:$0xff] }
 0x380   :  { %3002 = vmatpush.msrb.mxu1 %v2136_v48  ;;  %3011 = vmatpush.msrb.mxu2 %v2298_v13  ;;  %v1765_v48 = vld [vmem:[#allocation17 + $0x440] sm:$0xff]  ;;  %v2214_v13 = vld [vmem:[#allocation17 + $0x1248] sm:$0xff] }
 0x381   :  { %3031 = vmatpush.msrb.mxu3 %v2394_v44  ;;  %2983 = vmatpush.msrb.mxu0 %v2034_v51  ;;  %v2310_v44 = vld [vmem:[#allocation17 + $0x1548] sm:$0xff]  ;;  %v1663_v51 = vld [vmem:[#allocation17 + $0x110] sm:$0xff] }
 0x382   :  { %3003 = vmatpush.msrb.mxu1 %v2130_v14  ;;  %3012 = vmatpush.msrb.mxu2 %v2292_v12  ;;  %v1759_v14 = vld [vmem:[#allocation17 + $0x410] sm:$0xff]  ;;  %v2208_v12 = vld [vmem:[#allocation17 + $0x1218] sm:$0xff] }
 0x383   :  { %3032 = vmatpush.msrb.mxu3 %v2388_v15  ;;  %2984 = vmatpush.msrb.mxu0 %v2028_v16  ;;  %v2304_v15 = vld [vmem:[#allocation17 + $0x1518] sm:$0xff]  ;;  %v1657_v16 = vld [vmem:[#allocation17 + $0xe0] sm:$0xff] }
 0x384   :  { %3004 = vmatpush.msrb.mxu1 %v2124_v17  ;;  %3013 = vmatpush.msrb.mxu2 %v2286_v18  ;;  %v1753_v17 = vld [vmem:[#allocation17 + $0x3e0] sm:$0xff]  ;;  %v1915_v18 = vld [vmem:[#allocation17 + $0x8f0] sm:$0xff] }
 0x385   :  { %3033 = vmatpush.msrb.mxu3 %v2382_v19  ;;  %2985 = vmatpush.msrb.mxu0 %v2022_v22  ;;  %v2011_v19 = vld [vmem:[#allocation17 + $0xbf0] sm:$0xff] }
 0x386   :  { %3005 = vmatpush.msrb.mxu1 %v2118_v23  ;;  %3014 = vmatpush.msrb.mxu2 %v2280_v10  ;;  %v1651_v22 = vld [vmem:[#allocation17 + $0xb0] sm:$0xff]  ;;  %v1909_v10 = vld [vmem:[#allocation17 + $0x8c0] sm:$0xff] }
 0x387   :  { %3034 = vmatpush.msrb.mxu3 %v2376_v53  ;;  %2986 = vmatpush.msrb.mxu0 %v2016_v21  ;;  %v1747_v23 = vld [vmem:[#allocation17 + $0x3b0] sm:$0xff]  ;;  %v2005_v53 = vld [vmem:[#allocation17 + $0xbc0] sm:$0xff] }
 0x388   :  { %3006 = vmatpush.msrb.mxu1 %v2112_v24  ;;  %3015 = vmatpush.msrb.mxu2 %v2274_v25  ;;  %v1645_v21 = vld [vmem:[#allocation17 + $0x80] sm:$0xff]  ;;  %v1903_v25 = vld [vmem:[#allocation17 + $0x890] sm:$0xff] }
 0x389   :  { %3035 = vmatpush.msrb.mxu3 %v2370_v29  ;;  %2987 = vmatmul.f32.vlgmr.msrb.gmra.mxu0 %v5234_v39  ;;  %v1741_v24 = vld [vmem:[#allocation17 + $0x380] sm:$0xff]  ;;  %v1999_v29 = vld [vmem:[#allocation17 + $0xb90] sm:$0xff] }
 0x38a   :  { %3007 = vmatmul.f32.vlgmr.msrb.gmra.mxu1 %v5236_v40  ;;  %3051 = vmatpush.msra.mxu0 %v1723_v6  ;;  %v1639_v6 = vld [vmem:[#allocation17 + $0x50] sm:$0xff] }
 0x38b   :  { %3071 = vmatpush.msra.mxu1 %v1819_v30  ;;  %3016 = vmatpush.msrb.mxu2 %v2268_v0  ;;  %v1735_v30 = vld [vmem:[#allocation17 + $0x350] sm:$0xff]  ;;  %v1897_v0 = vld [vmem:[#allocation17 + $0x860] sm:$0xff] }
 0x38c   :  { %3036 = vmatpush.msrb.mxu3 %v2364_v26  ;;  %3052 = vmatpush.msra.mxu0 %v1717_v27  ;;  %v1993_v26 = vld [vmem:[#allocation17 + $0xb60] sm:$0xff] }
 0x38d   :  { %3072 = vmatpush.msra.mxu1 %v1813_v28  ;;  %3017 = vmatpush.msrb.mxu2 %v2262_v31  ;;  %v1633_v27 = vld [vmem:[#allocation17 + $0x20] sm:$0xff]  ;;  %v1891_v31 = vld [vmem:[#allocation17 + $0x830] sm:$0xff] }
 0x38e   :  { %3037 = vmatpush.msrb.mxu3 %v2358_v60  ;;  %3053 = vmatpush.msra.mxu0 %v1711_v50  ;;  %v1729_v28 = vld [vmem:[#allocation17 + $0x320] sm:$0xff]  ;;  %v1987_v60 = vld [vmem:[#allocation17 + $0xb30] sm:$0xff] }
 0x38f   :  { %3073 = vmatpush.msra.mxu1 %v1807_v32  ;;  %3018 = vmatpush.msrb.mxu2 %v2256_v33  ;;  %v2107_v50 = vld [vmem:[#allocation17 + $0xef0] sm:$0xff]  ;;  %v1885_v33 = vld [vmem:[#allocation17 + $0x800] sm:$0xff] }
 0x390   :  { %3038 = vmatpush.msrb.mxu3 %v2352_v34  ;;  %3054 = vmatpush.msra.mxu0 %v1705_v63  ;;  %v2203_v32 = vld [vmem:[#allocation17 + $0x11f0] sm:$0xff]  ;;  %v1981_v34 = vld [vmem:[#allocation17 + $0xb00] sm:$0xff] }
 0x391   :  { %3074 = vmatpush.msra.mxu1 %v1801_v36  ;;  %3019 = vmatpush.msrb.mxu2 %v2250_v37  ;;  %v2101_v63 = vld [vmem:[#allocation17 + $0xec0] sm:$0xff]  ;;  %v1879_v37 = vld [vmem:[#allocation17 + $0x7d0] sm:$0xff] }
 0x392   :  { %3039 = vmatpush.msrb.mxu3 %v2346_v38  ;;  %3055 = vmatpush.msra.mxu0 %v1699_v41  ;;  %v2197_v36 = vld [vmem:[#allocation17 + $0x11c0] sm:$0xff]  ;;  %v1975_v38 = vld [vmem:[#allocation17 + $0xad0] sm:$0xff] }
 0x393   :  { %3075 = vmatpush.msra.mxu1 %v1795_v42  ;;  %3020 = vmatpush.msrb.mxu2 %v2244_v43  ;;  %v2095_v41 = vld [vmem:[#allocation17 + $0xe90] sm:$0xff]  ;;  %v1873_v43 = vld [vmem:[#allocation17 + $0x7a0] sm:$0xff] }
 0x394   :  { %3040 = vmatpush.msrb.mxu3 %v2340_v46  ;;  %3056 = vmatpush.msra.mxu0 %v1693_v47  ;;  %v2191_v42 = vld [vmem:[#allocation17 + $0x1190] sm:$0xff]  ;;  %v1969_v46 = vld [vmem:[#allocation17 + $0xaa0] sm:$0xff] }
 0x395   :  { %3076 = vmatpush.msra.mxu1 %v1789_v54  ;;  %3021 = vmatpush.msrb.mxu2 %v2238_v55  ;;  %v2089_v47 = vld [vmem:[#allocation17 + $0xe60] sm:$0xff]  ;;  %v1867_v55 = vld [vmem:[#allocation17 + $0x770] sm:$0xff] }
 0x396   :  { %3041 = vmatpush.msrb.mxu3 %v2334_v56  ;;  %3057 = vmatpush.msra.mxu0 %v1687_v57  ;;  %v2185_v54 = vld [vmem:[#allocation17 + $0x1160] sm:$0xff]  ;;  %v1963_v56 = vld [vmem:[#allocation17 + $0xa70] sm:$0xff] }
 0x397   :  { %3077 = vmatpush.msra.mxu1 %v1783_v58  ;;  %3022 = vmatpush.msrb.mxu2 %v2232_v59  ;;  %v2083_v57 = vld [vmem:[#allocation17 + $0xe30] sm:$0xff]  ;;  %v1861_v59 = vld [vmem:[#allocation17 + $0x740] sm:$0xff] }
 0x398   :  { %3042 = vmatpush.msrb.mxu3 %v2328_v4  ;;  %3058 = vmatpush.msra.mxu0 %v1681_v5  ;;  %v2179_v58 = vld [vmem:[#allocation17 + $0x1130] sm:$0xff]  ;;  %v1957_v4 = vld [vmem:[#allocation17 + $0xa40] sm:$0xff] }
 0x399   :  { %3078 = vmatpush.msra.mxu1 %v1777_v52  ;;  %3023 = vmatpush.msrb.mxu2 %v2226_v62  ;;  %v2077_v5 = vld [vmem:[#allocation17 + $0xe00] sm:$0xff]  ;;  %v1855_v62 = vld [vmem:[#allocation17 + $0x710] sm:$0xff] }
 0x39a   :  { %3043 = vmatpush.msrb.mxu3 %v2322_v2  ;;  %3059 = vmatpush.msra.mxu0 %v1675_v1  ;;  %v2173_v52 = vld [vmem:[#allocation17 + $0x1100] sm:$0xff]  ;;  %v1951_v2 = vld [vmem:[#allocation17 + $0xa10] sm:$0xff] }
 0x39b   :  { %3079 = vmatpush.msra.mxu1 %v1771_v3  ;;  %3024 = vmatpush.msrb.mxu2 %v2220_v7  ;;  %v2071_v1 = vld [vmem:[#allocation17 + $0xdd0] sm:$0xff]  ;;  %v1849_v7 = vld [vmem:[#allocation17 + $0x6e0] sm:$0xff] }
 0x39c   :  { %3044 = vmatpush.msrb.mxu3 %v2316_v8  ;;  %3060 = vmatpush.msra.mxu0 %v1669_v9  ;;  %v2167_v3 = vld [vmem:[#allocation17 + $0x10d0] sm:$0xff]  ;;  %v1945_v8 = vld [vmem:[#allocation17 + $0x9e0] sm:$0xff] }
 0x39d   :  { %3080 = vmatpush.msra.mxu1 %v1765_v48  ;;  %3025 = vmatpush.msrb.mxu2 %v2214_v13  ;;  %v2065_v9 = vld [vmem:[#allocation17 + $0xda0] sm:$0xff]  ;;  %v1843_v13 = vld [vmem:[#allocation17 + $0x6b0] sm:$0xff] }
 0x39e   :  { %3045 = vmatpush.msrb.mxu3 %v2310_v44  ;;  %3061 = vmatpush.msra.mxu0 %v1663_v51  ;;  %v2161_v48 = vld [vmem:[#allocation17 + $0x10a0] sm:$0xff]  ;;  %v1939_v44 = vld [vmem:[#allocation17 + $0x9b0] sm:$0xff] }
 0x39f   :  { %3081 = vmatpush.msra.mxu1 %v1759_v14  ;;  %3026 = vmatpush.msrb.mxu2 %v2208_v12  ;;  %v2059_v51 = vld [vmem:[#allocation17 + $0xd70] sm:$0xff]  ;;  %v1837_v12 = vld [vmem:[#allocation17 + $0x680] sm:$0xff] }
 0x3a0   :  { %3046 = vmatpush.msrb.mxu3 %v2304_v15  ;;  %3027 = vmatmul.f32.vlgmr.msrb.gmra.mxu2 %v5258_v35  ;;  %v2155_v14 = vld [vmem:[#allocation17 + $0x1070] sm:$0xff]  ;;  %v1933_v15 = vld [vmem:[#allocation17 + $0x980] sm:$0xff] }
 0x3a1   :  { %3047 = vmatmul.f32.vlgmr.msrb.gmra.mxu3 %v5260_v61  ;;  %3062 = vmatpush.msra.mxu0 %v1657_v16  ;;  %v2053_v16 = vld [vmem:[#allocation17 + $0xd40] sm:$0xff] }
 0x3a2   :  { %3082 = vmatpush.msra.mxu1 %v1753_v17  ;;  %3091 = vmatpush.msra.mxu2 %v1915_v18  ;;  %v2149_v17 = vld [vmem:[#allocation17 + $0x1040] sm:$0xff]  ;;  %v1831_v18 = vld [vmem:[#allocation17 + $0x650] sm:$0xff] }
 0x3a3   :  { %3111 = vmatpush.msra.mxu3 %v2011_v19  ;;  %3063 = vmatpush.msra.mxu0 %v1651_v22  ;;  %v1927_v19 = vld [vmem:[#allocation17 + $0x950] sm:$0xff] }
 0x3a4   :  { %3083 = vmatpush.msra.mxu1 %v1747_v23  ;;  %3092 = vmatpush.msra.mxu2 %v1909_v10  ;;  %v2047_v22 = vld [vmem:[#allocation17 + $0xd10] sm:$0xff]  ;;  %v1825_v10 = vld [vmem:[#allocation17 + $0x620] sm:$0xff] }
 0x3a5   :  { %3112 = vmatpush.msra.mxu3 %v2005_v53  ;;  %3064 = vmatpush.msra.mxu0 %v1645_v21  ;;  %v2143_v23 = vld [vmem:[#allocation17 + $0x1010] sm:$0xff]  ;;  %v1921_v53 = vld [vmem:[#allocation17 + $0x920] sm:$0xff] }
 0x3a6   :  { %3084 = vmatpush.msra.mxu1 %v1741_v24  ;;  %3093 = vmatpush.msra.mxu2 %v1903_v25  ;;  %v2041_v21 = vld [vmem:[#allocation17 + $0xce0] sm:$0xff]  ;;  %v2299_v25 = vld [vmem:[#allocation17 + $0x14f0] sm:$0xff] }
 0x3a7   :  { %3113 = vmatpush.msra.mxu3 %v1999_v29  ;;  %3065 = vmatpush.msra.mxu0 %v1639_v6  ;;  %v2137_v24 = vld [vmem:[#allocation17 + $0xfe0] sm:$0xff]  ;;  %v2395_v29 = vld [vmem:[#allocation17 + $0x17f0] sm:$0xff] }
 0x3a8   :  { %3085 = vmatpush.msra.mxu1 %v1735_v30  ;;  %3094 = vmatpush.msra.mxu2 %v1897_v0  ;;  %v2035_v6 = vld [vmem:[#allocation17 + $0xcb0] sm:$0xff]  ;;  %v2293_v0 = vld [vmem:[#allocation17 + $0x14c0] sm:$0xff] }
 0x3a9   :  { %3114 = vmatpush.msra.mxu3 %v1993_v26  ;;  %3066 = vmatpush.msra.mxu0 %v1633_v27  ;;  %v2131_v30 = vld [vmem:[#allocation17 + $0xfb0] sm:$0xff]  ;;  %v2389_v26 = vld [vmem:[#allocation17 + $0x17c0] sm:$0xff] }
 0x3aa   :  { %3086 = vmatpush.msra.mxu1 %v1729_v28  ;;  %3095 = vmatpush.msra.mxu2 %v1891_v31  ;;  %v2029_v27 = vld [vmem:[#allocation17 + $0xc80] sm:$0xff]  ;;  %v2287_v31 = vld [vmem:[#allocation17 + $0x1490] sm:$0xff] }
 0x3ab   :  { %3115 = vmatpush.msra.mxu3 %v1987_v60  ;;  %3067 = vmatmul.f32.vlgmr.msra.gmra.mxu0 %v5226_v49  ;;  %v2125_v28 = vld [vmem:[#allocation17 + $0xf80] sm:$0xff]  ;;  %v2383_v60 = vld [vmem:[#allocation17 + $0x1790] sm:$0xff] }
 0x3ac   :  { %3087 = vmatmul.f32.vlgmr.msra.gmra.mxu1 %v5228_v20  ;;  %3131 = vmatpush.msrb.mxu0 %v2107_v50  ;;  %v2023_v50 = vld [vmem:[#allocation17 + $0xc50] sm:$0xff] }
 0x3ad   :  { %3151 = vmatpush.msrb.mxu1 %v2203_v32  ;;  %3096 = vmatpush.msra.mxu2 %v1885_v33  ;;  %v2119_v32 = vld [vmem:[#allocation17 + $0xf50] sm:$0xff]  ;;  %v2281_v33 = vld [vmem:[#allocation17 + $0x1460] sm:$0xff] }
 0x3ae   :  { %3116 = vmatpush.msra.mxu3 %v1981_v34  ;;  %3132 = vmatpush.msrb.mxu0 %v2101_v63  ;;  %v2377_v34 = vld [vmem:[#allocation17 + $0x1760] sm:$0xff] }
 0x3af   :  { %3152 = vmatpush.msrb.mxu1 %v2197_v36  ;;  %3097 = vmatpush.msra.mxu2 %v1879_v37  ;;  %v2017_v63 = vld [vmem:[#allocation17 + $0xc20] sm:$0xff]  ;;  %v2275_v37 = vld [vmem:[#allocation17 + $0x1430] sm:$0xff] }
 0x3b0   :  { %3117 = vmatpush.msra.mxu3 %v1975_v38  ;;  %3133 = vmatpush.msrb.mxu0 %v2095_v41  ;;  %v2113_v36 = vld [vmem:[#allocation17 + $0xf20] sm:$0xff]  ;;  %v2371_v38 = vld [vmem:[#allocation17 + $0x1730] sm:$0xff]  ;;  %v1724_v41 = vld [vmem:[#allocation17 + $0x2f8] sm:$0xff] }
 0x3b1   :  { %3153 = vmatpush.msrb.mxu1 %v2191_v42  ;;  %3098 = vmatpush.msra.mxu2 %v1873_v43  ;;  %v1820_v42 = vld [vmem:[#allocation17 + $0x5f8] sm:$0xff]  ;;  %v2269_v43 = vld [vmem:[#allocation17 + $0x1400] sm:$0xff] }
 0x3b2   :  { %3118 = vmatpush.msra.mxu3 %v1969_v46  ;;  %3134 = vmatpush.msrb.mxu0 %v2089_v47  ;;  %v2365_v46 = vld [vmem:[#allocation17 + $0x1700] sm:$0xff]  ;;  %v1718_v47 = vld [vmem:[#allocation17 + $0x2c8] sm:$0xff] }
 0x3b3   :  { %3154 = vmatpush.msrb.mxu1 %v2185_v54  ;;  %3099 = vmatpush.msra.mxu2 %v1867_v55  ;;  %v1814_v54 = vld [vmem:[#allocation17 + $0x5c8] sm:$0xff]  ;;  %v2263_v55 = vld [vmem:[#allocation17 + $0x13d0] sm:$0xff] }
 0x3b4   :  { %3119 = vmatpush.msra.mxu3 %v1963_v56  ;;  %3135 = vmatpush.msrb.mxu0 %v2083_v57  ;;  %v2359_v56 = vld [vmem:[#allocation17 + $0x16d0] sm:$0xff]  ;;  %v1712_v57 = vld [vmem:[#allocation17 + $0x298] sm:$0xff] }
 0x3b5   :  { %3155 = vmatpush.msrb.mxu1 %v2179_v58  ;;  %3100 = vmatpush.msra.mxu2 %v1861_v59  ;;  %v1808_v58 = vld [vmem:[#allocation17 + $0x598] sm:$0xff]  ;;  %v2257_v59 = vld [vmem:[#allocation17 + $0x13a0] sm:$0xff] }
 0x3b6   :  { %3120 = vmatpush.msra.mxu3 %v1957_v4  ;;  %3136 = vmatpush.msrb.mxu0 %v2077_v5  ;;  %v2353_v4 = vld [vmem:[#allocation17 + $0x16a0] sm:$0xff]  ;;  %v1706_v5 = vld [vmem:[#allocation17 + $0x268] sm:$0xff] }
 0x3b7   :  { %3156 = vmatpush.msrb.mxu1 %v2173_v52  ;;  %3101 = vmatpush.msra.mxu2 %v1855_v62  ;;  %v1802_v52 = vld [vmem:[#allocation17 + $0x568] sm:$0xff]  ;;  %v2251_v62 = vld [vmem:[#allocation17 + $0x1370] sm:$0xff] }
 0x3b8   :  { %3121 = vmatpush.msra.mxu3 %v1951_v2  ;;  %3137 = vmatpush.msrb.mxu0 %v2071_v1  ;;  %v2347_v2 = vld [vmem:[#allocation17 + $0x1670] sm:$0xff]  ;;  %v1700_v1 = vld [vmem:[#allocation17 + $0x238] sm:$0xff] }
 0x3b9   :  { %3157 = vmatpush.msrb.mxu1 %v2167_v3  ;;  %3102 = vmatpush.msra.mxu2 %v1849_v7  ;;  %v1796_v3 = vld [vmem:[#allocation17 + $0x538] sm:$0xff]  ;;  %v2245_v7 = vld [vmem:[#allocation17 + $0x1340] sm:$0xff] }
 0x3ba   :  { %3122 = vmatpush.msra.mxu3 %v1945_v8  ;;  %3138 = vmatpush.msrb.mxu0 %v2065_v9  ;;  %v2341_v8 = vld [vmem:[#allocation17 + $0x1640] sm:$0xff]  ;;  %v1694_v9 = vld [vmem:[#allocation17 + $0x208] sm:$0xff] }
 0x3bb   :  { %3158 = vmatpush.msrb.mxu1 %v2161_v48  ;;  %3103 = vmatpush.msra.mxu2 %v1843_v13  ;;  %v1790_v48 = vld [vmem:[#allocation17 + $0x508] sm:$0xff]  ;;  %v2239_v13 = vld [vmem:[#allocation17 + $0x1310] sm:$0xff] }
 0x3bc   :  { %3123 = vmatpush.msra.mxu3 %v1939_v44  ;;  %3139 = vmatpush.msrb.mxu0 %v2059_v51  ;;  %v2335_v44 = vld [vmem:[#allocation17 + $0x1610] sm:$0xff]  ;;  %v1688_v51 = vld [vmem:[#allocation17 + $0x1d8] sm:$0xff] }
 0x3bd   :  { %3159 = vmatpush.msrb.mxu1 %v2155_v14  ;;  %3104 = vmatpush.msra.mxu2 %v1837_v12  ;;  %v1784_v14 = vld [vmem:[#allocation17 + $0x4d8] sm:$0xff]  ;;  %v2233_v12 = vld [vmem:[#allocation17 + $0x12e0] sm:$0xff] }
 0x3be   :  { %3124 = vmatpush.msra.mxu3 %v1933_v15  ;;  %3140 = vmatpush.msrb.mxu0 %v2053_v16  ;;  %v2329_v15 = vld [vmem:[#allocation17 + $0x15e0] sm:$0xff]  ;;  %v1682_v16 = vld [vmem:[#allocation17 + $0x1a8] sm:$0xff] }
 0x3bf   :  { %3160 = vmatpush.msrb.mxu1 %v2149_v17  ;;  %3105 = vmatpush.msra.mxu2 %v1831_v18  ;;  %v1778_v17 = vld [vmem:[#allocation17 + $0x4a8] sm:$0xff]  ;;  %v2227_v18 = vld [vmem:[#allocation17 + $0x12b0] sm:$0xff] }
 0x3c0   :  { %3125 = vmatpush.msra.mxu3 %v1927_v19  ;;  %3141 = vmatpush.msrb.mxu0 %v2047_v22  ;;  %v2323_v19 = vld [vmem:[#allocation17 + $0x15b0] sm:$0xff]  ;;  %v1676_v22 = vld [vmem:[#allocation17 + $0x178] sm:$0xff] }
 0x3c1   :  { %3161 = vmatpush.msrb.mxu1 %v2143_v23  ;;  %3106 = vmatpush.msra.mxu2 %v1825_v10  ;;  %v1772_v23 = vld [vmem:[#allocation17 + $0x478] sm:$0xff]  ;;  %v2221_v10 = vld [vmem:[#allocation17 + $0x1280] sm:$0xff] }
 0x3c2   :  { %3126 = vmatpush.msra.mxu3 %v1921_v53  ;;  %3107 = vmatmul.f32.vlgmr.msra.gmra.mxu2 %v5246_v45  ;;  %v2317_v53 = vld [vmem:[#allocation17 + $0x1580] sm:$0xff] }
 0x3c3   :  { %3127 = vmatmul.f32.vlgmr.msra.gmra.mxu3 %v5248_v11  ;;  %3142 = vmatpush.msrb.mxu0 %v2041_v21  ;;  %v1670_v21 = vld [vmem:[#allocation17 + $0x148] sm:$0xff] }
 0x3c4   :  { %3162 = vmatpush.msrb.mxu1 %v2137_v24  ;;  %3171 = vmatpush.msrb.mxu2 %v2299_v25  ;;  %v1766_v24 = vld [vmem:[#allocation17 + $0x448] sm:$0xff]  ;;  %v2215_v25 = vld [vmem:[#allocation17 + $0x1250] sm:$0xff] }
 0x3c5   :  { %3191 = vmatpush.msrb.mxu3 %v2395_v29  ;;  %3143 = vmatpush.msrb.mxu0 %v2035_v6  ;;  %v2311_v29 = vld [vmem:[#allocation17 + $0x1550] sm:$0xff]  ;;  %v1664_v6 = vld [vmem:[#allocation17 + $0x118] sm:$0xff] }
 0x3c6   :  { %3163 = vmatpush.msrb.mxu1 %v2131_v30  ;;  %3172 = vmatpush.msrb.mxu2 %v2293_v0  ;;  %v1760_v30 = vld [vmem:[#allocation17 + $0x418] sm:$0xff]  ;;  %v2209_v0 = vld [vmem:[#allocation17 + $0x1220] sm:$0xff] }
 0x3c7   :  { %3192 = vmatpush.msrb.mxu3 %v2389_v26  ;;  %3144 = vmatpush.msrb.mxu0 %v2029_v27  ;;  %v2305_v26 = vld [vmem:[#allocation17 + $0x1520] sm:$0xff]  ;;  %v1658_v27 = vld [vmem:[#allocation17 + $0xe8] sm:$0xff] }
 0x3c8   :  { %3164 = vmatpush.msrb.mxu1 %v2125_v28  ;;  %3173 = vmatpush.msrb.mxu2 %v2287_v31  ;;  %v1754_v28 = vld [vmem:[#allocation17 + $0x3e8] sm:$0xff]  ;;  %v1916_v31 = vld [vmem:[#allocation17 + $0x8f8] sm:$0xff] }
 0x3c9   :  { %3193 = vmatpush.msrb.mxu3 %v2383_v60  ;;  %3145 = vmatpush.msrb.mxu0 %v2023_v50  ;;  %v2012_v60 = vld [vmem:[#allocation17 + $0xbf8] sm:$0xff] }
 0x3ca   :  { %3165 = vmatpush.msrb.mxu1 %v2119_v32  ;;  %3174 = vmatpush.msrb.mxu2 %v2281_v33  ;;  %v1652_v50 = vld [vmem:[#allocation17 + $0xb8] sm:$0xff]  ;;  %v1910_v33 = vld [vmem:[#allocation17 + $0x8c8] sm:$0xff] }
 0x3cb   :  { %3194 = vmatpush.msrb.mxu3 %v2377_v34  ;;  %3146 = vmatpush.msrb.mxu0 %v2017_v63  ;;  %v1748_v32 = vld [vmem:[#allocation17 + $0x3b8] sm:$0xff]  ;;  %v2006_v34 = vld [vmem:[#allocation17 + $0xbc8] sm:$0xff] }
 0x3cc   :  { %3166 = vmatpush.msrb.mxu1 %v2113_v36  ;;  %3175 = vmatpush.msrb.mxu2 %v2275_v37  ;;  %v1646_v63 = vld [vmem:[#allocation17 + $0x88] sm:$0xff]  ;;  %v1904_v37 = vld [vmem:[#allocation17 + $0x898] sm:$0xff] }
 0x3cd   :  { %3195 = vmatpush.msrb.mxu3 %v2371_v38  ;;  %3147 = vmatmul.f32.vlgmr.msrb.gmra.mxu0 %v5234_v39  ;;  %v1742_v36 = vld [vmem:[#allocation17 + $0x388] sm:$0xff]  ;;  %v2000_v38 = vld [vmem:[#allocation17 + $0xb98] sm:$0xff] }
 0x3ce   :  { %3167 = vmatmul.f32.vlgmr.msrb.gmra.mxu1 %v5236_v40  ;;  %3211 = vmatpush.msra.mxu0 %v1724_v41  ;;  %v1640_v41 = vld [vmem:[#allocation17 + $0x58] sm:$0xff] }
 0x3cf   :  { %3231 = vmatpush.msra.mxu1 %v1820_v42  ;;  %3176 = vmatpush.msrb.mxu2 %v2269_v43  ;;  %v1736_v42 = vld [vmem:[#allocation17 + $0x358] sm:$0xff]  ;;  %v1898_v43 = vld [vmem:[#allocation17 + $0x868] sm:$0xff] }
 0x3d0   :  { %3196 = vmatpush.msrb.mxu3 %v2365_v46  ;;  %3212 = vmatpush.msra.mxu0 %v1718_v47  ;;  %v1994_v46 = vld [vmem:[#allocation17 + $0xb68] sm:$0xff] }
 0x3d1   :  { %3232 = vmatpush.msra.mxu1 %v1814_v54  ;;  %3177 = vmatpush.msrb.mxu2 %v2263_v55  ;;  %v1634_v47 = vld [vmem:[#allocation17 + $0x28] sm:$0xff]  ;;  %v1892_v55 = vld [vmem:[#allocation17 + $0x838] sm:$0xff] }
 0x3d2   :  { %3197 = vmatpush.msrb.mxu3 %v2359_v56  ;;  %3213 = vmatpush.msra.mxu0 %v1712_v57  ;;  %v1730_v54 = vld [vmem:[#allocation17 + $0x328] sm:$0xff]  ;;  %v1988_v56 = vld [vmem:[#allocation17 + $0xb38] sm:$0xff] }
 0x3d3   :  { %3233 = vmatpush.msra.mxu1 %v1808_v58  ;;  %3178 = vmatpush.msrb.mxu2 %v2257_v59  ;;  %v2108_v57 = vld [vmem:[#allocation17 + $0xef8] sm:$0xff]  ;;  %v1886_v59 = vld [vmem:[#allocation17 + $0x808] sm:$0xff] }
 0x3d4   :  { %3198 = vmatpush.msrb.mxu3 %v2353_v4  ;;  %3214 = vmatpush.msra.mxu0 %v1706_v5  ;;  %v2204_v58 = vld [vmem:[#allocation17 + $0x11f8] sm:$0xff]  ;;  %v1982_v4 = vld [vmem:[#allocation17 + $0xb08] sm:$0xff] }
 0x3d5   :  { %3234 = vmatpush.msra.mxu1 %v1802_v52  ;;  %3179 = vmatpush.msrb.mxu2 %v2251_v62  ;;  %v2102_v5 = vld [vmem:[#allocation17 + $0xec8] sm:$0xff]  ;;  %v1880_v62 = vld [vmem:[#allocation17 + $0x7d8] sm:$0xff] }
 0x3d6   :  { %3199 = vmatpush.msrb.mxu3 %v2347_v2  ;;  %3215 = vmatpush.msra.mxu0 %v1700_v1  ;;  %v2198_v52 = vld [vmem:[#allocation17 + $0x11c8] sm:$0xff]  ;;  %v1976_v2 = vld [vmem:[#allocation17 + $0xad8] sm:$0xff] }
 0x3d7   :  { %3235 = vmatpush.msra.mxu1 %v1796_v3  ;;  %3180 = vmatpush.msrb.mxu2 %v2245_v7  ;;  %v2096_v1 = vld [vmem:[#allocation17 + $0xe98] sm:$0xff]  ;;  %v1874_v7 = vld [vmem:[#allocation17 + $0x7a8] sm:$0xff] }
 0x3d8   :  { %3200 = vmatpush.msrb.mxu3 %v2341_v8  ;;  %3216 = vmatpush.msra.mxu0 %v1694_v9  ;;  %v2192_v3 = vld [vmem:[#allocation17 + $0x1198] sm:$0xff]  ;;  %v1970_v8 = vld [vmem:[#allocation17 + $0xaa8] sm:$0xff] }
 0x3d9   :  { %3236 = vmatpush.msra.mxu1 %v1790_v48  ;;  %3181 = vmatpush.msrb.mxu2 %v2239_v13  ;;  %v2090_v9 = vld [vmem:[#allocation17 + $0xe68] sm:$0xff]  ;;  %v1964_v48 = vld [vmem:[#allocation17 + $0xa78] sm:$0xff] }
 0x3da   :  { %3201 = vmatpush.msrb.mxu3 %v2335_v44  ;;  %3217 = vmatpush.msra.mxu0 %v1688_v51  ;;  %v2084_v13 = vld [vmem:[#allocation17 + $0xe38] sm:$0xff]  ;;  %v5298_v51 = vpop.f32.mrf.mxu0 }
 0x3db   :  { %3237 = vmatpush.msra.mxu1 %v1784_v14  ;;  %3182 = vmatpush.msrb.mxu2 %v2233_v12  ;;  %v2180_v44 = vld [vmem:[#allocation17 + $0x1138] sm:$0xff]  ;;  %v1862_v14 = vld [vmem:[#allocation17 + $0x748] sm:$0xff] }
 0x3dc   :  { %3202 = vmatpush.msrb.mxu3 %v2329_v15  ;;  %3218 = vmatpush.msra.mxu0 %v1682_v16  ;;  %v1958_v12 = vld [vmem:[#allocation17 + $0xa48] sm:$0xff] }
 0x3dd   :  { %3238 = vmatpush.msra.mxu1 %v1778_v17  ;;  %3183 = vmatpush.msrb.mxu2 %v2227_v18  ;;  %v2078_v15 = vld [vmem:[#allocation17 + $0xe08] sm:$0xff]  ;;  %v1856_v17 = vld [vmem:[#allocation17 + $0x718] sm:$0xff] }
 0x3de   :  { %3203 = vmatpush.msrb.mxu3 %v2323_v19  ;;  %3219 = vmatpush.msra.mxu0 %v1676_v22  ;;  %v2174_v16 = vld [vmem:[#allocation17 + $0x1108] sm:$0xff]  ;;  %v1952_v18 = vld [vmem:[#allocation17 + $0xa18] sm:$0xff] }
 0x3df   :  { %3239 = vmatpush.msra.mxu1 %v1772_v23  ;;  %3184 = vmatpush.msrb.mxu2 %v2221_v10  ;;  %v2072_v19 = vld [vmem:[#allocation17 + $0xdd8] sm:$0xff]  ;;  %v1850_v23 = vld [vmem:[#allocation17 + $0x6e8] sm:$0xff] }
 0x3e0   :  { %3204 = vmatpush.msrb.mxu3 %v2317_v53  ;;  %3220 = vmatpush.msra.mxu0 %v1670_v21  ;;  %v2168_v22 = vld [vmem:[#allocation17 + $0x10d8] sm:$0xff]  ;;  %v1946_v10 = vld [vmem:[#allocation17 + $0x9e8] sm:$0xff] }
 0x3e1   :  { %3240 = vmatpush.msra.mxu1 %v1766_v24  ;;  %3185 = vmatpush.msrb.mxu2 %v2215_v25  ;;  %v2066_v53 = vld [vmem:[#allocation17 + $0xda8] sm:$0xff]  ;;  %v5300_v24 = vpop.f32.mrf.mxu1  ;;  %v5302_v25 = vpop.f32.mrf.mxu2 }
 0x3e2   :  { %3205 = vmatpush.msrb.mxu3 %v2311_v29  ;;  %3221 = vmatpush.msra.mxu0 %v1664_v6  ;;  %v2162_v21 = vld [vmem:[#allocation17 + $0x10a8] sm:$0xff]  ;;  %v1844_v29 = vld [vmem:[#allocation17 + $0x6b8] sm:$0xff] }
 0x3e3   :  { %3241 = vmatpush.msra.mxu1 %v1760_v30  ;;  %3186 = vmatpush.msrb.mxu2 %v2209_v0  ;;  %v1940_v6 = vld [vmem:[#allocation17 + $0x9b8] sm:$0xff] }
 0x3e4   :  { %3206 = vmatpush.msrb.mxu3 %v2305_v26  ;;  %3187 = vmatmul.f32.vlgmr.msrb.gmra.mxu2 %v5258_v35  ;;  %v2060_v30 = vld [vmem:[#allocation17 + $0xd78] sm:$0xff]  ;;  %v1838_v26 = vld [vmem:[#allocation17 + $0x688] sm:$0xff] }
 0x3e5   :  { %3207 = vmatmul.f32.vlgmr.msrb.gmra.mxu3 %v5260_v61  ;;  %3222 = vmatpush.msra.mxu0 %v1658_v27  ;;  %v2156_v0 = vld [vmem:[#allocation17 + $0x1078] sm:$0xff]  ;;  %v1934_v27 = vld [vmem:[#allocation17 + $0x988] sm:$0xff] }
 0x3e6   :  { %3242 = vmatpush.msra.mxu1 %v1754_v28  ;;  %3251 = vmatpush.msra.mxu2 %v1916_v31  ;;  %v2054_v28 = vld [vmem:[#allocation17 + $0xd48] sm:$0xff] }
 0x3e7   :  { %3271 = vmatpush.msra.mxu3 %v2012_v60  ;;  %3223 = vmatpush.msra.mxu0 %v1652_v50  ;;  %v2150_v31 = vld [vmem:[#allocation17 + $0x1048] sm:$0xff]  ;;  %v5304_v60 = vpop.f32.mrf.mxu0  ;;  %v1832_v50 = vld [vmem:[#allocation17 + $0x658] sm:$0xff] }
 0x3e8   :  { %3243 = vmatpush.msra.mxu1 %v1748_v32  ;;  %3252 = vmatpush.msra.mxu2 %v1910_v33  ;;  %v1928_v32 = vld [vmem:[#allocation17 + $0x958] sm:$0xff] }
 0x3e9   :  { %3272 = vmatpush.msra.mxu3 %v2006_v34  ;;  %3224 = vmatpush.msra.mxu0 %v1646_v63  ;;  %v2048_v33 = vld [vmem:[#allocation17 + $0xd18] sm:$0xff]  ;;  %v5306_v63 = vpop.f32.mrf.mxu3 }
 0x3ea   :  { %3244 = vmatpush.msra.mxu1 %v1742_v36  ;;  %3253 = vmatpush.msra.mxu2 %v1904_v37  ;;  %v2144_v34 = vld [vmem:[#allocation17 + $0x1018] sm:$0xff]  ;;  %v1826_v36 = vld [vmem:[#allocation17 + $0x628] sm:$0xff] }
 0x3eb   :  { %3273 = vmatpush.msra.mxu3 %v2000_v38  ;;  %3225 = vmatpush.msra.mxu0 %v1640_v41  ;;  %v1922_v37 = vld [vmem:[#allocation17 + $0x928] sm:$0xff] }
 0x3ec   :  { %3245 = vmatpush.msra.mxu1 %v1736_v42  ;;  %3254 = vmatpush.msra.mxu2 %v1898_v43  ;;  %v2042_v38 = vld [vmem:[#allocation17 + $0xce8] sm:$0xff]  ;;  %v2300_v42 = vld [vmem:[#allocation17 + $0x14f8] sm:$0xff] }
 0x3ed   :  { %3274 = vmatpush.msra.mxu3 %v1994_v46  ;;  %3226 = vmatpush.msra.mxu0 %v1634_v47  ;;  %v2138_v41 = vld [vmem:[#allocation17 + $0xfe8] sm:$0xff]  ;;  %v2396_v43 = vld [vmem:[#allocation17 + $0x17f8] sm:$0xff]  ;;  %v5308_v46 = vpop.f32.mrf.mxu1  ;;  %v5310_v47 = vpop.f32.mrf.mxu2 }
 0x3ee   :  { %3246 = vmatpush.msra.mxu1 %v1730_v54  ;;  %3255 = vmatpush.msra.mxu2 %v1892_v55  ;;  %v2036_v54 = vld [vmem:[#allocation17 + $0xcb8] sm:$0xff] }
 0x3ef   :  { %3275 = vmatpush.msra.mxu3 %v1988_v56  ;;  %3227 = vmatmul.f32.vlgmr.msra.gmra.mxu0 %v5226_v49  ;;  %v2186_v49 = vld [vmem:[#allocation17 + $0x1168] sm:$0xff]  ;;  %v2132_v55 = vld [vmem:[#allocation17 + $0xfb8] sm:$0xff] }
 0x3f0   :  { %3247 = vmatmul.f32.vlgmr.msra.gmra.mxu1 %v5228_v20  ;;  %3291 = vmatpush.msrb.mxu0 %v2108_v57  ;;  %v1868_v20 = vld [vmem:[#allocation17 + $0x778] sm:$0xff]  ;;  %v2294_v56 = vld [vmem:[#allocation17 + $0x14c8] sm:$0xff] }
 0x3f1   :  { %3311 = vmatpush.msrb.mxu1 %v2204_v58  ;;  %3256 = vmatpush.msra.mxu2 %v1886_v59  ;;  %v2390_v57 = vld [vmem:[#allocation17 + $0x17c8] sm:$0xff]  ;;  %v2588_v58 = vpop.f32.mrf.mxu0 }
 0x3f2   :  { %3276 = vmatpush.msra.mxu3 %v1982_v4  ;;  %3292 = vmatpush.msrb.mxu0 %v2102_v5  ;;  %v2030_v59 = vld [vmem:[#allocation17 + $0xc88] sm:$0xff]  ;;  %v2288_v5 = vld [vmem:[#allocation17 + $0x1498] sm:$0xff] }
 0x3f3   :  { %3312 = vmatpush.msrb.mxu1 %v2198_v52  ;;  %3257 = vmatpush.msra.mxu2 %v1880_v62  ;;  %v2126_v4 = vld [vmem:[#allocation17 + $0xf88] sm:$0xff]  ;;  %v2384_v52 = vld [vmem:[#allocation17 + $0x1798] sm:$0xff] }
 0x3f4   :  { %3277 = vmatpush.msra.mxu3 %v1976_v2  ;;  %3293 = vmatpush.msrb.mxu0 %v2096_v1  ;;  %v2120_v62 = vld [vmem:[#allocation17 + $0xf58] sm:$0xff]  ;;  %v2378_v2 = vld [vmem:[#allocation17 + $0x1768] sm:$0xff]  ;;  %v5314_v1 = vld [vmem:[#allocation19] sm:$0x3f] }
 0x3f5   :  { %3313 = vmatpush.msrb.mxu1 %v2192_v3  ;;  %3258 = vmatpush.msra.mxu2 %v1874_v7  ;;  %v5316_v3 = vpop.f32.mrf.mxu3  ;;  %v2018_v7 = vld [vmem:[#allocation17 + $0xc28] sm:$0xff] }
 0x3f6   :  { %3278 = vmatpush.msra.mxu3 %v1970_v8  ;;  %3294 = vmatpush.msrb.mxu0 %v2090_v9  ;;  %v2114_v8 = vld [vmem:[#allocation17 + $0xf28] sm:$0xff]  ;;  %v2276_v9 = vld [vmem:[#allocation17 + $0x1438] sm:$0xff] }
 0x3f7   :  { %3314 = vmatpush.msrb.mxu1 %v2186_v49  ;;  %3259 = vmatpush.msra.mxu2 %v1868_v20  ;;  %v2372_v49 = vld [vmem:[#allocation17 + $0x1738] sm:$0xff]  ;;  %v2608_v20 = vpop.f32.mrf.mxu1 }
 0x3f8   :  { %3279 = vmatpush.msra.mxu3 %v1964_v48  ;;  %3295 = vmatpush.msrb.mxu0 %v2084_v13  ;;  %v5318_v48 = vpop.f32.mrf.mxu2  ;;  %v2399_v13 = vperm.slane %v5314_v1, 0 }
 0x3f9   :  { %3315 = vmatpush.msrb.mxu1 %v2180_v44  ;;  %3260 = vmatpush.msra.mxu2 %v1862_v14  ;;  %v3407_v44 = vld [vmem:[#allocation20 + $0xf0] sm:$0xff] }
 0x3fa   :  { %3280 = vmatpush.msra.mxu3 %v1958_v12  ;;  %3296 = vmatpush.msrb.mxu0 %v2078_v15  ;;  %v3439_v14 = vld [vmem:[#allocation20 + $0x1f0] sm:$0xff]  ;;  %v5321_v12 = vpop.f32.mrf.mxu0  ;;  %v2270_v15 = vld [vmem:[#allocation17 + $0x1408] sm:$0xff] }
 0x3fb   :  { %3316 = vmatpush.msrb.mxu1 %v2174_v16  ;;  %3261 = vmatpush.msra.mxu2 %v1856_v17  ;;  %v2366_v16 = vld [vmem:[#allocation17 + $0x1708] sm:$0xff]  ;;  %v2400_v17 = vperm.slane %v5314_v1, 1 }
 0x3fc   :  { %3281 = vmatpush.msra.mxu3 %v1952_v18  ;;  %3297 = vmatpush.msrb.mxu0 %v2072_v19  ;;  %v3405_v18 = vld [vmem:[#allocation20 + $0xe0] sm:$0xff] }
 0x3fd   :  { %3317 = vmatpush.msrb.mxu1 %v2168_v22  ;;  %3262 = vmatpush.msra.mxu2 %v1850_v23  ;;  %v3437_v19 = vld [vmem:[#allocation20 + $0x1e0] sm:$0xff]  ;;  %v2264_v22 = vld [vmem:[#allocation17 + $0x13d8] sm:$0xff] }
 0x3fe   :  { %3282 = vmatpush.msra.mxu3 %v1946_v10  ;;  %3298 = vmatpush.msrb.mxu0 %v2066_v53  ;;  %v2360_v23 = vld [vmem:[#allocation17 + $0x16d8] sm:$0xff]  ;;  %v2429_v10 = vadd.f32 %v5298_v51, %v2399_v13  ;;  %v3421_v13 = vld [vmem:[#allocation20 + $0x160] sm:$0xff] }
 0x3ff   :  { %3318 = vmatpush.msrb.mxu1 %v2162_v21  ;;  %3263 = vmatpush.msra.mxu2 %v1844_v29  ;;  %v3403_v53 = vld [vmem:[#allocation20 + $0xd0] sm:$0xff]  ;;  %v2648_v29 = vpop.f32.mrf.mxu3 }
 0x400   :  { %3283 = vmatpush.msra.mxu3 %v1940_v6  ;;  %3299 = vmatpush.msrb.mxu0 %v2060_v30  ;;  %v3435_v21 = vld [vmem:[#allocation20 + $0x1d0] sm:$0xff]  ;;  %v2258_v6 = vld [vmem:[#allocation17 + $0x13a8] sm:$0xff] }
 0x401   :  { %3319 = vmatpush.msrb.mxu1 %v2156_v0  ;;  %3264 = vmatpush.msra.mxu2 %v1838_v26  ;;  %v2354_v30 = vld [vmem:[#allocation17 + $0x16a8] sm:$0xff]  ;;  %v5327_v26 = vpop.f32.mrf.mxu1  ;;  %v2252_v51 = vld [vmem:[#allocation17 + $0x1378] sm:$0xff] }
 0x402   :  { %3284 = vmatpush.msra.mxu3 %v1934_v27  ;;  %3300 = vmatpush.msrb.mxu0 %v2054_v28  ;;  %v3433_v0 = vld [vmem:[#allocation20 + $0x1c0] sm:$0xff]  ;;  %v5329_v27 = vpop.f32.mrf.mxu2  ;;  %v2348_v28 = vld [vmem:[#allocation17 + $0x1678] sm:$0xff] }
 0x403   :  { %3320 = vmatpush.msrb.mxu1 %v2150_v31  ;;  %3265 = vmatpush.msra.mxu2 %v1832_v50  ;;  %v2449_v31 = vadd.f32 %v5300_v24, %v2429_v10  ;;  %v3399_v50 = vld [vmem:[#allocation20 + $0xb0] sm:$0xff] }
 0x404   :  { %3285 = vmatpush.msra.mxu3 %v1928_v32  ;;  %3301 = vmatpush.msrb.mxu0 %v2048_v33  ;;  %v3431_v32 = vld [vmem:[#allocation20 + $0x1b0] sm:$0xff]  ;;  %v5332_v33 = vpop.f32.mrf.mxu0 }
 0x405   :  { %3321 = vmatpush.msrb.mxu1 %v2144_v34  ;;  %3266 = vmatpush.msra.mxu2 %v1826_v36  ;;  %v2246_v34 = vld [vmem:[#allocation17 + $0x1348] sm:$0xff]  ;;  %v2240_v24 = vld [vmem:[#allocation17 + $0x1318] sm:$0xff] }
 0x406   :  { %3286 = vmatpush.msra.mxu3 %v1922_v37  ;;  %3267 = vmatmul.f32.vlgmr.msra.gmra.mxu2 %v5246_v45  ;;  %v2024_v45 = vld [vmem:[#allocation17 + $0xc58] sm:$0xff]  ;;  %v2342_v36 = vld [vmem:[#allocation17 + $0x1648] sm:$0xff]  ;;  %v2469_v37 = vadd.f32 %v5302_v25, %v2449_v31 }
 0x407   :  { %3287 = vmatmul.f32.vlgmr.msra.gmra.mxu3 %v5248_v11  ;;  %3302 = vmatpush.msrb.mxu0 %v2042_v38  ;;  %v2282_v11 = vld [vmem:[#allocation17 + $0x1468] sm:$0xff] }
 0x408   :  { %3322 = vmatpush.msrb.mxu1 %v2138_v41  ;;  %3331 = vmatpush.msrb.mxu2 %v2300_v42  ;;  %v3397_v41 = vld [vmem:[#allocation20 + $0xa0] sm:$0xff] }
 0x409   :  { %3351 = vmatpush.msrb.mxu3 %v2396_v43  ;;  %3303 = vmatpush.msrb.mxu0 %v2036_v54  ;;  %v3429_v42 = vld [vmem:[#allocation20 + $0x1a0] sm:$0xff]  ;;  %v2336_v43 = vld [vmem:[#allocation17 + $0x1618] sm:$0xff] }
 0x40a   :  { %3323 = vmatpush.msrb.mxu1 %v2132_v55  ;;  %3332 = vmatpush.msrb.mxu2 %v2294_v56  ;;  %v3395_v55 = vld [vmem:[#allocation20 + $0x90] sm:$0xff]  ;;  %v2234_v25 = vld [vmem:[#allocation17 + $0x12e8] sm:$0xff] }
 0x40b   :  { %3352 = vmatpush.msrb.mxu3 %v2390_v57  ;;  %3304 = vmatpush.msrb.mxu0 %v2030_v59  ;;  %v3427_v56 = vld [vmem:[#allocation20 + $0x190] sm:$0xff]  ;;  %v5336_v57 = vpop.f32.mrf.mxu3  ;;  %v2489_v59 = vadd.f32 %v5306_v63, %v2469_v37  ;;  %v2222_v63 = vld [vmem:[#allocation17 + $0x1288] sm:$0xff] }
 0x40c   :  { %3324 = vmatpush.msrb.mxu1 %v2126_v4  ;;  %3333 = vmatpush.msrb.mxu2 %v2288_v5  ;;  %v3393_v4 = vld [vmem:[#allocation20 + $0x80] sm:$0xff] }
 0x40d   :  { %3353 = vmatpush.msrb.mxu3 %v2384_v52  ;;  %3305 = vmatpush.msrb.mxu0 %v2024_v45  ;;  %v3425_v5 = vld [vmem:[#allocation20 + $0x180] sm:$0xff]  ;;  %v5339_v52 = vpop.f32.mrf.mxu1  ;;  %v5341_v45 = vpop.f32.mrf.mxu2 }
 0x40e   :  { %3325 = vmatpush.msrb.mxu1 %v2120_v62  ;;  %3334 = vmatpush.msrb.mxu2 %v2282_v11  ;;  %v2228_v62 = vld [vmem:[#allocation17 + $0x12b8] sm:$0xff]  ;;  %v3501_v31 = vld [vmem:[#allocation20 + $0x3e0] sm:$0xff] }
 0x40f   :  { %3354 = vmatpush.msrb.mxu3 %v2378_v2  ;;  %3306 = vmatpush.msrb.mxu0 %v2018_v7  ;;  %v2324_v11 = vld [vmem:[#allocation17 + $0x15b8] sm:$0xff] }
 0x410   :  { %3326 = vmatpush.msrb.mxu1 %v2114_v8  ;;  %3335 = vmatpush.msrb.mxu2 %v2276_v9  ;;  %v3391_v7 = vld [vmem:[#allocation20 + $0x70] sm:$0xff]  ;;  %v5343_v9 = vpop.f32.mrf.mxu0 }
 0x411   :  { %3355 = vmatpush.msrb.mxu3 %v2372_v49  ;;  %3307 = vmatmul.f32.vlgmr.msrb.gmra.mxu0 %v5234_v39  ;;  %v2589_v39 = vadd.f32 %v2588_v58, %v2400_v17  ;;  %v2330_v58 = vld [vmem:[#allocation17 + $0x15e8] sm:$0xff]  ;;  %v3423_v8 = vld [vmem:[#allocation20 + $0x170] sm:$0xff] }
 0x412   :  { %3327 = vmatmul.f32.vlgmr.msrb.gmra.mxu1 %v5236_v40  ;;  %3575 = vmatpush.msra.mxu0 %v3407_v44  ;;  %v3401_v40 = vld [vmem:[#allocation20 + $0xc0] sm:$0xff]  ;;  %v2216_v44 = vld [vmem:[#allocation17 + $0x1258] sm:$0xff] }
 0x413   :  { %3595 = vmatpush.msra.mxu1 %v3439_v14  ;;  %3336 = vmatpush.msrb.mxu2 %v2270_v15  ;;  %v2609_v38 = vadd.f32 %v2608_v20, %v2589_v39  ;;  %v2318_v49 = vld [vmem:[#allocation17 + $0x1588] sm:$0xff]  ;;  %v2509_v20 = vadd.f32 %v5304_v60, %v2489_v59  ;;  %v2312_v14 = vld [vmem:[#allocation17 + $0x1558] sm:$0xff] }
 0x414   :  { %3356 = vmatpush.msrb.mxu3 %v2366_v16  ;;  %3576 = vmatpush.msra.mxu0 %v3405_v18  ;;  %v3387_v16 = vld [vmem:[#allocation20 + $0x50] sm:$0xff]  ;;  %v5347_v18 = vpop.f32.mrf.mxu3  ;;  %v2306_v60 = vld [vmem:[#allocation17 + $0x1528] sm:$0xff] }
 0x415   :  { %3596 = vmatpush.msra.mxu1 %v3437_v19  ;;  %3337 = vmatpush.msrb.mxu2 %v2264_v22  ;;  %v2629_v54 = vadd.f32 %v5318_v48, %v2609_v38  ;;  %v3389_v48 = vld [vmem:[#allocation20 + $0x60] sm:$0xff]  ;;  %v3419_v17 = vld [vmem:[#allocation20 + $0x150] sm:$0xff]  ;;  %v2529_v22 = vadd.f32 %v5308_v46, %v2509_v20  ;;  %v5352_v10 = vpop.f32.mrf.mxu2 }
 0x416   :  { %3357 = vmatpush.msrb.mxu3 %v2360_v23  ;;  %3577 = vmatpush.msra.mxu0 %v3403_v53  ;;  %v2210_v19 = vld [vmem:[#allocation17 + $0x1228] sm:$0xff]  ;;  %v5350_v23 = vpop.f32.mrf.mxu1  ;;  %v3503_v46 = vld [vmem:[#allocation20 + $0x3f0] sm:$0xff] }
 0x417   :  { %3597 = vmatpush.msra.mxu1 %v3435_v21  ;;  %3338 = vmatpush.msrb.mxu2 %v2258_v6  ;;  %v2649_v2 = vadd.f32 %v2648_v29, %v2629_v54  ;;  %v3417_v53 = vld [vmem:[#allocation20 + $0x140] sm:$0xff]  ;;  %v2401_v29 = vperm.slane %v5314_v1, 2  ;;  %v2402_v6 = vperm.slane %v5314_v1, 3 }
 0x418   :  { %3358 = vmatpush.msrb.mxu3 %v2354_v30  ;;  %3578 = vmatpush.msra.mxu0 %v3401_v40  ;;  %v3471_v30 = vld [vmem:[#allocation20 + $0x2f0] sm:$0xff]  ;;  %v2908_v39 = vpop.f32.mrf.mxu0  ;;  %v3377_v54 = vld [vmem:[#allocation20] sm:$0xff] }
 0x419   :  { %3598 = vmatpush.msra.mxu1 %v3433_v0  ;;  %3339 = vmatpush.msrb.mxu2 %v2252_v51  ;;  %v2669_v15 = vadd.f32 %v5321_v12, %v2649_v2  ;;  %v3385_v12 = vld [vmem:[#allocation20 + $0x40] sm:$0xff]  ;;  %v3383_v40 = vld [vmem:[#allocation20 + $0x30] sm:$0xff]  ;;  %v2549_v51 = vadd.f32 %v5310_v47, %v2529_v22 }
 0x41a   :  { %3359 = vmatpush.msrb.mxu3 %v2348_v28  ;;  %3579 = vmatpush.msra.mxu0 %v3399_v50  ;;  %v3415_v0 = vld [vmem:[#allocation20 + $0x130] sm:$0xff]  ;;  %v3381_v50 = vld [vmem:[#allocation20 + $0x20] sm:$0xff] }
 0x41b   :  { %3599 = vmatpush.msra.mxu1 %v3431_v32  ;;  %3340 = vmatpush.msrb.mxu2 %v2246_v34  ;;  %v2689_v21 = vadd.f32 %v5327_v26, %v2669_v15  ;;  %v3469_v26 = vld [vmem:[#allocation20 + $0x2e0] sm:$0xff]  ;;  %v2749_v34 = vadd.f32 %v5332_v33, %v2401_v29  ;;  %v3379_v47 = vld [vmem:[#allocation20 + $0x10] sm:$0xff]  ;;  %v5365_v38 = vadd.f32 %v5316_v3, %v2549_v51 }
 0x41c   :  { %3360 = vmatpush.msrb.mxu3 %v2342_v36  ;;  %3580 = vmatpush.msra.mxu0 %v3397_v41  ;;  %v3413_v32 = vld [vmem:[#allocation20 + $0x120] sm:$0xff]  ;;  %v2909_v36 = vadd.f32 %v2908_v39, %v2402_v6  ;;  %v5362_v37 = vpop.f32.mrf.mxu3  ;;  %v3463_v3 = vld [vmem:[#allocation20 + $0x2b0] sm:$0xff] }
 0x41d   :  { %3600 = vmatpush.msra.mxu1 %v3429_v42  ;;  %3341 = vmatpush.msrb.mxu2 %v2240_v24  ;;  %v2709_v28 = vadd.f32 %v5329_v27, %v2689_v21  ;;  %v3411_v27 = vld [vmem:[#allocation20 + $0x110] sm:$0xff]  ;;  %v3465_v33 = vld [vmem:[#allocation20 + $0x2c0] sm:$0xff] }
 0x41e   :  { %3361 = vmatpush.msrb.mxu3 %v2336_v43  ;;  %3581 = vmatpush.msra.mxu0 %v3395_v55  ;;  %v3497_v42 = vld [vmem:[#allocation20 + $0x3c0] sm:$0xff]  ;;  %v2928_v24 = vpop.f32.mrf.mxu1  ;;  %v2948_v43 = vpop.f32.mrf.mxu2  ;;  %v3459_v2 = vld [vmem:[#allocation20 + $0x290] sm:$0xff] }
 0x41f   :  { %3601 = vmatpush.msra.mxu1 %v3427_v56  ;;  %3342 = vmatpush.msrb.mxu2 %v2234_v25  ;;  %v5368_v41 = vadd.f32 %v5336_v57, %v2709_v28  ;;  %v3409_v55 = vld [vmem:[#allocation20 + $0x100] sm:$0xff]  ;;  %v2769_v56 = vadd.f32 %v5339_v52, %v2749_v34  ;;  %v2929_v25 = vadd.f32 %v2928_v24, %v2909_v36  ;;  %v3371_v57 = vmax.f32 %v5365_v38, 0.0  ;;  %v3535_v52 = vld [vmem:[#allocation20 + $0x4f0] sm:$0xff] }
 0x420   :  { %3362 = vmatpush.msrb.mxu3 %v2330_v58  ;;  %3582 = vmatpush.msra.mxu0 %v3393_v4  ;;  %v3495_v58 = vld [vmem:[#allocation20 + $0x3b0] sm:$0xff]  ;;  %v3457_v20 = vld [vmem:[#allocation20 + $0x280] sm:$0xff] }
 0x421   :  { %3602 = vmatpush.msra.mxu1 %v3425_v5  ;;  %3343 = vmatpush.msrb.mxu2 %v2228_v62  ;;  %v3372_v59 = vmax.f32 %v5368_v41, 0.0  ;;  %v2789_v4 = vadd.f32 %v5341_v45, %v2769_v56  ;;  %v2949_v5 = vadd.f32 %v2948_v43, %v2929_v25  ;;  %v3461_v62 = vld [vmem:[#allocation20 + $0x2a0] sm:$0xff]  ;;  %v3487_v15 = vld [vmem:[#allocation20 + $0x370] sm:$0xff]  ;;  %v3408_v43 = vld [vmem:[#allocation20 + $0xf8] sm:$0xff] }
 0x422   :  { %3363 = vmatpush.msrb.mxu3 %v2324_v11  ;;  %3583 = vmatpush.msra.mxu0 %v3391_v7  ;;  %v3493_v11 = vld [vmem:[#allocation20 + $0x3a0] sm:$0xff]  ;;  %v3491_v7 = vld [vmem:[#allocation20 + $0x390] sm:$0xff]  ;;  %v3438_v56 = vld [vmem:[#allocation20 + $0x1e8] sm:$0xff] }
 0x423   :  { %3603 = vmatpush.msra.mxu1 %v3423_v8  ;;  %3344 = vmatpush.msrb.mxu2 %v2222_v63  ;;  %v3533_v45 = vld [vmem:[#allocation20 + $0x4e0] sm:$0xff]  ;;  %v2809_v63 = vadd.f32 %v5347_v18, %v2789_v4  ;;  %v3527_v18 = vld [vmem:[#allocation20 + $0x4b0] sm:$0xff]  ;;  %v3448_v41 = vld [vmem:[#allocation20 + $0x238] sm:$0xff] }
 0x424   :  { %3364 = vmatpush.msrb.mxu3 %v2318_v49  ;;  %3584 = vmatpush.msra.mxu0 %v3389_v48  ;;  %v2968_v8 = vpop.f32.mrf.mxu3  ;;  %v3489_v48 = vld [vmem:[#allocation20 + $0x380] sm:$0xff]  ;;  %v3447_v28 = vld [vmem:[#allocation20 + $0x230] sm:$0xff] }
 0x425   :  { %3604 = vmatpush.msra.mxu1 %v3421_v13  ;;  %3345 = vmatpush.msrb.mxu2 %v2216_v44  ;;  %v2969_v49 = vadd.f32 %v2968_v8, %v2949_v5  ;;  %v2988_v13 = vpop.f32.mrf.mxu0  ;;  %v3531_v44 = vld [vmem:[#allocation20 + $0x4d0] sm:$0xff]  ;;  %v3485_v22 = vld [vmem:[#allocation20 + $0x360] sm:$0xff]  ;;  %v3402_v5 = vld [vmem:[#allocation20 + $0xc8] sm:$0xff] }
 0x426   :  { %3365 = vmatpush.msrb.mxu3 %v2312_v14  ;;  %3585 = vmatpush.msra.mxu0 %v3387_v16  ;;  %v3455_v14 = vld [vmem:[#allocation20 + $0x270] sm:$0xff]  ;;  %v3529_v16 = vld [vmem:[#allocation20 + $0x4c0] sm:$0xff]  ;;  %v3008_v21 = vpop.f32.mrf.mxu1  ;;  %v3028_v29 = vpop.f32.mrf.mxu2 }
 0x427   :  { %3605 = vmatpush.msra.mxu1 %v3419_v17  ;;  %3346 = vmatpush.msrb.mxu2 %v2210_v19  ;;  %v2829_v17 = vadd.f32 %v5343_v9, %v2809_v63  ;;  %v2989_v19 = vadd.f32 %v2988_v13, %v2969_v49  ;;  %v3525_v6 = vld [vmem:[#allocation20 + $0x4a0] sm:$0xff]  ;;  %v3519_v34 = vld [vmem:[#allocation20 + $0x470] sm:$0xff]  ;;  %v3398_v63 = vld [vmem:[#allocation20 + $0xa8] sm:$0xff] }
 0x428   :  { %3366 = vmatpush.msrb.mxu3 %v2306_v60  ;;  %3347 = vmatmul.f32.vlgmr.msrb.gmra.mxu2 %v5258_v35  ;;  %v3467_v35 = vld [vmem:[#allocation20 + $0x2d0] sm:$0xff]  ;;  %v3453_v60 = vld [vmem:[#allocation20 + $0x260] sm:$0xff]  ;;  %v3430_v49 = vld [vmem:[#allocation20 + $0x1a8] sm:$0xff] }
 0x429   :  { %3367 = vmatmul.f32.vlgmr.msrb.gmra.mxu3 %v5260_v61  ;;  %3586 = vmatpush.msra.mxu0 %v3385_v12  ;;  %v3499_v61 = vld [vmem:[#allocation20 + $0x3d0] sm:$0xff]  ;;  %v3449_v39 = vld [vmem:[#allocation20 + $0x240] sm:$0xff]  ;;  %v3428_v13 = vld [vmem:[#allocation20 + $0x198] sm:$0xff] }
 0x42a   :  { %3606 = vmatpush.msra.mxu1 %v3417_v53  ;;  %3615 = vmatpush.msra.mxu2 %v3471_v30  ;;  %v3451_v12 = vld [vmem:[#allocation20 + $0x250] sm:$0xff]  ;;  %v2849_v30 = vadd.f32 %v5350_v23, %v2829_v17  ;;  %v3481_v9 = vld [vmem:[#allocation20 + $0x340] sm:$0xff] }
 0x42b   :  { %3635 = vmatpush.msra.mxu3 %v3503_v46  ;;  %3587 = vmatpush.msra.mxu0 %v3383_v40  ;;  %v3483_v53 = vld [vmem:[#allocation20 + $0x350] sm:$0xff]  ;;  %v3009_v46 = vadd.f32 %v3008_v21, %v2989_v19  ;;  %v3513_v25 = vld [vmem:[#allocation20 + $0x440] sm:$0xff]  ;;  %v3422_v21 = vld [vmem:[#allocation20 + $0x168] sm:$0xff] }
 0x42c   :  { %3607 = vmatpush.msra.mxu1 %v3415_v0  ;;  %3616 = vmatpush.msra.mxu2 %v3469_v26  ;;  %v3523_v40 = vld [vmem:[#allocation20 + $0x490] sm:$0xff]  ;;  %v2869_v0 = vadd.f32 %v5352_v10, %v2849_v30  ;;  %v3048_v23 = vpop.f32.mrf.mxu3  ;;  %v3388_v30 = vld [vmem:[#allocation20 + $0x58] sm:$0xff]  ;;  %v3553_v38 = vld [vmem:[#allocation20 + $0x580] sm:$0xff] }
 0x42d   :  { %3636 = vmatpush.msra.mxu3 %v3501_v31  ;;  %3588 = vmatpush.msra.mxu0 %v3381_v50  ;;  %v3029_v51 = vadd.f32 %v3028_v29, %v3009_v46  ;;  %v3479_v26 = vld [vmem:[#allocation20 + $0x330] sm:$0xff]  ;;  %v3521_v31 = vld [vmem:[#allocation20 + $0x480] sm:$0xff]  ;;  %v3420_v46 = vld [vmem:[#allocation20 + $0x158] sm:$0xff] }
 0x42e   :  { %3608 = vmatpush.msra.mxu1 %v3413_v32  ;;  %3617 = vmatpush.msra.mxu2 %v3467_v35  ;;  %v3445_v50 = vld [vmem:[#allocation20 + $0x220] sm:$0xff]  ;;  %v5383_v36 = vadd.f32 %v5362_v37, %v2869_v0  ;;  %v3443_v10 = vld [vmem:[#allocation20 + $0x210] sm:$0xff]  ;;  %v3440_v37 = vld [vmem:[#allocation20 + $0x1f8] sm:$0xff]  ;;  %v3088_v17 = vpop.f32.mrf.mxu1 }
 0x42f   :  { %3637 = vmatpush.msra.mxu3 %v3499_v61  ;;  %3589 = vmatpush.msra.mxu0 %v3379_v47  ;;  %v3477_v32 = vld [vmem:[#allocation20 + $0x320] sm:$0xff]  ;;  %v5385_v35 = vadd.f32 %v3048_v23, %v3029_v51  ;;  %v3475_v61 = vld [vmem:[#allocation20 + $0x310] sm:$0xff]  ;;  %v3418_v0 = vld [vmem:[#allocation20 + $0x148] sm:$0xff] }
 0x430   :  { %3609 = vmatpush.msra.mxu1 %v3411_v27  ;;  %3618 = vmatpush.msra.mxu2 %v3465_v33  ;;  %v3517_v47 = vld [vmem:[#allocation20 + $0x460] sm:$0xff]  ;;  %v3511_v4 = vld [vmem:[#allocation20 + $0x430] sm:$0xff]  ;;  %v3460_v23 = vld [vmem:[#allocation20 + $0x298] sm:$0xff] }
 0x431   :  { %3638 = vmatpush.msra.mxu3 %v3497_v42  ;;  %3590 = vmatpush.msra.mxu0 %v3377_v54  ;;  %v3441_v27 = vld [vmem:[#allocation20 + $0x200] sm:$0xff]  ;;  %v3373_v42 = vmax.f32 %v5383_v36, 0.0  ;;  %v3374_v24 = vmax.f32 %v5385_v35, 0.0  ;;  %v3515_v54 = vld [vmem:[#allocation20 + $0x450] sm:$0xff]  ;;  %v3504_v36 = vld [vmem:[#allocation20 + $0x3f8] sm:$0xff] }
 0x432   :  { %3610 = vmatpush.msra.mxu1 %v3409_v55  ;;  %3619 = vmatpush.msra.mxu2 %v3463_v3  ;;  %v3473_v33 = vld [vmem:[#allocation20 + $0x300] sm:$0xff]  ;;  %v3406_v55 = vld [vmem:[#allocation20 + $0xe8] sm:$0xff]  ;;  %v3404_v3 = vld [vmem:[#allocation20 + $0xd8] sm:$0xff] }
 0x433   :  { %3639 = vmatpush.msra.mxu3 %v3495_v58  ;;  %3591 = vmatmul.f32.vlgmr.msra.gmra.mxu0 %v3371_v57  ;;  %v3436_v58 = vld [vmem:[#allocation20 + $0x1d8] sm:$0xff]  ;;  %v3507_v8 = vld [vmem:[#allocation20 + $0x410] sm:$0xff] }
 0x434   :  { %3611 = vmatmul.f32.vlgmr.msra.gmra.mxu1 %v3372_v59  ;;  %3620 = vmatpush.msra.mxu2 %v3461_v62  ;;  %v3434_v62 = vld [vmem:[#allocation20 + $0x1c8] sm:$0xff]  ;;  %v3840_v35 = vld [vmem:[#allocation23 + $0xb8] sm:$0xff] }
 0x435   :  { %3640 = vmatpush.msra.mxu3 %v3493_v11  ;;  %3655 = vmatpush.msrb.mxu0 %v3535_v52  ;;  %v3509_v11 = vld [vmem:[#allocation20 + $0x420] sm:$0xff]  ;;  %v3400_v52 = vld [vmem:[#allocation20 + $0xb8] sm:$0xff] }
 0x436   :  { %3621 = vmatpush.msra.mxu2 %v3459_v2  ;;  %v3432_v2 = vld [vmem:[#allocation20 + $0x1b8] sm:$0xff] }
 0x437   :  { %3641 = vmatpush.msra.mxu3 %v3491_v7  ;;  %3656 = vmatpush.msrb.mxu0 %v3533_v45  ;;  %v2403_v7 = vperm.slane %v5314_v1, 4  ;;  %v3068_v45 = vpop.f32.mrf.mxu0  ;;  %v3470_v1 = vld [vmem:[#allocation20 + $0x2e8] sm:$0xff] }
 0x438   :  { %3622 = vmatpush.msra.mxu2 %v3457_v20  ;;  %v3505_v20 = vld [vmem:[#allocation20 + $0x400] sm:$0xff] }
 0x439   :  { %3642 = vmatpush.msra.mxu3 %v3489_v48  ;;  %3657 = vmatpush.msrb.mxu0 %v3531_v44  ;;  %v3396_v48 = vld [vmem:[#allocation20 + $0x98] sm:$0xff]  ;;  %v3069_v44 = vadd.f32 %v3068_v45, %v2403_v7  ;;  %v3557_v45 = vld [vmem:[#allocation20 + $0x5a0] sm:$0xff] }
 0x43a   :  { %3623 = vmatpush.msra.mxu2 %v3455_v14  ;;  %v3472_v14 = vld [vmem:[#allocation20 + $0x2f8] sm:$0xff] }
 0x43b   :  { %3643 = vmatpush.msra.mxu3 %v3487_v15  ;;  %3658 = vmatpush.msrb.mxu0 %v3529_v16  ;;  %v3394_v15 = vld [vmem:[#allocation20 + $0x88] sm:$0xff] }
 0x43c   :  { %3624 = vmatpush.msra.mxu2 %v3453_v60  ;;  %v3426_v16 = vld [vmem:[#allocation20 + $0x188] sm:$0xff]  ;;  %v3392_v60 = vld [vmem:[#allocation20 + $0x78] sm:$0xff] }
 0x43d   :  { %3644 = vmatpush.msra.mxu3 %v3485_v22  ;;  %3659 = vmatpush.msrb.mxu0 %v3527_v18  ;;  %v3424_v22 = vld [vmem:[#allocation20 + $0x178] sm:$0xff]  ;;  %v3089_v18 = vadd.f32 %v3088_v17, %v3069_v44 }
 0x43e   :  { %3625 = vmatpush.msra.mxu2 %v3451_v12  ;;  %v3468_v12 = vld [vmem:[#allocation20 + $0x2d8] sm:$0xff] }
 0x43f   :  { %3645 = vmatpush.msra.mxu3 %v3483_v53  ;;  %3660 = vmatpush.msrb.mxu0 %v3525_v6  ;;  %v3390_v53 = vld [vmem:[#allocation20 + $0x68] sm:$0xff]  ;;  %v3528_v44 = vld [vmem:[#allocation20 + $0x4b8] sm:$0xff] }
 0x440   :  { %3626 = vmatpush.msra.mxu2 %v3449_v39  ;;  %v3466_v6 = vld [vmem:[#allocation20 + $0x2c8] sm:$0xff]  ;;  %v3464_v39 = vld [vmem:[#allocation20 + $0x2b8] sm:$0xff] }
 0x441   :  { %3646 = vmatpush.msra.mxu3 %v3481_v9  ;;  %3661 = vmatpush.msrb.mxu0 %v3523_v40  ;;  %v3386_v40 = vld [vmem:[#allocation20 + $0x48] sm:$0xff]  ;;  %v3568_v17 = vld [vmem:[#allocation20 + $0x5f8] sm:$0xff] }
 0x442   :  { %3627 = vmatpush.msra.mxu2 %v3447_v28  ;;  %v3462_v28 = vld [vmem:[#allocation20 + $0x2a8] sm:$0xff] }
 0x443   :  { %3647 = vmatpush.msra.mxu3 %v3479_v26  ;;  %3662 = vmatpush.msrb.mxu0 %v3521_v31  ;;  %v3567_v26 = vld [vmem:[#allocation20 + $0x5f0] sm:$0xff] }
 0x444   :  { %3628 = vmatpush.msra.mxu2 %v3445_v50  ;;  %v3384_v50 = vld [vmem:[#allocation20 + $0x38] sm:$0xff]  ;;  %3675 = vmatpush.msrb.mxu1 %v3567_v26  ;;  %v3514_v26 = vld [vmem:[#allocation20 + $0x448] sm:$0xff] }
 0x445   :  { %3648 = vmatpush.msra.mxu3 %v3477_v32  ;;  %3663 = vmatpush.msrb.mxu0 %v3519_v34  ;;  %v3108_v19 = vpop.f32.mrf.mxu2  ;;  %v3416_v32 = vld [vmem:[#allocation20 + $0x138] sm:$0xff]  ;;  %v3565_v34 = vld [vmem:[#allocation20 + $0x5e0] sm:$0xff] }
 0x446   :  { %3629 = vmatpush.msra.mxu2 %v3443_v10  ;;  %v3109_v29 = vadd.f32 %v3108_v19, %v3089_v18  ;;  %v3128_v9 = vpop.f32.mrf.mxu3  ;;  %v3382_v10 = vld [vmem:[#allocation20 + $0x28] sm:$0xff]  ;;  %3676 = vmatpush.msrb.mxu1 %v3565_v34  ;;  %v3547_v19 = vld [vmem:[#allocation20 + $0x550] sm:$0xff]  ;;  %v3500_v34 = vld [vmem:[#allocation20 + $0x3d8] sm:$0xff] }
 0x447   :  { %3649 = vmatpush.msra.mxu3 %v3475_v61  ;;  %3664 = vmatpush.msrb.mxu0 %v3517_v47  ;;  %v3414_v61 = vld [vmem:[#allocation20 + $0x128] sm:$0xff] }
 0x448   :  { %3630 = vmatpush.msra.mxu2 %v3441_v27  ;;  %v3129_v51 = vadd.f32 %v3128_v9, %v3109_v29  ;;  %v3458_v27 = vld [vmem:[#allocation20 + $0x288] sm:$0xff]  ;;  %v3543_v29 = vld [vmem:[#allocation20 + $0x530] sm:$0xff]  ;;  %v3560_v9 = vld [vmem:[#allocation20 + $0x5b8] sm:$0xff] }
 0x449   :  { %3650 = vmatpush.msra.mxu3 %v3473_v33  ;;  %3631 = vmatmul.f32.vlgmr.msra.gmra.mxu2 %v3373_v42  ;;  %v3563_v33 = vld [vmem:[#allocation20 + $0x5d0] sm:$0xff]  ;;  %v3442_v18 = vld [vmem:[#allocation20 + $0x208] sm:$0xff] }
 0x44a   :  { %3651 = vmatmul.f32.vlgmr.msra.gmra.mxu3 %v3374_v24  ;;  %3695 = vmatpush.msrb.mxu2 %v3408_v43  ;;  %v3148_v31 = vpop.f32.mrf.mxu0  ;;  %v3380_v43 = vld [vmem:[#allocation20 + $0x18] sm:$0xff] }
 0x44b   :  { %3715 = vmatpush.msrb.mxu3 %v3440_v37  ;;  %3665 = vmatpush.msrb.mxu0 %v3515_v54  ;;  %v3149_v47 = vadd.f32 %v3148_v31, %v3129_v51  ;;  %v3412_v37 = vld [vmem:[#allocation20 + $0x118] sm:$0xff]  ;;  %v3558_v51 = vld [vmem:[#allocation20 + $0x5a8] sm:$0xff] }
 0x44c   :  { %3696 = vmatpush.msrb.mxu2 %v3406_v55  ;;  %3677 = vmatpush.msrb.mxu1 %v3563_v33  ;;  %v3456_v54 = vld [vmem:[#allocation20 + $0x278] sm:$0xff]  ;;  %v3561_v55 = vld [vmem:[#allocation20 + $0x5c0] sm:$0xff]  ;;  %v3506_v33 = vld [vmem:[#allocation20 + $0x408] sm:$0xff] }
 0x44d   :  { %3716 = vmatpush.msrb.mxu3 %v3438_v56  ;;  %3666 = vmatpush.msrb.mxu0 %v3513_v25  ;;  %v3168_v56 = vpop.f32.mrf.mxu1  ;;  %v3378_v25 = vld [vmem:[#allocation20 + $0x8] sm:$0xff]  ;;  %v3512_v31 = vld [vmem:[#allocation20 + $0x438] sm:$0xff] }
 0x44e   :  { %3697 = vmatpush.msrb.mxu2 %v3404_v3  ;;  %v3410_v3 = vld [vmem:[#allocation20 + $0x108] sm:$0xff]  ;;  %3678 = vmatpush.msrb.mxu1 %v3561_v55 }
 0x44f   :  { %3717 = vmatpush.msrb.mxu3 %v3436_v58  ;;  %3667 = vmatpush.msrb.mxu0 %v3511_v4  ;;  %v3169_v58 = vadd.f32 %v3168_v56, %v3149_v47  ;;  %v3559_v4 = vld [vmem:[#allocation20 + $0x5b0] sm:$0xff]  ;;  %v3498_v47 = vld [vmem:[#allocation20 + $0x3c8] sm:$0xff]  ;;  %v3492_v56 = vld [vmem:[#allocation20 + $0x398] sm:$0xff] }
 0x450   :  { %3698 = vmatpush.msrb.mxu2 %v3402_v5  ;;  %v3536_v5 = vld [vmem:[#allocation20 + $0x4f8] sm:$0xff]  ;;  %3679 = vmatpush.msrb.mxu1 %v3559_v4  ;;  %v3546_v55 = vld [vmem:[#allocation20 + $0x548] sm:$0xff] }
 0x451   :  { %3718 = vmatpush.msrb.mxu3 %v3434_v62  ;;  %3668 = vmatpush.msrb.mxu0 %v3509_v11  ;;  %v3454_v11 = vld [vmem:[#allocation20 + $0x268] sm:$0xff] }
 0x452   :  { %3699 = vmatpush.msrb.mxu2 %v3400_v52  ;;  %3680 = vmatpush.msrb.mxu1 %v3557_v45  ;;  %v3486_v4 = vld [vmem:[#allocation20 + $0x368] sm:$0xff] }
 0x453   :  { %3719 = vmatpush.msrb.mxu3 %v3432_v2  ;;  %3669 = vmatpush.msrb.mxu0 %v3507_v8  ;;  %v3534_v2 = vld [vmem:[#allocation20 + $0x4e8] sm:$0xff]  ;;  %v3452_v8 = vld [vmem:[#allocation20 + $0x258] sm:$0xff] }
 0x454   :  { %3700 = vmatpush.msrb.mxu2 %v3398_v63 }
 0x455   :  { %3720 = vmatpush.msrb.mxu3 %v3430_v49  ;;  %3670 = vmatpush.msrb.mxu0 %v3505_v20  ;;  %v3555_v49 = vld [vmem:[#allocation20 + $0x590] sm:$0xff]  ;;  %v3532_v20 = vld [vmem:[#allocation20 + $0x4d8] sm:$0xff] }
 0x456   :  { %3701 = vmatpush.msrb.mxu2 %v3396_v48  ;;  %v3450_v48 = vld [vmem:[#allocation20 + $0x248] sm:$0xff]  ;;  %3681 = vmatpush.msrb.mxu1 %v3555_v49 }
 0x457   :  { %3721 = vmatpush.msrb.mxu3 %v3428_v13  ;;  %3735 = vmatpush.msra.mxu0 %v3472_v14  ;;  %v3446_v14 = vld [vmem:[#allocation20 + $0x228] sm:$0xff] }
 0x458   :  { %3702 = vmatpush.msrb.mxu2 %v3394_v15  ;;  %3682 = vmatpush.msrb.mxu1 %v3553_v38  ;;  %v3549_v15 = vld [vmem:[#allocation20 + $0x560] sm:$0xff]  ;;  %v3478_v49 = vld [vmem:[#allocation20 + $0x328] sm:$0xff] }
 0x459   :  { %3722 = vmatpush.msrb.mxu3 %v3426_v16  ;;  %3736 = vmatpush.msra.mxu0 %v3470_v1  ;;  %v3526_v16 = vld [vmem:[#allocation20 + $0x4a8] sm:$0xff]  ;;  %v3444_v1 = vld [vmem:[#allocation20 + $0x218] sm:$0xff] }
 0x45a   :  { %3703 = vmatpush.msrb.mxu2 %v3392_v60  ;;  %v3566_v60 = vld [vmem:[#allocation20 + $0x5e8] sm:$0xff] }
 0x45b   :  { %3723 = vmatpush.msrb.mxu3 %v3424_v22  ;;  %3737 = vmatpush.msra.mxu0 %v3468_v12  ;;  %v3524_v22 = vld [vmem:[#allocation20 + $0x498] sm:$0xff]  ;;  %v3545_v12 = vld [vmem:[#allocation20 + $0x540] sm:$0xff] }
 0x45c   :  { %3704 = vmatpush.msrb.mxu2 %v3390_v53  ;;  %v3522_v53 = vld [vmem:[#allocation20 + $0x488] sm:$0xff] }
 0x45d   :  { %3724 = vmatpush.msrb.mxu3 %v3422_v21  ;;  %3738 = vmatpush.msra.mxu0 %v3466_v6  ;;  %v3564_v21 = vld [vmem:[#allocation20 + $0x5d8] sm:$0xff] }
 0x45e   :  { %3705 = vmatpush.msrb.mxu2 %v3388_v30  ;;  %v3520_v6 = vld [vmem:[#allocation20 + $0x478] sm:$0xff]  ;;  %v3562_v30 = vld [vmem:[#allocation20 + $0x5c8] sm:$0xff] }
 0x45f   :  { %3725 = vmatpush.msrb.mxu3 %v3420_v46  ;;  %3739 = vmatpush.msra.mxu0 %v3464_v39  ;;  %v3541_v46 = vld [vmem:[#allocation20 + $0x520] sm:$0xff]  ;;  %v3518_v39 = vld [vmem:[#allocation20 + $0x468] sm:$0xff] }
 0x460   :  { %3706 = vmatpush.msrb.mxu2 %v3386_v40  ;;  %v3539_v40 = vld [vmem:[#allocation20 + $0x510] sm:$0xff] }
 0x461   :  { %3726 = vmatpush.msrb.mxu3 %v3418_v0  ;;  %3740 = vmatpush.msra.mxu0 %v3462_v28  ;;  %v3516_v0 = vld [vmem:[#allocation20 + $0x458] sm:$0xff]  ;;  %v3537_v28 = vld [vmem:[#allocation20 + $0x500] sm:$0xff] }
 0x462   :  { %3707 = vmatpush.msrb.mxu2 %v3384_v50  ;;  %v3502_v50 = vld [vmem:[#allocation20 + $0x3e8] sm:$0xff] }
 0x463   :  { %3727 = vmatpush.msrb.mxu3 %v3416_v32  ;;  %3741 = vmatpush.msra.mxu0 %v3460_v23  ;;  %v3554_v32 = vld [vmem:[#allocation20 + $0x588] sm:$0xff] }
 0x464   :  { %3708 = vmatpush.msrb.mxu2 %v3382_v10  ;;  %v3510_v23 = vld [vmem:[#allocation20 + $0x428] sm:$0xff]  ;;  %v3552_v10 = vld [vmem:[#allocation20 + $0x578] sm:$0xff] }
 0x465   :  { %3728 = vmatpush.msrb.mxu3 %v3414_v61  ;;  %3742 = vmatpush.msra.mxu0 %v3458_v27  ;;  %v3508_v61 = vld [vmem:[#allocation20 + $0x418] sm:$0xff]  ;;  %v3550_v27 = vld [vmem:[#allocation20 + $0x568] sm:$0xff] }
 0x466   :  { %3709 = vmatpush.msrb.mxu2 %v3380_v43  ;;  %v3496_v43 = vld [vmem:[#allocation20 + $0x3b8] sm:$0xff] }
 0x467   :  { %3729 = vmatpush.msrb.mxu3 %v3412_v37  ;;  %v3188_v62 = vpop.f32.mrf.mxu2  ;;  %3743 = vmatpush.msra.mxu0 %v3456_v54  ;;  %v3548_v37 = vld [vmem:[#allocation20 + $0x558] sm:$0xff]  ;;  %v3494_v54 = vld [vmem:[#allocation20 + $0x3a8] sm:$0xff] }
 0x468   :  { %3710 = vmatpush.msrb.mxu2 %v3378_v25  ;;  %v3189_v52 = vadd.f32 %v3188_v62, %v3169_v58  ;;  %v3208_v7 = vpop.f32.mrf.mxu3  ;;  %v3490_v25 = vld [vmem:[#allocation20 + $0x388] sm:$0xff]  ;;  %v3544_v58 = vld [vmem:[#allocation20 + $0x538] sm:$0xff] }
 0x469   :  { %3730 = vmatpush.msrb.mxu3 %v3410_v3  ;;  %3711 = vmatmul.f32.vlgmr.msrb.gmra.mxu2 %v3371_v57  ;;  %v3530_v57 = vld [vmem:[#allocation20 + $0x4c8] sm:$0xff]  ;;  %v3488_v3 = vld [vmem:[#allocation20 + $0x378] sm:$0xff] }
 0x46a   :  { %3731 = vmatmul.f32.vlgmr.msrb.gmra.mxu3 %v3372_v59  ;;  %3775 = vmatpush.msra.mxu2 %v3536_v5  ;;  %v5398_v63 = vadd.f32 %v3208_v7, %v3189_v52  ;;  %v3551_v59 = vld [vmem:[#allocation20 + $0x570] sm:$0xff]  ;;  %v3542_v5 = vld [vmem:[#allocation20 + $0x528] sm:$0xff]  ;;  %v3484_v62 = vld [vmem:[#allocation20 + $0x358] sm:$0xff] }
 0x46b   :  { %3744 = vmatpush.msra.mxu0 %v3454_v11  ;;  %3683 = vmatpush.msrb.mxu1 %v3551_v59  ;;  %v3540_v11 = vld [vmem:[#allocation20 + $0x518] sm:$0xff]  ;;  %v3482_v52 = vld [vmem:[#allocation20 + $0x348] sm:$0xff] }
 0x46c   :  { %3776 = vmatpush.msra.mxu2 %v3534_v2  ;;  %v3375_v13 = vmax.f32 %v5398_v63, 0.0  ;;  %3795 = vmatpush.msra.mxu3 %v3568_v17  ;;  %v3538_v2 = vld [vmem:[#allocation20 + $0x508] sm:$0xff]  ;;  %v4206_v7 = vld [vmem:[#allocation19] sm:$0x3f]  ;;  %v3228_v45 = vpop.f32.mrf.mxu0 }
 0x46d   :  { %3745 = vmatpush.msra.mxu0 %v3452_v8  ;;  %3684 = vmatpush.msrb.mxu1 %v3549_v15  ;;  %v2404_v8 = vperm.slane %v4206_v7, 5  ;;  %v3480_v63 = vld [vmem:[#allocation20 + $0x338] sm:$0xff]  ;;  %v3865_v7 = vld [vmem:[#allocation23 + $0x180] sm:$0xff] }
 0x46e   :  { %3777 = vmatpush.msra.mxu2 %v3532_v20  ;;  %3671 = vmatmul.f32.vlgmr.msrb.gmra.mxu0 %v3375_v13 }
 0x46f   :  { %3746 = vmatpush.msra.mxu0 %v3450_v48  ;;  %3685 = vmatpush.msrb.mxu1 %v3547_v19  ;;  %v3229_v20 = vadd.f32 %v3228_v45, %v2404_v8  ;;  %v3476_v48 = vld [vmem:[#allocation20 + $0x318] sm:$0xff]  ;;  %v3822_v8 = vld [vmem:[#allocation23 + $0x28] sm:$0xff] }
 0x470   :  { %3778 = vmatpush.msra.mxu2 %v3530_v57  ;;  %3796 = vmatpush.msra.mxu3 %v3566_v60  ;;  %v3474_v57 = vld [vmem:[#allocation20 + $0x308] sm:$0xff] }
 0x471   :  { %3747 = vmatpush.msra.mxu0 %v3448_v41  ;;  %3686 = vmatpush.msrb.mxu1 %v3545_v12  ;;  %v3866_v45 = vld [vmem:[#allocation23 + $0x188] sm:$0xff] }
 0x472   :  { %3779 = vmatpush.msra.mxu2 %v3528_v44  ;;  %3797 = vmatpush.msra.mxu3 %v3564_v21  ;;  %v3848_v21 = vld [vmem:[#allocation23 + $0xf8] sm:$0xff] }
 0x473   :  { %3748 = vmatpush.msra.mxu0 %v3446_v14  ;;  %3687 = vmatpush.msrb.mxu1 %v3543_v29  ;;  %v3845_v29 = vld [vmem:[#allocation23 + $0xe0] sm:$0xff] }
 0x474   :  { %3780 = vmatpush.msra.mxu2 %v3526_v16  ;;  %3798 = vmatpush.msra.mxu3 %v3562_v30  ;;  %v3843_v30 = vld [vmem:[#allocation23 + $0xd0] sm:$0xff] }
 0x475   :  { %3749 = vmatpush.msra.mxu0 %v3444_v1  ;;  %3688 = vmatpush.msrb.mxu1 %v3541_v46  ;;  %v3844_v46 = vld [vmem:[#allocation23 + $0xd8] sm:$0xff] }
 0x476   :  { %3781 = vmatpush.msra.mxu2 %v3524_v22  ;;  %3799 = vmatpush.msra.mxu3 %v3560_v9  ;;  %v3842_v9 = vld [vmem:[#allocation23 + $0xc8] sm:$0xff] }
 0x477   :  { %3750 = vmatpush.msra.mxu0 %v3442_v18  ;;  %3689 = vmatpush.msrb.mxu1 %v3539_v40  ;;  %v3879_v40 = vld [vmem:[#allocation23 + $0x1f0] sm:$0xff] }
 0x478   :  { %3751 = vmatmul.f32.vlgmr.msra.gmra.mxu0 %v3373_v42  ;;  %3782 = vmatpush.msra.mxu2 %v3522_v53  ;;  %v3556_v42 = vld [vmem:[#allocation20 + $0x598] sm:$0xff] }
 0x479   :  { %3800 = vmatpush.msra.mxu3 %v3558_v51  ;;  %3690 = vmatpush.msrb.mxu1 %v3537_v28  ;;  %v3847_v53 = vld [vmem:[#allocation23 + $0xf0] sm:$0xff]  ;;  %v3877_v51 = vld [vmem:[#allocation23 + $0x1e0] sm:$0xff] }
 0x47a   :  { %3783 = vmatpush.msra.mxu2 %v3520_v6  ;;  %3887 = vmatpush.msrb.mxu0 %v3847_v53  ;;  %v3846_v6 = vld [vmem:[#allocation23 + $0xe8] sm:$0xff]  ;;  %v3839_v28 = vld [vmem:[#allocation23 + $0xb0] sm:$0xff]  ;;  %v3852_v53 = vld [vmem:[#allocation23 + $0x118] sm:$0xff] }
 0x47b   :  { %3755 = vmatpush.msra.mxu1 %v3504_v36  ;;  %3801 = vmatpush.msra.mxu3 %v3556_v42  ;;  %v3876_v36 = vld [vmem:[#allocation23 + $0x1d8] sm:$0xff]  ;;  %v3837_v42 = vld [vmem:[#allocation23 + $0xa0] sm:$0xff] }
 0x47c   :  { %3784 = vmatpush.msra.mxu2 %v3518_v39  ;;  %3888 = vmatpush.msrb.mxu0 %v3845_v29  ;;  %v3841_v39 = vld [vmem:[#allocation23 + $0xc0] sm:$0xff] }
 0x47d   :  { %3756 = vmatpush.msra.mxu1 %v3502_v50  ;;  %3802 = vmatpush.msra.mxu3 %v3554_v32  ;;  %v3873_v50 = vld [vmem:[#allocation23 + $0x1c0] sm:$0xff]  ;;  %v3874_v32 = vld [vmem:[#allocation23 + $0x1c8] sm:$0xff] }
 0x47e   :  { %3785 = vmatpush.msra.mxu2 %v3516_v0  ;;  %3889 = vmatpush.msrb.mxu0 %v3843_v30  ;;  %v3880_v0 = vld [vmem:[#allocation23 + $0x1f8] sm:$0xff]  ;;  %v3850_v30 = vld [vmem:[#allocation23 + $0x108] sm:$0xff] }
 0x47f   :  { %3757 = vmatpush.msra.mxu1 %v3500_v34  ;;  %3803 = vmatpush.msra.mxu3 %v3552_v10  ;;  %v3836_v34 = vld [vmem:[#allocation23 + $0x98] sm:$0xff]  ;;  %v3871_v10 = vld [vmem:[#allocation23 + $0x1b0] sm:$0xff] }
 0x480   :  { %3786 = vmatpush.msra.mxu2 %v3514_v26  ;;  %3890 = vmatpush.msrb.mxu0 %v3841_v39  ;;  %v3875_v26 = vld [vmem:[#allocation23 + $0x1d0] sm:$0xff]  ;;  %v3984_v29 = vld [vmem:[#allocation26 + $0x78] sm:$0xff] }
 0x481   :  { %3758 = vmatpush.msra.mxu1 %v3498_v47  ;;  %3804 = vmatpush.msra.mxu3 %v3550_v27  ;;  %v3833_v47 = vld [vmem:[#allocation23 + $0x80] sm:$0xff]  ;;  %v3834_v27 = vld [vmem:[#allocation23 + $0x88] sm:$0xff] }
 0x482   :  { %3787 = vmatpush.msra.mxu2 %v3512_v31  ;;  %v3838_v31 = vld [vmem:[#allocation23 + $0xa8] sm:$0xff]  ;;  %3891 = vmatpush.msrb.mxu0 %v3839_v28 }
 0x483   :  { %3759 = vmatpush.msra.mxu1 %v3496_v43  ;;  %3805 = vmatpush.msra.mxu3 %v3548_v37  ;;  %v3870_v43 = vld [vmem:[#allocation23 + $0x1a8] sm:$0xff]  ;;  %v3831_v37 = vld [vmem:[#allocation23 + $0x70] sm:$0xff] }
 0x484   :  { %3788 = vmatpush.msra.mxu2 %v3510_v23  ;;  %v3835_v23 = vld [vmem:[#allocation23 + $0x90] sm:$0xff]  ;;  %3892 = vmatpush.msrb.mxu0 %v3837_v42 }
 0x485   :  { %3760 = vmatpush.msra.mxu1 %v3494_v54  ;;  %3806 = vmatpush.msra.mxu3 %v3546_v55  ;;  %v3832_v54 = vld [vmem:[#allocation23 + $0x78] sm:$0xff]  ;;  %v3867_v55 = vld [vmem:[#allocation23 + $0x190] sm:$0xff] }
 0x486   :  { %3789 = vmatpush.msra.mxu2 %v3508_v61  ;;  %v3872_v61 = vld [vmem:[#allocation23 + $0x1b8] sm:$0xff]  ;;  %3893 = vmatpush.msrb.mxu0 %v3835_v23 }
 0x487   :  { %3761 = vmatpush.msra.mxu1 %v3492_v56  ;;  %3807 = vmatpush.msra.mxu3 %v3544_v58  ;;  %v3868_v56 = vld [vmem:[#allocation23 + $0x198] sm:$0xff]  ;;  %v3827_v58 = vld [vmem:[#allocation23 + $0x50] sm:$0xff] }
 0x488   :  { %3790 = vmatpush.msra.mxu2 %v3506_v33  ;;  %v3869_v33 = vld [vmem:[#allocation23 + $0x1a0] sm:$0xff]  ;;  %3894 = vmatpush.msrb.mxu0 %v3833_v47 }
 0x489   :  { %3791 = vmatmul.f32.vlgmr.msra.gmra.mxu2 %v3375_v13  ;;  %3762 = vmatpush.msra.mxu1 %v3490_v25  ;;  %v3248_v13 = vpop.f32.mrf.mxu1  ;;  %v3268_v38 = vpop.f32.mrf.mxu2  ;;  %v3829_v25 = vld [vmem:[#allocation23 + $0x60] sm:$0xff] }
 0x48a   :  { %3808 = vmatpush.msra.mxu3 %v3542_v5  ;;  %v3249_v41 = vadd.f32 %v3248_v13, %v3229_v20  ;;  %v3288_v44 = vpop.f32.mrf.mxu3  ;;  %3927 = vmatpush.msrb.mxu2 %v3848_v21  ;;  %v3825_v5 = vld [vmem:[#allocation23 + $0x40] sm:$0xff]  ;;  %v3820_v20 = vld [vmem:[#allocation23 + $0x18] sm:$0xff] }
 0x48b   :  { %3763 = vmatpush.msra.mxu1 %v3488_v3  ;;  %v3830_v3 = vld [vmem:[#allocation23 + $0x68] sm:$0xff]  ;;  %3895 = vmatpush.msrb.mxu0 %v3831_v37  ;;  %v3817_v13 = vld [vmem:[#allocation23] sm:$0xff] }
 0x48c   :  { %3809 = vmatpush.msra.mxu3 %v3540_v11  ;;  %v3269_v59 = vadd.f32 %v3268_v38, %v3249_v41  ;;  %3928 = vmatpush.msrb.mxu2 %v3846_v6  ;;  %v3823_v11 = vld [vmem:[#allocation23 + $0x30] sm:$0xff]  ;;  %v3861_v38 = vld [vmem:[#allocation23 + $0x160] sm:$0xff]  ;;  %v3862_v41 = vld [vmem:[#allocation23 + $0x168] sm:$0xff] }
 0x48d   :  { %3764 = vmatpush.msra.mxu1 %v3486_v4  ;;  %v3828_v4 = vld [vmem:[#allocation23 + $0x58] sm:$0xff]  ;;  %3896 = vmatpush.msrb.mxu0 %v3829_v25  ;;  %v3849_v21 = vld [vmem:[#allocation23 + $0x100] sm:$0xff] }
 0x48e   :  { %3810 = vmatpush.msra.mxu3 %v3538_v2  ;;  %v3289_v14 = vadd.f32 %v3288_v44, %v3269_v59  ;;  %v3308_v15 = vpop.f32.mrf.mxu0  ;;  %3929 = vmatpush.msrb.mxu2 %v3844_v46  ;;  %v3821_v2 = vld [vmem:[#allocation23 + $0x20] sm:$0xff]  ;;  %v3859_v59 = vld [vmem:[#allocation23 + $0x150] sm:$0xff]  ;;  %v3860_v44 = vld [vmem:[#allocation23 + $0x158] sm:$0xff] }
 0x48f   :  { %3765 = vmatpush.msra.mxu1 %v3484_v62  ;;  %v3826_v62 = vld [vmem:[#allocation23 + $0x48] sm:$0xff]  ;;  %3897 = vmatpush.msrb.mxu0 %v3827_v58  ;;  %v3983_v6 = vld [vmem:[#allocation26 + $0x70] sm:$0xff]  ;;  %v4000_v46 = vld [vmem:[#allocation26 + $0xf8] sm:$0xff] }
 0x490   :  { %v3309_v16 = vadd.f32 %v3308_v15, %v3289_v14  ;;  %3947 = vmatpush.msrb.mxu3 %v3880_v0  ;;  %3930 = vmatpush.msrb.mxu2 %v3842_v9  ;;  %v3857_v14 = vld [vmem:[#allocation23 + $0x140] sm:$0xff]  ;;  %v3858_v15 = vld [vmem:[#allocation23 + $0x148] sm:$0xff] }
 0x491   :  { %3766 = vmatpush.msra.mxu1 %v3482_v52  ;;  %v3328_v1 = vpop.f32.mrf.mxu1  ;;  %v3824_v52 = vld [vmem:[#allocation23 + $0x38] sm:$0xff]  ;;  %3898 = vmatpush.msrb.mxu0 %v3825_v5  ;;  %v3982_v9 = vld [vmem:[#allocation26 + $0x68] sm:$0xff]  ;;  %v3981_v0 = vld [vmem:[#allocation26 + $0x60] sm:$0xff] }
 0x492   :  { %v3329_v17 = vadd.f32 %v3328_v1, %v3309_v16  ;;  %3931 = vmatpush.msrb.mxu2 %v3840_v35  ;;  %v3569_v16 = vld [vmem:[#allocation22] sm:$0x3]  ;;  %v3855_v1 = vld [vmem:[#allocation23 + $0x130] sm:$0xff] }
 0x493   :  { %3767 = vmatpush.msra.mxu1 %v3480_v63  ;;  %3899 = vmatpush.msrb.mxu0 %v3823_v11  ;;  %v3819_v63 = vld [vmem:[#allocation23 + $0x10] sm:$0xff] }
 0x494   :  { %3932 = vmatpush.msrb.mxu2 %v3838_v31  ;;  %v3998_v35 = vld [vmem:[#allocation26 + $0xe8] sm:$0xff]  ;;  %v3979_v31 = vld [vmem:[#allocation26 + $0x50] sm:$0xff] }
 0x495   :  { %3768 = vmatpush.msra.mxu1 %v3478_v49  ;;  %3900 = vmatpush.msrb.mxu0 %v3821_v2  ;;  %v3863_v49 = vld [vmem:[#allocation23 + $0x170] sm:$0xff]  ;;  %v3977_v2 = vld [vmem:[#allocation26 + $0x40] sm:$0xff] }
 0x496   :  { %3933 = vmatpush.msrb.mxu2 %v3836_v34 }
 0x497   :  { %3769 = vmatpush.msra.mxu1 %v3476_v48  ;;  %v3864_v48 = vld [vmem:[#allocation23 + $0x178] sm:$0xff]  ;;  %3901 = vmatpush.msrb.mxu0 %v3819_v63 }
 0x498   :  { %3934 = vmatpush.msrb.mxu2 %v3834_v27  ;;  %v3975_v63 = vld [vmem:[#allocation26 + $0x30] sm:$0xff] }
 0x499   :  { %3770 = vmatpush.msra.mxu1 %v3474_v57  ;;  %v3818_v57 = vld [vmem:[#allocation23 + $0x8] sm:$0xff]  ;;  %3902 = vmatpush.msrb.mxu0 %v3817_v13 }
 0x49a   :  { %3935 = vmatpush.msrb.mxu2 %v3832_v54  ;;  %v3973_v13 = vld [vmem:[#allocation26 + $0x20] sm:$0xff] }
 0x49b   :  { %4005 = vmatpush.msra.mxu0 %v3984_v29 }
 0x49c   :  { %3936 = vmatpush.msrb.mxu2 %v3830_v3 }
 0x49d   :  { %4006 = vmatpush.msra.mxu0 %v3983_v6 }
 0x49e   :  { %3937 = vmatpush.msrb.mxu2 %v3828_v4 }
 0x49f   :  { %4007 = vmatpush.msra.mxu0 %v3982_v9 }
 0x4a0   :  { %3938 = vmatpush.msrb.mxu2 %v3826_v62 }
 0x4a1   :  { %4008 = vmatpush.msra.mxu0 %v3981_v0 }
 0x4a2   :  { %3939 = vmatpush.msrb.mxu2 %v3824_v52 }
 0x4a4   :  { %3940 = vmatpush.msrb.mxu2 %v3822_v8  ;;  %v3976_v8 = vld [vmem:[#allocation26 + $0x38] sm:$0xff] }
 0x4a6   :  { %3941 = vmatpush.msrb.mxu2 %v3820_v20  ;;  %v3974_v20 = vld [vmem:[#allocation26 + $0x28] sm:$0xff] }
 0x4a8   :  { %3942 = vmatpush.msrb.mxu2 %v3818_v57  ;;  %v3972_v57 = vld [vmem:[#allocation26 + $0x18] sm:$0xff] }
 0x4ab   :  { %v3348_v19 = vpop.f32.mrf.mxu2 }
 0x4ac   :  { %v3349_v60 = vadd.f32 %v3348_v19, %v3329_v17  ;;  %v3368_v22 = vpop.f32.mrf.mxu3  ;;  %v3856_v17 = vld [vmem:[#allocation23 + $0x138] sm:$0xff]  ;;  %v3571_v19 = vperm.slane %v3569_v16, 0 }
 0x4ae   :  { %v3369_v18 = vadd.f32 %v3368_v22, %v3349_v60  ;;  %v3853_v60 = vld [vmem:[#allocation23 + $0x120] sm:$0xff]  ;;  %v3854_v22 = vld [vmem:[#allocation23 + $0x128] sm:$0xff] }
 0x4b0   :  { %v3376_v12 = vmax.f32 %v3369_v18, 0.0  ;;  %v3851_v18 = vld [vmem:[#allocation23 + $0x110] sm:$0xff] }
 0x4b2   :  { %3691 = vmatmul.f32.vlgmr.msrb.gmra.mxu1 %v3376_v12  ;;  %3811 = vmatmul.f32.vlgmr.msra.gmra.mxu3 %v3376_v12  ;;  %v3592_v12 = vpop.f32.mrf.mxu0 }
 0x4b3   :  { %3907 = vmatpush.msrb.mxu1 %v3879_v40  ;;  %v3593_v39 = vadd.f32 %v3592_v12, %v3571_v19  ;;  %v3999_v40 = vld [vmem:[#allocation26 + $0xf0] sm:$0xff]  ;;  %v3986_v19 = vld [vmem:[#allocation26 + $0x88] sm:$0xff] }
 0x4b5   :  { %3908 = vmatpush.msrb.mxu1 %v3877_v51  ;;  %v3612_v51 = vpop.f32.mrf.mxu1 }
 0x4b7   :  { %3909 = vmatpush.msrb.mxu1 %v3875_v26  ;;  %v3980_v26 = vld [vmem:[#allocation26 + $0x58] sm:$0xff] }
 0x4b8   :  { %4009 = vmatpush.msra.mxu0 %v3980_v26 }
 0x4b9   :  { %3910 = vmatpush.msrb.mxu1 %v3873_v50 }
 0x4ba   :  { %3771 = vmatmul.f32.vlgmr.msra.gmra.mxu1 %v3374_v24  ;;  %v3878_v24 = vld [vmem:[#allocation23 + $0x1e8] sm:$0xff]  ;;  %4010 = vmatpush.msra.mxu0 %v3979_v31 }
 0x4bb   :  { %3948 = vmatpush.msrb.mxu3 %v3878_v24  ;;  %3911 = vmatpush.msrb.mxu1 %v3871_v10  ;;  %v3613_v24 = vadd.f32 %v3612_v51, %v3593_v39  ;;  %v3572_v10 = vperm.slane %v3569_v16, 1  ;;  %v3969_v16 = vld [vmem:[#allocation26] sm:$0xff] }
 0x4bc   :  { %v4205_v51 = vld [vmem:[#allocation28] ss:$0 sm:$0xff] }
 0x4bd   :  { %3949 = vmatpush.msrb.mxu3 %v3876_v36  ;;  %3912 = vmatpush.msrb.mxu1 %v3869_v33  ;;  %v3997_v36 = vld [vmem:[#allocation26 + $0xe0] sm:$0xff] }
 0x4bf   :  { %3950 = vmatpush.msrb.mxu3 %v3874_v32  ;;  %3913 = vmatpush.msrb.mxu1 %v3867_v55  ;;  %v3978_v32 = vld [vmem:[#allocation26 + $0x48] sm:$0xff] }
 0x4c0   :  { %4011 = vmatpush.msra.mxu0 %v3978_v32 }
 0x4c1   :  { %3951 = vmatpush.msrb.mxu3 %v3872_v61  ;;  %3914 = vmatpush.msrb.mxu1 %v3865_v7  ;;  %v3996_v7 = vld [vmem:[#allocation26 + $0xd8] sm:$0xff] }
 0x4c2   :  { %4012 = vmatpush.msra.mxu0 %v3977_v2 }
 0x4c3   :  { %3952 = vmatpush.msrb.mxu3 %v3870_v43  ;;  %3915 = vmatpush.msrb.mxu1 %v3863_v49  ;;  %v3994_v49 = vld [vmem:[#allocation26 + $0xc8] sm:$0xff] }
 0x4c4   :  { %4013 = vmatpush.msra.mxu0 %v3976_v8 }
 0x4c5   :  { %3953 = vmatpush.msrb.mxu3 %v3868_v56  ;;  %3916 = vmatpush.msrb.mxu1 %v3861_v38  ;;  %v3992_v38 = vld [vmem:[#allocation26 + $0xb8] sm:$0xff] }
 0x4c6   :  { %4014 = vmatpush.msra.mxu0 %v3975_v63 }
 0x4c7   :  { %3954 = vmatpush.msrb.mxu3 %v3866_v45  ;;  %3917 = vmatpush.msrb.mxu1 %v3859_v59  ;;  %v3995_v45 = vld [vmem:[#allocation26 + $0xd0] sm:$0xff] }
 0x4c8   :  { %4015 = vmatpush.msra.mxu0 %v3974_v20  ;;  %v3971_v59 = vld [vmem:[#allocation26 + $0x10] sm:$0xff] }
 0x4c9   :  { %3955 = vmatpush.msrb.mxu3 %v3864_v48  ;;  %3918 = vmatpush.msrb.mxu1 %v3857_v14  ;;  %v3993_v48 = vld [vmem:[#allocation26 + $0xc0] sm:$0xff]  ;;  %v3970_v14 = vld [vmem:[#allocation26 + $0x8] sm:$0xff] }
 0x4ca   :  { %4016 = vmatpush.msra.mxu0 %v3973_v13 }
 0x4cb   :  { %3956 = vmatpush.msrb.mxu3 %v3862_v41  ;;  %3919 = vmatpush.msrb.mxu1 %v3855_v1  ;;  %v3991_v41 = vld [vmem:[#allocation26 + $0xb0] sm:$0xff]  ;;  %v3988_v1 = vld [vmem:[#allocation26 + $0x98] sm:$0xff] }
 0x4cc   :  { %v3632_v28 = vpop.f32.mrf.mxu2  ;;  %4017 = vmatpush.msra.mxu0 %v3972_v57 }
 0x4cd   :  { %3957 = vmatpush.msrb.mxu3 %v3860_v44  ;;  %3920 = vmatpush.msrb.mxu1 %v3853_v60  ;;  %v3633_v42 = vadd.f32 %v3632_v28, %v3613_v24  ;;  %v3652_v23 = vpop.f32.mrf.mxu3  ;;  %v3990_v44 = vld [vmem:[#allocation26 + $0xa8] sm:$0xff]  ;;  %v3985_v60 = vld [vmem:[#allocation26 + $0x80] sm:$0xff] }
 0x4ce   :  { %4018 = vmatpush.msra.mxu0 %v3971_v59 }
 0x4cf   :  { %3958 = vmatpush.msrb.mxu3 %v3858_v15  ;;  %3921 = vmatpush.msrb.mxu1 %v3851_v18  ;;  %v3653_v34 = vadd.f32 %v3652_v23, %v3633_v42  ;;  %v3989_v15 = vld [vmem:[#allocation26 + $0xa0] sm:$0xff] }
 0x4d0   :  { %4019 = vmatpush.msra.mxu0 %v3970_v14 }
 0x4d1   :  { %3959 = vmatpush.msrb.mxu3 %v3856_v17  ;;  %3922 = vmatpush.msrb.mxu1 %v3849_v21  ;;  %v3987_v17 = vld [vmem:[#allocation26 + $0x90] sm:$0xff] }
 0x4d2   :  { %4020 = vmatpush.msra.mxu0 %v3969_v16 }
 0x4d3   :  { %3960 = vmatpush.msrb.mxu3 %v3854_v22  ;;  %4025 = vmatpush.msra.mxu1 %v4000_v46  ;;  %v3881_v22 = vld [vmem:[#allocation25] sm:$0x3] }
 0x4d4   :  { %v3883_v18 = vperm.slane %v3881_v22, 0  ;;  %v3884_v29 = vperm.slane %v3881_v22, 1 }
 0x4d5   :  { %3961 = vmatpush.msrb.mxu3 %v3852_v53  ;;  %4026 = vmatpush.msra.mxu1 %v3999_v40 }
 0x4d7   :  { %3962 = vmatpush.msrb.mxu3 %v3850_v30  ;;  %4027 = vmatpush.msra.mxu1 %v3998_v35 }
 0x4d9   :  { %4028 = vmatpush.msra.mxu1 %v3997_v36 }
 0x4db   :  { %4029 = vmatpush.msra.mxu1 %v3996_v7 }
 0x4dd   :  { %4030 = vmatpush.msra.mxu1 %v3995_v45 }
 0x4df   :  { %4031 = vmatpush.msra.mxu1 %v3994_v49 }
 0x4e1   :  { %4032 = vmatpush.msra.mxu1 %v3993_v48 }
 0x4e3   :  { %4033 = vmatpush.msra.mxu1 %v3992_v38 }
 0x4e5   :  { %4034 = vmatpush.msra.mxu1 %v3991_v41 }
 0x4e7   :  { %4035 = vmatpush.msra.mxu1 %v3990_v44 }
 0x4e9   :  { %4036 = vmatpush.msra.mxu1 %v3989_v15 }
 0x4eb   :  { %v3672_v50 = vpop.f32.mrf.mxu0  ;;  %4037 = vmatpush.msra.mxu1 %v3988_v1 }
 0x4ec   :  { %v3712_v61 = vpop.f32.mrf.mxu2  ;;  %v3673_v47 = vadd.f32 %v3672_v50, %v3653_v34 }
 0x4ed   :  { %v3713_v33 = vadd.f32 %v3712_v61, %v3572_v10  ;;  %v3732_v54 = vpop.f32.mrf.mxu3  ;;  %4038 = vmatpush.msra.mxu1 %v3987_v17 }
 0x4ef   :  { %v3733_v56 = vadd.f32 %v3732_v54, %v3713_v33  ;;  %4039 = vmatpush.msra.mxu1 %v3986_v19 }
 0x4f1   :  { %4040 = vmatpush.msra.mxu1 %v3985_v60 }
 0x4f5   :  { %v3752_v55 = vpop.f32.mrf.mxu0 }
 0x4f6   :  { %v3753_v25 = vadd.f32 %v3752_v55, %v3733_v56 }
 0x50c   :  { %v3792_v4 = vpop.f32.mrf.mxu2 }
 0x52f   :  { %v3692_v27 = vpop.f32.mrf.mxu1 }
 0x530   :  { %v3693_v43 = vadd.f32 %v3692_v27, %v3673_v47 }
 0x532   :  { %v3815_v37 = vmax.f32 %v3693_v43, 0.0 }
 0x534   :  { %3903 = vmatmul.f32.vlgmr.msrb.gmra.mxu0 %v3815_v37  ;;  %3943 = vmatmul.f32.vlgmr.msrb.gmra.mxu2 %v3815_v37 }
 0x535   :  { %v3812_v62 = vpop.f32.mrf.mxu3 }
 0x537   :  { %v3772_v3 = vpop.f32.mrf.mxu1 }
 0x538   :  { %v3773_v58 = vadd.f32 %v3772_v3, %v3753_v25 }
 0x53a   :  { %v3793_v5 = vadd.f32 %v3792_v4, %v3773_v58 }
 0x53c   :  { %v3813_v11 = vadd.f32 %v3812_v62, %v3793_v5 }
 0x53e   :  { %v3816_v52 = vmax.f32 %v3813_v11, 0.0 }
 0x540   :  { %3923 = vmatmul.f32.vlgmr.msrb.gmra.mxu1 %v3816_v52  ;;  %3963 = vmatmul.f32.vlgmr.msrb.gmra.mxu3 %v3816_v52 }
 0x5b1   :  { %v3904_v12 = vpop.f32.mrf.mxu0 }
 0x5b2   :  { %v3905_v53 = vadd.f32 %v3904_v12, %v3883_v18 }
 0x5b7   :  { %v3944_v30 = vpop.f32.mrf.mxu2 }
 0x5b8   :  { %v3945_v39 = vadd.f32 %v3944_v30, %v3884_v29 }
 0x5bd   :  { %v3924_v21 = vpop.f32.mrf.mxu1 }
 0x5be   :  { %v3925_v6 = vadd.f32 %v3924_v21, %v3905_v53 }
 0x5c0   :  { %v3967_v46 = vmax.f32 %v3925_v6, 0.0 }
 0x5c2   :  { %4021 = vmatmul.f32.vlgmr.msra.gmra.mxu0 %v3967_v46 }
 0x5c3   :  { %v3964_v9 = vpop.f32.mrf.mxu3 }
 0x5c4   :  { %v3965_v40 = vadd.f32 %v3964_v9, %v3945_v39 }
 0x5c6   :  { %v3968_v0 = vmax.f32 %v3965_v40, 0.0 }
 0x5c8   :  { %4041 = vmatmul.f32.vlgmr.msra.gmra.mxu1 %v3968_v0 }
 0x63f   :  { %v4022_v28 = vpop.f32.mrf.mxu0 }
 0x640   :  { %v4023_v35 = vadd.f32 %v4205_v51, %v4022_v28 }
 0x645   :  { %v4042_v24 = vpop.f32.mrf.mxu1 }
 0x646   :  { %v4043_v26 = vadd.f32 %v4042_v24, %v4023_v35 }
 0x648   :  { %4045 = vst [vmem:[%s5477_s20] sm:$0xff] %v4043_v26 }
 0x649   :  { %4050 = vsyncpa [#allocation4], 1 }
 0x64a   :  { %4051 = vsyncpa [#allocation6], 1 }
 0x64b   :  { %4052 = vsyncpa [#allocation9], 1 }
 0x64c   :  { %4053 = vsyncpa [#allocation12], 1 }
 0x64d   :  { %4054 = vsyncpa [#allocation15], 1 }
 0x64e   :  { %4055 = vsyncpa [#allocation18], 1 }
 0x64f   :  { %4056 = vsyncpa [#allocation21], 1 }
 0x650   :  { %4057 = vsyncpa [#allocation24], 1 }
 0x651   :  { %4058 = vsyncpa [#allocation27], 1 }

</bundles_post_ra>
